<compile_context>
chip_gen: v6e
topology: v6e:2x2x1
jax: 0.10.0
libtpu: 0.0.40
codegen_flags: <defaults>
</compile_context>

<pallas_src>
import functools
import math

import jax
import jax.numpy as jnp
from jax.experimental import pallas as pl
from jax.experimental.pallas import tpu as pltpu

_LN_EPS = 1e-5


# -----------------------------------------------------------------------------
# small shared helpers
# -----------------------------------------------------------------------------
def _layernorm(x, g, b):
    mean = jnp.mean(x, axis=-1, keepdims=True)
    c = x - mean
    var = jnp.mean(c * c, axis=-1, keepdims=True)
    return c * jax.lax.rsqrt(var + _LN_EPS) * g + b


def _row_tile(m, max_tile):
    return m if m <= max_tile else max_tile


# -----------------------------------------------------------------------------
# Linear: y = x @ W + b   (row-tiled, bf16 MXU operands, f32 accumulation)
# -----------------------------------------------------------------------------
def _linear_kernel(x_ref, w_ref, b_ref, o_ref):
    o_ref[...] = (
        jnp.dot(x_ref[...], w_ref[...], preferred_element_type=jnp.float32)
        + b_ref[...]
    )


def pallas_linear(x, w, b, *, max_tile=512):
    lead = x.shape[:-1]
    k = x.shape[-1]
    n_out = w.shape[-1]
    x2 = x.reshape(-1, k)
    m = x2.shape[0]
    tm = _row_tile(m, max_tile)
    out = pl.pallas_call(
        _linear_kernel,
        out_shape=jax.ShapeDtypeStruct((m, n_out), jnp.float32),
        grid=(pl.cdiv(m, tm),),
        in_specs=[
            pl.BlockSpec((tm, k), lambda i: (i, 0)),
            pl.BlockSpec((k, n_out), lambda i: (0, 0)),
            pl.BlockSpec((1, n_out), lambda i: (0, 0)),
        ],
        out_specs=pl.BlockSpec((tm, n_out), lambda i: (i, 0)),
        compiler_params=pltpu.CompilerParams(dimension_semantics=("parallel",)),
    )(x2.astype(jnp.bfloat16), w.astype(jnp.bfloat16),
      b.reshape(1, -1).astype(jnp.float32))
    return out.reshape(*lead, n_out)


# -----------------------------------------------------------------------------
# Fused LayerNorm -> Linear  (layer_norm_s -> linear_in)
# -----------------------------------------------------------------------------
def _ln_linear_kernel(x_ref, g_ref, b_ref, w_ref, wb_ref, o_ref):
    ln = _layernorm(x_ref[...], g_ref[...], b_ref[...])
    o_ref[...] = (
        jnp.dot(ln.astype(jnp.bfloat16), w_ref[...],
                preferred_element_type=jnp.float32)
        + wb_ref[...]
    )


def pallas_ln_linear(x, g, b, w, wb, *, max_tile=512):
    m, cin = x.shape
    n_out = w.shape[-1]
    tm = _row_tile(m, max_tile)
    return pl.pallas_call(
        _ln_linear_kernel,
        out_shape=jax.ShapeDtypeStruct((m, n_out), jnp.float32),
        grid=(pl.cdiv(m, tm),),
        in_specs=[
            pl.BlockSpec((tm, cin), lambda i: (i, 0)),
            pl.BlockSpec((1, cin), lambda i: (0, 0)),
            pl.BlockSpec((1, cin), lambda i: (0, 0)),
            pl.BlockSpec((cin, n_out), lambda i: (0, 0)),
            pl.BlockSpec((1, n_out), lambda i: (0, 0)),
        ],
        out_specs=pl.BlockSpec((tm, n_out), lambda i: (i, 0)),
        compiler_params=pltpu.CompilerParams(dimension_semantics=("parallel",)),
    )(x.astype(jnp.float32), g.reshape(1, -1).astype(jnp.float32),
      b.reshape(1, -1).astype(jnp.float32), w.astype(jnp.bfloat16),
      wb.reshape(1, -1).astype(jnp.float32))


# -----------------------------------------------------------------------------
# Fused pair-side pass:  LayerNorm(z) -> (bf16 z, scaled pair bias) in ONE read
# of z from HBM.  The sqrt(1/3) logits scale is folded into (w, wb) by the caller.
# -----------------------------------------------------------------------------
def _ln_z_bias_kernel(z_ref, g_ref, b_ref, w_ref, wb_ref, z16_ref, bias_ref):
    ln = _layernorm(z_ref[...], g_ref[...], b_ref[...])
    ln16 = ln.astype(jnp.bfloat16)
    z16_ref[...] = ln16
    bias_ref[...] = (
        jnp.dot(ln16, w_ref[...], preferred_element_type=jnp.float32)
        + wb_ref[...]
    )


def pallas_ln_z_bias(z2, g, b, w, wb, *, max_tile=1024):
    m, cz = z2.shape
    h = w.shape[-1]
    tm = _row_tile(m, max_tile)
    return pl.pallas_call(
        _ln_z_bias_kernel,
        out_shape=(jax.ShapeDtypeStruct((m, cz), jnp.bfloat16),
                   jax.ShapeDtypeStruct((m, h), jnp.float32)),
        grid=(pl.cdiv(m, tm),),
        in_specs=[
            pl.BlockSpec((tm, cz), lambda i: (i, 0)),
            pl.BlockSpec((1, cz), lambda i: (0, 0)),
            pl.BlockSpec((1, cz), lambda i: (0, 0)),
            pl.BlockSpec((cz, h), lambda i: (0, 0)),
            pl.BlockSpec((1, h), lambda i: (0, 0)),
        ],
        out_specs=(pl.BlockSpec((tm, cz), lambda i: (i, 0)),
                   pl.BlockSpec((tm, h), lambda i: (i, 0))),
        compiler_params=pltpu.CompilerParams(dimension_semantics=("parallel",)),
    )(z2.astype(jnp.float32), g.reshape(1, -1).astype(jnp.float32),
      b.reshape(1, -1).astype(jnp.float32), w.astype(jnp.bfloat16),
      wb.reshape(1, -1).astype(jnp.float32))


# -----------------------------------------------------------------------------
# Fused per-block update:
#   x = LN_ipa(s + ipa_out); x = transition_layers(x); x = LN_trans(x)
#   outputs (x, bb_update_linear(x))     (dropout = identity at inference)
# -----------------------------------------------------------------------------
def _block_update_kernel(s_ref, d_ref, g1_ref, gb1_ref, w1_ref, b1_ref,
                         w2_ref, b2_ref, w3_ref, b3_ref, g2_ref, gb2_ref,
                         bbw_ref, bbb_ref, s_out_ref, upd_ref, *, n_layers):
    x = s_ref[...] + d_ref[...]
    x = _layernorm(x, g1_ref[...], gb1_ref[...])
    for l in range(n_layers):
        h = jnp.dot(x.astype(jnp.bfloat16), w1_ref[l],
                    preferred_element_type=jnp.float32) + b1_ref[l]
        h = jnp.maximum(h, 0.0)
        h = jnp.dot(h.astype(jnp.bfloat16), w2_ref[l],
                    preferred_element_type=jnp.float32) + b2_ref[l]
        h = jnp.maximum(h, 0.0)
        h = jnp.dot(h.astype(jnp.bfloat16), w3_ref[l],
                    preferred_element_type=jnp.float32) + b3_ref[l]
        x = x + h
    x = _layernorm(x, g2_ref[...], gb2_ref[...])
    s_out_ref[...] = x
    upd_ref[...] = (
        jnp.dot(x.astype(jnp.bfloat16), bbw_ref[...],
                preferred_element_type=jnp.float32)
        + bbb_ref[...]
    )


def pallas_block_update(s, ipa_out, params, cfg, *, max_tile=512):
    n, c = s.shape
    nl = cfg["no_transition_layers"]
    tr = params["transition"]
    tm = _row_tile(n, max_tile)
    row = lambda i: (i, 0)
    const2 = lambda i: (0, 0)
    const3 = lambda i: (0, 0, 0)
    kernel = functools.partial(_block_update_kernel, n_layers=nl)
    return pl.pallas_call(
        kernel,
        out_shape=(jax.ShapeDtypeStruct((n, c), jnp.float32),
                   jax.ShapeDtypeStruct((n, 6), jnp.float32)),
        grid=(pl.cdiv(n, tm),),
        in_specs=[
            pl.BlockSpec((tm, c), row),
            pl.BlockSpec((tm, c), row),
            pl.BlockSpec((1, c), const2),
            pl.BlockSpec((1, c), const2),
            pl.BlockSpec((nl, c, c), const3),
            pl.BlockSpec((nl, 1, c), const3),
            pl.BlockSpec((nl, c, c), const3),
            pl.BlockSpec((nl, 1, c), const3),
            pl.BlockSpec((nl, c, c), const3),
            pl.BlockSpec((nl, 1, c), const3),
            pl.BlockSpec((1, c), const2),
            pl.BlockSpec((1, c), const2),
            pl.BlockSpec((c, 6), const2),
            pl.BlockSpec((1, 6), const2),
        ],
        out_specs=(pl.BlockSpec((tm, c), row), pl.BlockSpec((tm, 6), row)),
        compiler_params=pltpu.CompilerParams(dimension_semantics=("parallel",)),
    )(
        s.astype(jnp.float32), ipa_out.astype(jnp.float32),
        params["ln_ipa_g"].reshape(1, -1), params["ln_ipa_b"].reshape(1, -1),
        tr["w1"].astype(jnp.bfloat16), tr["b1"].astype(jnp.float32),
        tr["w2"].astype(jnp.bfloat16), tr["b2"].astype(jnp.float32),
        tr["w3"].astype(jnp.bfloat16), tr["b3"].astype(jnp.float32),
        params["ln_trans_g"].reshape(1, -1), params["ln_trans_b"].reshape(1, -1),
        params["bb_w"].astype(jnp.bfloat16), params["bb_b"].reshape(1, -1),
    )


# -----------------------------------------------------------------------------
# IPA attention core (gridded over query tiles, z streamed per tile)
#   q        : [H, N, C]      bf16, pre-scaled by sqrt(1/(3C))
#   k, v     : [H, N, C]      bf16
#   qp, kp   : [H, N, Pq*3]   f32, pre-scaled per head by sqrt(0.5*softplus(hw)*wc)
#   kn       : [H, 1, N]      f32, = sum(kp^2, -1)
#   vp       : [H, N, Pv*3]   bf16
#   bias     : [H, N, N]      f32, = sqrt(1/3)*linear_b(z) + mask bias
#   z        : [N, N, Cz]     bf16
# outputs: o [H,N,C] f32, o_pt [H,N,Pv*3] f32, o_pair [N,H,Cz] f32 (lane-dense)
# -----------------------------------------------------------------------------
def _ipa_attention_kernel(q_ref, k_ref, v_ref, qp_ref, kp_ref, kn_ref, vp_ref,
                          bias_ref, z_ref, o_ref, opt_ref, opair_ref):
    # scalar q.k^T logits (head-batched matmul, contraction on the last dims)
    logits = jnp.einsum("hqc,hkc->hqk", q_ref[...], k_ref[...],
                        preferred_element_type=jnp.float32)
    # pair bias + mask bias (precomputed)
    logits = logits + bias_ref[...]
    # point-distance term decomposed: -(|q|^2 + |k|^2 - 2 q.k), cross term on MXU
    qp = qp_ref[...]
    cross = jnp.einsum("hqp,hkp->hqk", qp, kp_ref[...],
                       preferred_element_type=jnp.float32)
    logits = logits + 2.0 * cross
    logits = logits - jnp.sum(qp * qp, axis=-1, keepdims=True)
    logits = logits - kn_ref[...]

    # softmax over keys; reciprocal goes to the EUP
    logits = logits - jnp.max(logits, axis=-1, keepdims=True)
    e = jnp.exp(logits)
    attn = e * pl.reciprocal(jnp.sum(e, axis=-1, keepdims=True), approx=True)
    attn16 = attn.astype(jnp.bfloat16)

    # attention-weighted values / value points (head-batched MXU matmuls)
    o_ref[...] = jnp.einsum("hqk,hkc->hqc", attn16, v_ref[...],
                            preferred_element_type=jnp.float32)
    opt_ref[...] = jnp.einsum("hqk,hkp->hqp", attn16, vp_ref[...],
                              preferred_element_type=jnp.float32)

    # o_pair: per query row, [H, N_k] @ [N_k, C_z] on the MXU (batched over the
    # query rows of this tile).  Re-layout the attention to query-major first.
    attn_q = pltpu.einshape("hqk->qhk", attn).astype(jnp.bfloat16)
    opair_ref[...] = jnp.einsum("qhk,qkc->qhc", attn_q, z_ref[...],
                                preferred_element_type=jnp.float32)


def pallas_ipa_attention(q, k, v, qp, kp, kn, vp, bias, z, *, max_q_tile=128):
    heads, n, c = q.shape
    p3q = qp.shape[-1]
    p3v = vp.shape[-1]
    cz = z.shape[-1]
    tq = n if n <= max_q_tile else max_q_tile
    qrow = lambda i: (0, i, 0)
    const = lambda i: (0, 0, 0)
    zrow = lambda i: (i, 0, 0)
    return pl.pallas_call(
        _ipa_attention_kernel,
        out_shape=(
            jax.ShapeDtypeStruct((heads, n, c), jnp.float32),
            jax.ShapeDtypeStruct((heads, n, p3v), jnp.float32),
            jax.ShapeDtypeStruct((n, heads, cz), jnp.float32),
        ),
        grid=(pl.cdiv(n, tq),),
        in_specs=[
            pl.BlockSpec((heads, tq, c), qrow),     # q
            pl.BlockSpec((heads, n, c), const),     # k
            pl.BlockSpec((heads, n, c), const),     # v
            pl.BlockSpec((heads, tq, p3q), qrow),   # q points (scaled)
            pl.BlockSpec((heads, n, p3q), const),   # k points (scaled)
            pl.BlockSpec((heads, 1, n), const),     # |k points|^2
            pl.BlockSpec((heads, n, p3v), const),   # v points
            pl.BlockSpec((heads, tq, n), qrow),     # pair bias + mask bias
            pl.BlockSpec((tq, n, cz), zrow),        # z tile
        ],
        out_specs=(
            pl.BlockSpec((heads, tq, c), qrow),
            pl.BlockSpec((heads, tq, p3v), qrow),
            pl.BlockSpec((tq, heads, cz), zrow),
        ),
        compiler_params=pltpu.CompilerParams(
            dimension_semantics=("parallel",),
            vmem_limit_bytes=64 * 1024 * 1024,
        ),
    )(q, k, v, qp, kp, kn, vp, bias, z)


# -----------------------------------------------------------------------------
# Rigid3Array helpers (rotation matrix [.., 3, 3] + translation [.., 3]) — glue
# -----------------------------------------------------------------------------
def quat_to_rot(qw, qx, qy, qz, eps=1e-6):
    inv = jax.lax.rsqrt(jnp.maximum(qw * qw + qx * qx + qy * qy + qz * qz, eps))
    w, x, y, z = qw * inv, qx * inv, qy * inv, qz * inv
    row0 = jnp.stack([1 - 2 * (y * y + z * z), 2 * (x * y - w * z), 2 * (x * z + w * y)], -1)
    row1 = jnp.stack([2 * (x * y + w * z), 1 - 2 * (x * x + z * z), 2 * (y * z - w * x)], -1)
    row2 = jnp.stack([2 * (x * z - w * y), 2 * (y * z + w * x), 1 - 2 * (x * x + y * y)], -1)
    return jnp.stack([row0, row1, row2], axis=-2)


def rigid_apply(rot, trans, pts):
    return jnp.einsum("...ij,...j->...i", rot, pts) + trans


def rigid_invert_apply(rot, trans, pts):
    return jnp.einsum("...ji,...j->...i", rot, pts - trans)


def rigid_compose(rot1, t1, rot2, t2):
    rot = jnp.einsum("...ik,...kj->...ij", rot1, rot2)
    t = jnp.einsum("...ij,...j->...i", rot1, t2) + t1
    return rot, t


# -----------------------------------------------------------------------------
# InvariantPointAttention forward (non-multimer branch)
# -----------------------------------------------------------------------------
def _points_to_global(flat, rot, trans, heads, npts):
    n = flat.shape[0]
    pts = jnp.stack(jnp.split(flat, 3, axis=-1), axis=-1)   # [N, H*P, 3]
    pts = rigid_apply(rot[:, None], trans[:, None], pts)    # global frame
    return pts.reshape(n, heads, npts, 3)


def ipa_forward(p, cfg, s, z16, bias_full, rot, trans):
    n = s.shape[0]
    heads, c = cfg["no_heads_ipa"], cfg["c_ipa"]
    pq, pv, cz = cfg["no_qk_points"], cfg["no_v_points"], cfg["c_z"]
    hc = heads * c
    hpq = heads * pq * 3

    # fused projection of s: q | kv | q_pts | kv_pts  (single matmul)
    proj = pallas_linear(s, p["fused_w"], p["fused_b"])
    q = proj[:, :hc].reshape(n, heads, c)
    kv = proj[:, hc:3 * hc].reshape(n, heads, 2 * c)
    k, v = kv[..., :c], kv[..., c:]
    q_pts = _points_to_global(proj[:, 3 * hc:3 * hc + hpq], rot, trans, heads, pq)
    kv_pts = _points_to_global(proj[:, 3 * hc + hpq:], rot, trans, heads, pq + pv)
    k_pts, v_pts = kv_pts[:, :, :pq], kv_pts[:, :, pq:]

    # fold the scalar scales into the operands
    scale_qk = math.sqrt(1.0 / (3 * c))
    wc = math.sqrt(1.0 / (3.0 * (pq * 9.0 / 2.0)))
    g = jnp.sqrt(0.5 * wc * jax.nn.softplus(p["head_weights"]))        # [H]

    q_t = (jnp.transpose(q, (1, 0, 2)) * scale_qk).astype(jnp.bfloat16)
    k_t = jnp.transpose(k, (1, 0, 2)).astype(jnp.bfloat16)
    v_t = jnp.transpose(v, (1, 0, 2)).astype(jnp.bfloat16)
    qp_t = jnp.transpose(q_pts, (1, 0, 2, 3)).reshape(heads, n, pq * 3) * g[:, None, None]
    kp_t = jnp.transpose(k_pts, (1, 0, 2, 3)).reshape(heads, n, pq * 3) * g[:, None, None]
    kn = jnp.sum(kp_t * kp_t, axis=-1)[:, None, :]                     # [H, 1, N]
    vp_t = jnp.transpose(v_pts, (1, 0, 2, 3)).reshape(heads, n, pv * 3).astype(jnp.bfloat16)

    o, o_pt, o_pair = pallas_ipa_attention(
        q_t, k_t, v_t, qp_t.astype(jnp.float32), kp_t.astype(jnp.float32),
        kn.astype(jnp.float32), vp_t, bias_full, z16)

    o = jnp.transpose(o, (1, 0, 2)).reshape(n, hc)
    o_pt = jnp.transpose(o_pt, (1, 0, 2)).reshape(n, heads, pv, 3)
    o_pt = rigid_invert_apply(rot[:, None, None], trans[:, None, None], o_pt)
    o_pt_norm = jnp.sqrt(jnp.sum(o_pt * o_pt, axis=-1) + cfg["epsilon"]).reshape(n, heads * pv)
    o_pt = o_pt.reshape(n, heads * pv, 3)
    o_pair = o_pair.reshape(n, heads * cz)

    concat = jnp.concatenate(
        [o, o_pt[..., 0], o_pt[..., 1], o_pt[..., 2], o_pt_norm, o_pair], axis=-1)
    return pallas_linear(concat, p["out_w"], p["out_b"])


# -----------------------------------------------------------------------------
# StructureModule forward (inference mode: dropout = identity)
# -----------------------------------------------------------------------------
def structure_module_forward(params, cfg, s, z, aatype, asym_id, mask=None):
    n = s.shape[0]
    heads, cz = cfg["no_heads_ipa"], cfg["c_z"]
    if mask is None:
        mask = jnp.ones((n,), dtype=jnp.float32)

    ipa_p = params["ipa"]

    # Fused LayerNorm(s) -> linear_in.
    # NOTE: s_initial (post-LN s) only feeds the angle resnet in the reference,
    # which is not part of this forward's outputs, so it is not kept.
    s = pallas_ln_linear(s, params["ln_s_g"], params["ln_s_b"],
                         params["lin_in_w"], params["lin_in_b"])

    # Pair-dependent terms do not change across blocks: one fused pass over z
    # produces both the bf16 LayerNorm(z) (for o_pair) and the scaled pair bias.
    scale_b = math.sqrt(1.0 / 3.0)
    z16_2, b2 = pallas_ln_z_bias(
        z.reshape(n * n, cz), params["ln_z_g"], params["ln_z_b"],
        ipa_p["b_w"] * scale_b, ipa_p["b_b"] * scale_b)
    z16 = z16_2.reshape(n, n, cz)
    mask_bias = cfg["inf"] * (mask[:, None] * mask[None, :] - 1.0)
    bias_full = (jnp.transpose(b2.reshape(n, n, heads), (2, 0, 1))
                 + mask_bias[None, :, :]).astype(jnp.float32)          # [H, N, N]

    rot = jnp.broadcast_to(jnp.eye(3, dtype=jnp.float32), (n, 3, 3))
    trans = jnp.zeros((n, 3), dtype=jnp.float32)

    frames_l, pos_l, gln_l = [], [], []
    for i in range(cfg["no_blocks"]):
        delta = ipa_forward(ipa_p, cfg, s, z16, bias_full, rot, trans)
        # residual + LN_ipa + transition + LN_trans + bb_update, fused.
        s, upd = pallas_block_update(s, delta, params, cfg)

        rot_u = quat_to_rot(jnp.ones_like(upd[:, 0]), upd[:, 0], upd[:, 1], upd[:, 2])
        trans_u = upd[:, 3:6]
        rot, trans = rigid_compose(rot, trans, rot_u, trans_u)

        trans_sc = trans * cfg["trans_scale_factor"]
        frame = jnp.zeros((n, 4, 4), jnp.float32)
        frame = frame.at[:, :3, :3].set(rot)
        frame = frame.at[:, :3, 3].set(trans_sc)
        frame = frame.at[:, 3, 3].set(1.0)

        # frames_and_literature_positions_to_backb_pos
        lit = params["lit_positions"][aatype]                 # [N, 14, 3]
        lit5 = lit[:, :5, :]
        pred = jnp.einsum("nij,nkj->nki", rot, lit5) + trans_sc[:, None, :]
        pred_xyz = pred[:, jnp.array([0, 1, 2, 4]), :]

        frames_l.append(frame)
        pos_l.append(pred_xyz)
        # TODO(synk): backb_pos_to_gln_matrix (Gauss linking number matrix) is not in
        # the provided reference source; emitting a zeros placeholder of shape [N, N].
        gln_l.append(jnp.zeros((n, n), jnp.float32))

        if i < cfg["no_blocks"] - 1:
            rot = jax.lax.stop_gradient(rot)   # stop_rot_gradient (forward no-op)

    return {
        "frames": jnp.stack(frames_l),       # [no_blocks, N, 4, 4]
        "positions": jnp.stack(pos_l),       # [no_blocks, N, 4, 3]
        "gln_matrix": jnp.stack(gln_l),      # [no_blocks, N, N]
    }


# -----------------------------------------------------------------------------
# Deterministic parameter initialization (synthetic; shapes from __init__)
# -----------------------------------------------------------------------------
def init_params(key, cfg):
    c_s, c_z, c_ipa = cfg["c_s"], cfg["c_z"], cfg["c_ipa"]
    heads, pq, pv = cfg["no_heads_ipa"], cfg["no_qk_points"], cfg["no_v_points"]
    n_layers = cfg["no_transition_layers"]
    keys = iter(jax.random.split(key, 64))

    def lin(cin, cout, w_scale=0.05, b_scale=0.01):
        w = w_scale * jax.random.normal(next(keys), (cin, cout), jnp.float32)
        b = b_scale * jax.random.normal(next(keys), (cout,), jnp.float32)
        return w, b

    # IPA projections (q | kv | q_pts | kv_pts fused into a single matmul)
    q_w, q_b = lin(c_s, heads * c_ipa)
    kv_w, kv_b = lin(c_s, 2 * heads * c_ipa)
    qp_w, qp_b = lin(c_s, heads * pq * 3)
    kvp_w, kvp_b = lin(c_s, heads * (pq + pv) * 3)
    b_w, b_b = lin(c_z, heads)
    out_w, out_b = lin(heads * (c_z + c_ipa + pv * 4), c_s)
    ipa = {
        "fused_w": jnp.concatenate([q_w, kv_w, qp_w, kvp_w], axis=1),
        "fused_b": jnp.concatenate([q_b, kv_b, qp_b, kvp_b], axis=0),
        "b_w": b_w, "b_b": b_b,
        "head_weights": jnp.full((heads,), math.log(math.e - 1.0), jnp.float32),
        "out_w": out_w, "out_b": out_b,
    }

    # transition layers, stacked along a leading layer dimension
    w1s, b1s, w2s, b2s, w3s, b3s = [], [], [], [], [], []
    for _ in range(n_layers):
        w1, b1 = lin(c_s, c_s)
        w2, b2 = lin(c_s, c_s)
        w3, b3 = lin(c_s, c_s)
        w1s.append(w1); b1s.append(b1.reshape(1, -1))
        w2s.append(w2); b2s.append(b2.reshape(1, -1))
        w3s.append(w3); b3s.append(b3.reshape(1, -1))
    transition = {
        "w1": jnp.stack(w1s), "b1": jnp.stack(b1s),
        "w2": jnp.stack(w2s), "b2": jnp.stack(b2s),
        "w3": jnp.stack(w3s), "b3": jnp.stack(b3s),
    }

    bb_w, bb_b = lin(c_s, 6)
    lin_in_w, lin_in_b = lin(c_s, c_s)

    return {
        "ln_s_g": jnp.ones((c_s,), jnp.float32), "ln_s_b": jnp.zeros((c_s,), jnp.float32),
        "ln_z_g": jnp.ones((c_z,), jnp.float32), "ln_z_b": jnp.zeros((c_z,), jnp.float32),
        "lin_in_w": lin_in_w, "lin_in_b": lin_in_b,
        "ipa": ipa,
        "ln_ipa_g": jnp.ones((c_s,), jnp.float32), "ln_ipa_b": jnp.zeros((c_s,), jnp.float32),
        "transition": transition,
        "ln_trans_g": jnp.ones((c_s,), jnp.float32), "ln_trans_b": jnp.zeros((c_s,), jnp.float32),
        "bb_w": bb_w, "bb_b": bb_b,
        # synthetic restype_atom14_rigid_group_positions-like constant table [21, 14, 3]
        "lit_positions": 0.5 * jax.random.normal(next(keys), (21, 14, 3), jnp.float32),
    }


# -----------------------------------------------------------------------------
if __name__ == "__main__":
    cfg = dict(
        c_s=32, c_z=16, c_ipa=16, c_resnet=16,
        no_heads_ipa=4, no_qk_points=4, no_v_points=8,
        dropout_rate=0.1, no_blocks=2, no_transition_layers=1,
        no_resnet_blocks=2, no_angles=7,
        trans_scale_factor=10.0, epsilon=1e-8, inf=1e5,
    )
    N = 8
    key = jax.random.PRNGKey(0)
    k_s, k_z, k_aa, k_p = jax.random.split(key, 4)
    s = jax.random.normal(k_s, (N, cfg["c_s"]), jnp.float32)
    z = jax.random.normal(k_z, (N, N, cfg["c_z"]), jnp.float32)
    aatype = jax.random.randint(k_aa, (N,), 0, 21)
    asym_id = jnp.zeros((N,), jnp.int32)

    params = init_params(k_p, cfg)

    fwd = jax.jit(functools.partial(structure_module_forward, params, cfg))
    out = fwd(s, z, aatype, asym_id)
    jax.tree_util.tree_map(jax.block_until_ready, out)

    assert out["frames"].shape == (cfg["no_blocks"], N, 4, 4)
    assert out["positions"].shape == (cfg["no_blocks"], N, 4, 3)
    assert out["gln_matrix"].shape == (cfg["no_blocks"], N, N)
    assert all(bool(jnp.all(jnp.isfinite(v))) for v in out.values())
    print("KERNEL_OK")
</pallas_src>

<mosaic_0001>
module attributes {stable_mosaic.version = 11 : i64} {
  func.func @_linear_kernel(%arg0: i32, %arg1: memref<8x32xbf16, #tpu.memory_space<vmem>>, %arg2: memref<32x384xbf16, #tpu.memory_space<vmem>>, %arg3: memref<1x384xf32, #tpu.memory_space<vmem>>, %arg4: memref<8x384xf32, #tpu.memory_space<vmem>>) attributes {dimension_semantics = [#tpu.dimension_semantics<parallel>], iteration_bounds = array<i64: 1>, scalar_prefetch = 0 : i64, scratch_operands = 0 : i64, tpu.core_type = #tpu.core_type<tc>, window_params = [{transform_indices = @transform_0, window_bounds = array<i64: 8, 32>}, {pipeline_mode = #tpu.pipeline_mode<synchronous>, transform_indices = @transform_1, window_bounds = array<i64: 32, 384>}, {pipeline_mode = #tpu.pipeline_mode<synchronous>, transform_indices = @transform_2, window_bounds = array<i64: 1, 384>}, {transform_indices = @transform_3, window_bounds = array<i64: 8, 384>}]} {
    %c0 = arith.constant 0 : index
    %c0_0 = arith.constant 0 : index
    %0 = vector.load %arg1[%c0, %c0_0] : memref<8x32xbf16, #tpu.memory_space<vmem>>, vector<8x32xbf16>
    %c0_1 = arith.constant 0 : index
    %c0_2 = arith.constant 0 : index
    %1 = vector.load %arg2[%c0_1, %c0_2] : memref<32x384xbf16, #tpu.memory_space<vmem>>, vector<32x384xbf16>
    %cst = arith.constant dense<0.000000e+00> : vector<8x384xf32>
    %2 = tpu.matmul %0, %1, %cst {dimension_numbers = #tpu.dot_dimension_numbers<[1], [0], [0], [1], [0, 0, 1, 1], [], []>} : vector<8x32xbf16>, vector<32x384xbf16>, vector<8x384xf32> -> vector<8x384xf32>
    %c0_3 = arith.constant 0 : index
    %c0_4 = arith.constant 0 : index
    %3 = vector.load %arg3[%c0_3, %c0_4] : memref<1x384xf32, #tpu.memory_space<vmem>>, vector<1x384xf32>
    %4 = vector.broadcast %3 : vector<1x384xf32> to vector<8x384xf32>
    %5 = arith.addf %2, %4 : vector<8x384xf32>
    %c0_5 = arith.constant 0 : index
    %c0_6 = arith.constant 0 : index
    %6 = vector.load %arg4[%c0_5, %c0_6] : memref<8x384xf32, #tpu.memory_space<vmem>>, vector<8x384xf32>
    tpu.vector_store %arg4[%c0_5, %c0_6], %5 {strides = array<i32>} : memref<8x384xf32, #tpu.memory_space<vmem>>, vector<8x384xf32>,
    return
  }
  func.func @transform_0(%arg0: i32) -> (i32, i32) {
    %c0_i32 = arith.constant 0 : i32
    %c0_i32_0 = arith.constant 0 : i32
    return %arg0, %c0_i32 : i32, i32
  }
  func.func @transform_1(%arg0: i32) -> (i32, i32) {
    %c0_i32 = arith.constant 0 : i32
    %c0_i32_0 = arith.constant 0 : i32
    %c0_i32_1 = arith.constant 0 : i32
    return %c0_i32, %c0_i32_0 : i32, i32
  }
  func.func @transform_2(%arg0: i32) -> (i32, i32) {
    %c0_i32 = arith.constant 0 : i32
    %c0_i32_0 = arith.constant 0 : i32
    %c0_i32_1 = arith.constant 0 : i32
    return %c0_i32, %c0_i32_0 : i32, i32
  }
  func.func @transform_3(%arg0: i32) -> (i32, i32) {
    %c0_i32 = arith.constant 0 : i32
    %c0_i32_0 = arith.constant 0 : i32
    return %arg0, %c0_i32 : i32, i32
  }
}

module attributes {stable_mosaic.version = 11 : i64} {
  func.func @_ln_linear_kernel(%arg0: i32, %arg1: memref<8x32xf32, #tpu.memory_space<vmem>>, %arg2: memref<1x32xf32, #tpu.memory_space<vmem>>, %arg3: memref<1x32xf32, #tpu.memory_space<vmem>>, %arg4: memref<32x32xbf16, #tpu.memory_space<vmem>>, %arg5: memref<1x32xf32, #tpu.memory_space<vmem>>, %arg6: memref<8x32xf32, #tpu.memory_space<vmem>>) attributes {dimension_semantics = [#tpu.dimension_semantics<parallel>], iteration_bounds = array<i64: 1>, scalar_prefetch = 0 : i64, scratch_operands = 0 : i64, tpu.core_type = #tpu.core_type<tc>, window_params = [{transform_indices = @transform_0, window_bounds = array<i64: 8, 32>}, {pipeline_mode = #tpu.pipeline_mode<synchronous>, transform_indices = @transform_1, window_bounds = array<i64: 1, 32>}, {pipeline_mode = #tpu.pipeline_mode<synchronous>, transform_indices = @transform_2, window_bounds = array<i64: 1, 32>}, {pipeline_mode = #tpu.pipeline_mode<synchronous>, transform_indices = @transform_3, window_bounds = array<i64: 32, 32>}, {pipeline_mode = #tpu.pipeline_mode<synchronous>, transform_indices = @transform_4, window_bounds = array<i64: 1, 32>}, {transform_indices = @transform_5, window_bounds = array<i64: 8, 32>}]} {
    %c0 = arith.constant 0 : index
    %c0_0 = arith.constant 0 : index
    %0 = vector.load %arg1[%c0, %c0_0] : memref<8x32xf32, #tpu.memory_space<vmem>>, vector<8x32xf32>
    %c0_1 = arith.constant 0 : index
    %c0_2 = arith.constant 0 : index
    %1 = vector.load %arg2[%c0_1, %c0_2] : memref<1x32xf32, #tpu.memory_space<vmem>>, vector<1x32xf32>
    %c0_3 = arith.constant 0 : index
    %c0_4 = arith.constant 0 : index
    %2 = vector.load %arg3[%c0_3, %c0_4] : memref<1x32xf32, #tpu.memory_space<vmem>>, vector<1x32xf32>
    %cst = arith.constant dense<0.000000e+00> : vector<8xf32>
    %3 = vector.multi_reduction <add>, %0, %cst [1] : vector<8x32xf32> to vector<8xf32>
    %4 = vector.shape_cast %3 : vector<8xf32> to vector<8x1xf32>
    %cst_5 = arith.constant 3.200000e+01 : f32
    %5 = vector.broadcast %cst_5 : f32 to vector<8x1xf32>
    %6 = arith.divf %4, %5 : vector<8x1xf32>
    %7 = vector.broadcast %6 : vector<8x1xf32> to vector<8x32xf32>
    %8 = arith.subf %0, %7 : vector<8x32xf32>
    %9 = arith.mulf %8, %8 : vector<8x32xf32>
    %cst_6 = arith.constant dense<0.000000e+00> : vector<8xf32>
    %10 = vector.multi_reduction <add>, %9, %cst_6 [1] : vector<8x32xf32> to vector<8xf32>
    %11 = vector.shape_cast %10 : vector<8xf32> to vector<8x1xf32>
    %cst_7 = arith.constant 3.200000e+01 : f32
    %12 = vector.broadcast %cst_7 : f32 to vector<8x1xf32>
    %13 = arith.divf %11, %12 : vector<8x1xf32>
    %cst_8 = arith.constant 9.99999974E-6 : f32
    %14 = vector.broadcast %cst_8 : f32 to vector<8x1xf32>
    %15 = arith.addf %13, %14 : vector<8x1xf32>
    %16 = math.rsqrt %15 : vector<8x1xf32>
    %17 = vector.broadcast %16 : vector<8x1xf32> to vector<8x32xf32>
    %18 = arith.mulf %8, %17 : vector<8x32xf32>
    %19 = vector.broadcast %1 : vector<1x32xf32> to vector<8x32xf32>
    %20 = arith.mulf %18, %19 : vector<8x32xf32>
    %21 = vector.broadcast %2 : vector<1x32xf32> to vector<8x32xf32>
    %22 = arith.addf %20, %21 : vector<8x32xf32>
    %23 = arith.truncf %22 : vector<8x32xf32> to vector<8x32xbf16>
    %c0_9 = arith.constant 0 : index
    %c0_10 = arith.constant 0 : index
    %24 = vector.load %arg4[%c0_9, %c0_10] : memref<32x32xbf16, #tpu.memory_space<vmem>>, vector<32x32xbf16>
    %cst_11 = arith.constant dense<0.000000e+00> : vector<8x32xf32>
    %25 = tpu.matmul %23, %24, %cst_11 {dimension_numbers = #tpu.dot_dimension_numbers<[1], [0], [0], [1], [0, 0, 1, 1], [], []>} : vector<8x32xbf16>, vector<32x32xbf16>, vector<8x32xf32> -> vector<8x32xf32>
    %c0_12 = arith.constant 0 : index
    %c0_13 = arith.constant 0 : index
    %26 = vector.load %arg5[%c0_12, %c0_13] : memref<1x32xf32, #tpu.memory_space<vmem>>, vector<1x32xf32>
    %27 = vector.broadcast %26 : vector<1x32xf32> to vector<8x32xf32>
    %28 = arith.addf %25, %27 : vector<8x32xf32>
    %c0_14 = arith.constant 0 : index
    %c0_15 = arith.constant 0 : index
    %29 = vector.load %arg6[%c0_14, %c0_15] : memref<8x32xf32, #tpu.memory_space<vmem>>, vector<8x32xf32>
    tpu.vector_store %arg6[%c0_14, %c0_15], %28 {strides = array<i32>} : memref<8x32xf32, #tpu.memory_space<vmem>>, vector<8x32xf32>,
    return
  }
  func.func @transform_0(%arg0: i32) -> (i32, i32) {
    %c0_i32 = arith.constant 0 : i32
    %c0_i32_0 = arith.constant 0 : i32
    return %arg0, %c0_i32 : i32, i32
  }
  func.func @transform_1(%arg0: i32) -> (i32, i32) {
    %c0_i32 = arith.constant 0 : i32
    %c0_i32_0 = arith.constant 0 : i32
    %c0_i32_1 = arith.constant 0 : i32
    return %c0_i32, %c0_i32_0 : i32, i32
  }
  func.func @transform_2(%arg0: i32) -> (i32, i32) {
    %c0_i32 = arith.constant 0 : i32
    %c0_i32_0 = arith.constant 0 : i32
    %c0_i32_1 = arith.constant 0 : i32
    return %c0_i32, %c0_i32_0 : i32, i32
  }
  func.func @transform_3(%arg0: i32) -> (i32, i32) {
    %c0_i32 = arith.constant 0 : i32
    %c0_i32_0 = arith.constant 0 : i32
    %c0_i32_1 = arith.constant 0 : i32
    return %c0_i32, %c0_i32_0 : i32, i32
  }
  func.func @transform_4(%arg0: i32) -> (i32, i32) {
    %c0_i32 = arith.constant 0 : i32
    %c0_i32_0 = arith.constant 0 : i32
    %c0_i32_1 = arith.constant 0 : i32
    return %c0_i32, %c0_i32_0 : i32, i32
  }
  func.func @transform_5(%arg0: i32) -> (i32, i32) {
    %c0_i32 = arith.constant 0 : i32
    %c0_i32_0 = arith.constant 0 : i32
    return %arg0, %c0_i32 : i32, i32
  }
}

module attributes {stable_mosaic.version = 11 : i64} {
  func.func @_ln_z_bias_kernel(%arg0: i32, %arg1: memref<64x16xf32, #tpu.memory_space<vmem>>, %arg2: memref<1x16xf32, #tpu.memory_space<vmem>>, %arg3: memref<1x16xf32, #tpu.memory_space<vmem>>, %arg4: memref<16x4xbf16, #tpu.memory_space<vmem>>, %arg5: memref<1x4xf32, #tpu.memory_space<vmem>>, %arg6: memref<64x16xbf16, #tpu.memory_space<vmem>>, %arg7: memref<64x4xf32, #tpu.memory_space<vmem>>) attributes {dimension_semantics = [#tpu.dimension_semantics<parallel>], iteration_bounds = array<i64: 1>, scalar_prefetch = 0 : i64, scratch_operands = 0 : i64, tpu.core_type = #tpu.core_type<tc>, window_params = [{transform_indices = @transform_0, window_bounds = array<i64: 64, 16>}, {pipeline_mode = #tpu.pipeline_mode<synchronous>, transform_indices = @transform_1, window_bounds = array<i64: 1, 16>}, {pipeline_mode = #tpu.pipeline_mode<synchronous>, transform_indices = @transform_2, window_bounds = array<i64: 1, 16>}, {pipeline_mode = #tpu.pipeline_mode<synchronous>, transform_indices = @transform_3, window_bounds = array<i64: 16, 4>}, {pipeline_mode = #tpu.pipeline_mode<synchronous>, transform_indices = @transform_4, window_bounds = array<i64: 1, 4>}, {transform_indices = @transform_5, window_bounds = array<i64: 64, 16>}, {transform_indices = @transform_6, window_bounds = array<i64: 64, 4>}]} {
    %c0 = arith.constant 0 : index
    %c0_0 = arith.constant 0 : index
    %0 = vector.load %arg1[%c0, %c0_0] : memref<64x16xf32, #tpu.memory_space<vmem>>, vector<64x16xf32>
    %c0_1 = arith.constant 0 : index
    %c0_2 = arith.constant 0 : index
    %1 = vector.load %arg2[%c0_1, %c0_2] : memref<1x16xf32, #tpu.memory_space<vmem>>, vector<1x16xf32>
    %c0_3 = arith.constant 0 : index
    %c0_4 = arith.constant 0 : index
    %2 = vector.load %arg3[%c0_3, %c0_4] : memref<1x16xf32, #tpu.memory_space<vmem>>, vector<1x16xf32>
    %cst = arith.constant dense<0.000000e+00> : vector<64xf32>
    %3 = vector.multi_reduction <add>, %0, %cst [1] : vector<64x16xf32> to vector<64xf32>
    %4 = vector.shape_cast %3 : vector<64xf32> to vector<64x1xf32>
    %cst_5 = arith.constant 1.600000e+01 : f32
    %5 = vector.broadcast %cst_5 : f32 to vector<64x1xf32>
    %6 = arith.divf %4, %5 : vector<64x1xf32>
    %7 = vector.broadcast %6 : vector<64x1xf32> to vector<64x16xf32>
    %8 = arith.subf %0, %7 : vector<64x16xf32>
    %9 = arith.mulf %8, %8 : vector<64x16xf32>
    %cst_6 = arith.constant dense<0.000000e+00> : vector<64xf32>
    %10 = vector.multi_reduction <add>, %9, %cst_6 [1] : vector<64x16xf32> to vector<64xf32>
    %11 = vector.shape_cast %10 : vector<64xf32> to vector<64x1xf32>
    %cst_7 = arith.constant 1.600000e+01 : f32
    %12 = vector.broadcast %cst_7 : f32 to vector<64x1xf32>
    %13 = arith.divf %11, %12 : vector<64x1xf32>
    %cst_8 = arith.constant 9.99999974E-6 : f32
    %14 = vector.broadcast %cst_8 : f32 to vector<64x1xf32>
    %15 = arith.addf %13, %14 : vector<64x1xf32>
    %16 = math.rsqrt %15 : vector<64x1xf32>
    %17 = vector.broadcast %16 : vector<64x1xf32> to vector<64x16xf32>
    %18 = arith.mulf %8, %17 : vector<64x16xf32>
    %19 = vector.broadcast %1 : vector<1x16xf32> to vector<64x16xf32>
    %20 = arith.mulf %18, %19 : vector<64x16xf32>
    %21 = vector.broadcast %2 : vector<1x16xf32> to vector<64x16xf32>
    %22 = arith.addf %20, %21 : vector<64x16xf32>
    %23 = arith.truncf %22 : vector<64x16xf32> to vector<64x16xbf16>
    %c0_9 = arith.constant 0 : index
    %c0_10 = arith.constant 0 : index
    %24 = vector.load %arg6[%c0_9, %c0_10] : memref<64x16xbf16, #tpu.memory_space<vmem>>, vector<64x16xbf16>
    tpu.vector_store %arg6[%c0_9, %c0_10], %23 {strides = array<i32>} : memref<64x16xbf16, #tpu.memory_space<vmem>>, vector<64x16xbf16>,
    %c0_11 = arith.constant 0 : index
    %c0_12 = arith.constant 0 : index
    %25 = vector.load %arg4[%c0_11, %c0_12] : memref<16x4xbf16, #tpu.memory_space<vmem>>, vector<16x4xbf16>
    %cst_13 = arith.constant dense<0.000000e+00> : vector<64x4xf32>
    %26 = tpu.matmul %23, %25, %cst_13 {dimension_numbers = #tpu.dot_dimension_numbers<[1], [0], [0], [1], [0, 0, 1, 1], [], []>} : vector<64x16xbf16>, vector<16x4xbf16>, vector<64x4xf32> -> vector<64x4xf32>
    %c0_14 = arith.constant 0 : index
    %c0_15 = arith.constant 0 : index
    %27 = vector.load %arg5[%c0_14, %c0_15] : memref<1x4xf32, #tpu.memory_space<vmem>>, vector<1x4xf32>
    %28 = vector.broadcast %27 : vector<1x4xf32> to vector<64x4xf32>
    %29 = arith.addf %26, %28 : vector<64x4xf32>
    %c0_16 = arith.constant 0 : index
    %c0_17 = arith.constant 0 : index
    %30 = vector.load %arg7[%c0_16, %c0_17] : memref<64x4xf32, #tpu.memory_space<vmem>>, vector<64x4xf32>
    tpu.vector_store %arg7[%c0_16, %c0_17], %29 {strides = array<i32>} : memref<64x4xf32, #tpu.memory_space<vmem>>, vector<64x4xf32>,
    return
  }
  func.func @transform_0(%arg0: i32) -> (i32, i32) {
    %c0_i32 = arith.constant 0 : i32
    %c0_i32_0 = arith.constant 0 : i32
    return %arg0, %c0_i32 : i32, i32
  }
  func.func @transform_1(%arg0: i32) -> (i32, i32) {
    %c0_i32 = arith.constant 0 : i32
    %c0_i32_0 = arith.constant 0 : i32
    %c0_i32_1 = arith.constant 0 : i32
    return %c0_i32, %c0_i32_0 : i32, i32
  }
  func.func @transform_2(%arg0: i32) -> (i32, i32) {
    %c0_i32 = arith.constant 0 : i32
    %c0_i32_0 = arith.constant 0 : i32
    %c0_i32_1 = arith.constant 0 : i32
    return %c0_i32, %c0_i32_0 : i32, i32
  }
  func.func @transform_3(%arg0: i32) -> (i32, i32) {
    %c0_i32 = arith.constant 0 : i32
    %c0_i32_0 = arith.constant 0 : i32
    %c0_i32_1 = arith.constant 0 : i32
    return %c0_i32, %c0_i32_0 : i32, i32
  }
  func.func @transform_4(%arg0: i32) -> (i32, i32) {
    %c0_i32 = arith.constant 0 : i32
    %c0_i32_0 = arith.constant 0 : i32
    %c0_i32_1 = arith.constant 0 : i32
    return %c0_i32, %c0_i32_0 : i32, i32
  }
  func.func @transform_5(%arg0: i32) -> (i32, i32) {
    %c0_i32 = arith.constant 0 : i32
    %c0_i32_0 = arith.constant 0 : i32
    return %arg0, %c0_i32 : i32, i32
  }
  func.func @transform_6(%arg0: i32) -> (i32, i32) {
    %c0_i32 = arith.constant 0 : i32
    %c0_i32_0 = arith.constant 0 : i32
    return %arg0, %c0_i32 : i32, i32
  }
}

module attributes {stable_mosaic.version = 11 : i64} {
  func.func @_ipa_attention_kernel(%arg0: i32, %arg1: memref<4x8x16xbf16, #tpu.memory_space<vmem>>, %arg2: memref<4x8x16xbf16, #tpu.memory_space<vmem>>, %arg3: memref<4x8x16xbf16, #tpu.memory_space<vmem>>, %arg4: memref<4x8x12xf32, #tpu.memory_space<vmem>>, %arg5: memref<4x8x12xf32, #tpu.memory_space<vmem>>, %arg6: memref<4x1x8xf32, #tpu.memory_space<vmem>>, %arg7: memref<4x8x24xbf16, #tpu.memory_space<vmem>>, %arg8: memref<4x8x8xf32, #tpu.memory_space<vmem>>, %arg9: memref<8x8x16xbf16, #tpu.memory_space<vmem>>, %arg10: memref<4x8x16xf32, #tpu.memory_space<vmem>>, %arg11: memref<4x8x24xf32, #tpu.memory_space<vmem>>, %arg12: memref<8x4x16xf32, #tpu.memory_space<vmem>>) attributes {dimension_semantics = [#tpu.dimension_semantics<parallel>], iteration_bounds = array<i64: 1>, scalar_prefetch = 0 : i64, scratch_operands = 0 : i64, tpu.core_type = #tpu.core_type<tc>, window_params = [{transform_indices = @transform_0, window_bounds = array<i64: 4, 8, 16>}, {pipeline_mode = #tpu.pipeline_mode<synchronous>, transform_indices = @transform_1, window_bounds = array<i64: 4, 8, 16>}, {pipeline_mode = #tpu.pipeline_mode<synchronous>, transform_indices = @transform_2, window_bounds = array<i64: 4, 8, 16>}, {transform_indices = @transform_3, window_bounds = array<i64: 4, 8, 12>}, {pipeline_mode = #tpu.pipeline_mode<synchronous>, transform_indices = @transform_4, window_bounds = array<i64: 4, 8, 12>}, {pipeline_mode = #tpu.pipeline_mode<synchronous>, transform_indices = @transform_5, window_bounds = array<i64: 4, 1, 8>}, {pipeline_mode = #tpu.pipeline_mode<synchronous>, transform_indices = @transform_6, window_bounds = array<i64: 4, 8, 24>}, {transform_indices = @transform_7, window_bounds = array<i64: 4, 8, 8>}, {transform_indices = @transform_8, window_bounds = array<i64: 8, 8, 16>}, {transform_indices = @transform_9, window_bounds = array<i64: 4, 8, 16>}, {transform_indices = @transform_10, window_bounds = array<i64: 4, 8, 24>}, {transform_indices = @transform_11, window_bounds = array<i64: 8, 4, 16>}]} {
    %c0 = arith.constant 0 : index
    %c0_0 = arith.constant 0 : index
    %c0_1 = arith.constant 0 : index
    %0 = vector.load %arg1[%c0, %c0_0, %c0_1] : memref<4x8x16xbf16, #tpu.memory_space<vmem>>, vector<4x8x16xbf16>
    %c0_2 = arith.constant 0 : index
    %c0_3 = arith.constant 0 : index
    %c0_4 = arith.constant 0 : index
    %1 = vector.load %arg2[%c0_2, %c0_3, %c0_4] : memref<4x8x16xbf16, #tpu.memory_space<vmem>>, vector<4x8x16xbf16>
    "tpu.trace_start"() <{level = 10 : i32, message = "hqc,hkc->hqk"}> : () -> ()
    %cst = arith.constant dense<0.000000e+00> : vector<4x8x8xf32>
    %2 = tpu.matmul %0, %1, %cst {dimension_numbers = #tpu.dot_dimension_numbers<[2], [2], [1], [1], [0, 0, 0, 1, 1, 1], [0], [0]>} : vector<4x8x16xbf16>, vector<4x8x16xbf16>, vector<4x8x8xf32> -> vector<4x8x8xf32>
    "tpu.trace_stop"() : () -> ()
    %c0_5 = arith.constant 0 : index
    %c0_6 = arith.constant 0 : index
    %c0_7 = arith.constant 0 : index
    %3 = vector.load %arg8[%c0_5, %c0_6, %c0_7] : memref<4x8x8xf32, #tpu.memory_space<vmem>>, vector<4x8x8xf32>
    %4 = arith.addf %2, %3 : vector<4x8x8xf32>
    %c0_8 = arith.constant 0 : index
    %c0_9 = arith.constant 0 : index
    %c0_10 = arith.constant 0 : index
    %5 = vector.load %arg4[%c0_8, %c0_9, %c0_10] : memref<4x8x12xf32, #tpu.memory_space<vmem>>, vector<4x8x12xf32>
    %c0_11 = arith.constant 0 : index
    %c0_12 = arith.constant 0 : index
    %c0_13 = arith.constant 0 : index
    %6 = vector.load %arg5[%c0_11, %c0_12, %c0_13] : memref<4x8x12xf32, #tpu.memory_space<vmem>>, vector<4x8x12xf32>
    "tpu.trace_start"() <{level = 10 : i32, message = "hqp,hkp->hqk"}> : () -> ()
    %cst_14 = arith.constant dense<0.000000e+00> : vector<4x8x8xf32>
    %7 = tpu.matmul %5, %6, %cst_14 {dimension_numbers = #tpu.dot_dimension_numbers<[2], [2], [1], [1], [0, 0, 0, 1, 1, 1], [0], [0]>} : vector<4x8x12xf32>, vector<4x8x12xf32>, vector<4x8x8xf32> -> vector<4x8x8xf32>
    "tpu.trace_stop"() : () -> ()
    %cst_15 = arith.constant 2.000000e+00 : f32
    %8 = vector.broadcast %cst_15 : f32 to vector<4x8x8xf32>
    %9 = arith.mulf %8, %7 : vector<4x8x8xf32>
    %10 = arith.addf %4, %9 : vector<4x8x8xf32>
    %11 = arith.mulf %5, %5 : vector<4x8x12xf32>
    %cst_16 = arith.constant dense<0.000000e+00> : vector<4x8xf32>
    %12 = vector.multi_reduction <add>, %11, %cst_16 [2] : vector<4x8x12xf32> to vector<4x8xf32>
    %13 = vector.shape_cast %12 : vector<4x8xf32> to vector<4x8x1xf32>
    %14 = vector.broadcast %13 : vector<4x8x1xf32> to vector<4x8x8xf32>
    %15 = arith.subf %10, %14 : vector<4x8x8xf32>
    %c0_17 = arith.constant 0 : index
    %c0_18 = arith.constant 0 : index
    %c0_19 = arith.constant 0 : index
    %16 = vector.load %arg6[%c0_17, %c0_18, %c0_19] : memref<4x1x8xf32, #tpu.memory_space<vmem>>, vector<4x1x8xf32>
    %17 = vector.broadcast %16 : vector<4x1x8xf32> to vector<4x8x8xf32>
    %18 = arith.subf %15, %17 : vector<4x8x8xf32>
    %cst_20 = arith.constant dense<0xFF800000> : vector<4x8xf32>
    %19 = vector.multi_reduction <maximumf>, %18, %cst_20 [2] : vector<4x8x8xf32> to vector<4x8xf32>
    %20 = vector.shape_cast %19 : vector<4x8xf32> to vector<4x8x1xf32>
    %21 = vector.broadcast %20 : vector<4x8x1xf32> to vector<4x8x8xf32>
    %22 = arith.subf %18, %21 : vector<4x8x8xf32>
    %23 = math.exp %22 : vector<4x8x8xf32>
    %cst_21 = arith.constant dense<0.000000e+00> : vector<4x8xf32>
    %24 = vector.multi_reduction <add>, %23, %cst_21 [2] : vector<4x8x8xf32> to vector<4x8xf32>
    %25 = vector.shape_cast %24 : vector<4x8xf32> to vector<4x8x1xf32>
    %26 = tpu.reciprocal %25 {approx = true} : vector<4x8x1xf32> -> vector<4x8x1xf32>
    %27 = vector.broadcast %26 : vector<4x8x1xf32> to vector<4x8x8xf32>
    %28 = arith.mulf %23, %27 : vector<4x8x8xf32>
    %29 = arith.truncf %28 : vector<4x8x8xf32> to vector<4x8x8xbf16>
    %c0_22 = arith.constant 0 : index
    %c0_23 = arith.constant 0 : index
    %c0_24 = arith.constant 0 : index
    %30 = vector.load %arg3[%c0_22, %c0_23, %c0_24] : memref<4x8x16xbf16, #tpu.memory_space<vmem>>, vector<4x8x16xbf16>
    "tpu.trace_start"() <{level = 10 : i32, message = "hqk,hkc->hqc"}> : () -> ()
    %cst_25 = arith.constant dense<0.000000e+00> : vector<4x8x16xf32>
    %31 = tpu.matmul %29, %30, %cst_25 {dimension_numbers = #tpu.dot_dimension_numbers<[2], [1], [1], [2], [0, 0, 0, 1, 1, 2], [0], [0]>} : vector<4x8x8xbf16>, vector<4x8x16xbf16>, vector<4x8x16xf32> -> vector<4x8x16xf32>
    "tpu.trace_stop"() : () -> ()
    %c0_26 = arith.constant 0 : index
    %c0_27 = arith.constant 0 : index
    %c0_28 = arith.constant 0 : index
    %32 = vector.load %arg10[%c0_26, %c0_27, %c0_28] : memref<4x8x16xf32, #tpu.memory_space<vmem>>, vector<4x8x16xf32>
    tpu.vector_store %arg10[%c0_26, %c0_27, %c0_28], %31 {strides = array<i32>} : memref<4x8x16xf32, #tpu.memory_space<vmem>>, vector<4x8x16xf32>,
    %c0_29 = arith.constant 0 : index
    %c0_30 = arith.constant 0 : index
    %c0_31 = arith.constant 0 : index
    %33 = vector.load %arg7[%c0_29, %c0_30, %c0_31] : memref<4x8x24xbf16, #tpu.memory_space<vmem>>, vector<4x8x24xbf16>
    "tpu.trace_start"() <{level = 10 : i32, message = "hqk,hkp->hqp"}> : () -> ()
    %cst_32 = arith.constant dense<0.000000e+00> : vector<4x8x24xf32>
    %34 = tpu.matmul %29, %33, %cst_32 {dimension_numbers = #tpu.dot_dimension_numbers<[2], [1], [1], [2], [0, 0, 0, 1, 1, 2], [0], [0]>} : vector<4x8x8xbf16>, vector<4x8x24xbf16>, vector<4x8x24xf32> -> vector<4x8x24xf32>
    "tpu.trace_stop"() : () -> ()
    %c0_33 = arith.constant 0 : index
    %c0_34 = arith.constant 0 : index
    %c0_35 = arith.constant 0 : index
    %35 = vector.load %arg11[%c0_33, %c0_34, %c0_35] : memref<4x8x24xf32, #tpu.memory_space<vmem>>, vector<4x8x24xf32>
    tpu.vector_store %arg11[%c0_33, %c0_34, %c0_35], %34 {strides = array<i32>} : memref<4x8x24xf32, #tpu.memory_space<vmem>>, vector<4x8x24xf32>,
    %36 = tpu.transpose %28, [1, 0, 2] : vector<4x8x8xf32> -> vector<8x4x8xf32>
    %37 = arith.truncf %36 : vector<8x4x8xf32> to vector<8x4x8xbf16>
    %c0_36 = arith.constant 0 : index
    %c0_37 = arith.constant 0 : index
    %c0_38 = arith.constant 0 : index
    %38 = vector.load %arg9[%c0_36, %c0_37, %c0_38] : memref<8x8x16xbf16, #tpu.memory_space<vmem>>, vector<8x8x16xbf16>
    "tpu.trace_start"() <{level = 10 : i32, message = "qhk,qkc->qhc"}> : () -> ()
    %cst_39 = arith.constant dense<0.000000e+00> : vector<8x4x16xf32>
    %39 = tpu.matmul %37, %38, %cst_39 {dimension_numbers = #tpu.dot_dimension_numbers<[2], [1], [1], [2], [0, 0, 0, 1, 1, 2], [0], [0]>} : vector<8x4x8xbf16>, vector<8x8x16xbf16>, vector<8x4x16xf32> -> vector<8x4x16xf32>
    "tpu.trace_stop"() : () -> ()
    %c0_40 = arith.constant 0 : index
    %c0_41 = arith.constant 0 : index
    %c0_42 = arith.constant 0 : index
    %40 = vector.load %arg12[%c0_40, %c0_41, %c0_42] : memref<8x4x16xf32, #tpu.memory_space<vmem>>, vector<8x4x16xf32>
    tpu.vector_store %arg12[%c0_40, %c0_41, %c0_42], %39 {strides = array<i32>} : memref<8x4x16xf32, #tpu.memory_space<vmem>>, vector<8x4x16xf32>,
    return
  }
  func.func @transform_0(%arg0: i32) -> (i32, i32, i32) {
    %c0_i32 = arith.constant 0 : i32
    %c0_i32_0 = arith.constant 0 : i32
    %c0_i32_1 = arith.constant 0 : i32
    return %c0_i32, %arg0, %c0_i32_0 : i32, i32, i32
  }
  func.func @transform_1(%arg0: i32) -> (i32, i32, i32) {
    %c0_i32 = arith.constant 0 : i32
    %c0_i32_0 = arith.constant 0 : i32
    %c0_i32_1 = arith.constant 0 : i32
    %c0_i32_2 = arith.constant 0 : i32
    return %c0_i32, %c0_i32_0, %c0_i32_1 : i32, i32, i32
  }
  func.func @transform_2(%arg0: i32) -> (i32, i32, i32) {
    %c0_i32 = arith.constant 0 : i32
    %c0_i32_0 = arith.constant 0 : i32
    %c0_i32_1 = arith.constant 0 : i32
    %c0_i32_2 = arith.constant 0 : i32
    return %c0_i32, %c0_i32_0, %c0_i32_1 : i32, i32, i32
  }
  func.func @transform_3(%arg0: i32) -> (i32, i32, i32) {
    %c0_i32 = arith.constant 0 : i32
    %c0_i32_0 = arith.constant 0 : i32
    %c0_i32_1 = arith.constant 0 : i32
    return %c0_i32, %arg0, %c0_i32_0 : i32, i32, i32
  }
  func.func @transform_4(%arg0: i32) -> (i32, i32, i32) {
    %c0_i32 = arith.constant 0 : i32
    %c0_i32_0 = arith.constant 0 : i32
    %c0_i32_1 = arith.constant 0 : i32
    %c0_i32_2 = arith.constant 0 : i32
    return %c0_i32, %c0_i32_0, %c0_i32_1 : i32, i32, i32
  }
  func.func @transform_5(%arg0: i32) -> (i32, i32, i32) {
    %c0_i32 = arith.constant 0 : i32
    %c0_i32_0 = arith.constant 0 : i32
    %c0_i32_1 = arith.constant 0 : i32
    %c0_i32_2 = arith.constant 0 : i32
    return %c0_i32, %c0_i32_0, %c0_i32_1 : i32, i32, i32
  }
  func.func @transform_6(%arg0: i32) -> (i32, i32, i32) {
    %c0_i32 = arith.constant 0 : i32
    %c0_i32_0 = arith.constant 0 : i32
    %c0_i32_1 = arith.constant 0 : i32
    %c0_i32_2 = arith.constant 0 : i32
    return %c0_i32, %c0_i32_0, %c0_i32_1 : i32, i32, i32
  }
  func.func @transform_7(%arg0: i32) -> (i32, i32, i32) {
    %c0_i32 = arith.constant 0 : i32
    %c0_i32_0 = arith.constant 0 : i32
    %c0_i32_1 = arith.constant 0 : i32
    return %c0_i32, %arg0, %c0_i32_0 : i32, i32, i32
  }
  func.func @transform_8(%arg0: i32) -> (i32, i32, i32) {
    %c0_i32 = arith.constant 0 : i32
    %c0_i32_0 = arith.constant 0 : i32
    %c0_i32_1 = arith.constant 0 : i32
    return %arg0, %c0_i32, %c0_i32_0 : i32, i32, i32
  }
  func.func @transform_9(%arg0: i32) -> (i32, i32, i32) {
    %c0_i32 = arith.constant 0 : i32
    %c0_i32_0 = arith.constant 0 : i32
    %c0_i32_1 = arith.constant 0 : i32
    return %c0_i32, %arg0, %c0_i32_0 : i32, i32, i32
  }
  func.func @transform_10(%arg0: i32) -> (i32, i32, i32) {
    %c0_i32 = arith.constant 0 : i32
    %c0_i32_0 = arith.constant 0 : i32
    %c0_i32_1 = arith.constant 0 : i32
    return %c0_i32, %arg0, %c0_i32_0 : i32, i32, i32
  }
  func.func @transform_11(%arg0: i32) -> (i32, i32, i32) {
    %c0_i32 = arith.constant 0 : i32
    %c0_i32_0 = arith.constant 0 : i32
    %c0_i32_1 = arith.constant 0 : i32
    return %arg0, %c0_i32, %c0_i32_0 : i32, i32, i32
  }
}

module attributes {stable_mosaic.version = 11 : i64} {
  func.func @_linear_kernel(%arg0: i32, %arg1: memref<8x256xbf16, #tpu.memory_space<vmem>>, %arg2: memref<256x32xbf16, #tpu.memory_space<vmem>>, %arg3: memref<1x32xf32, #tpu.memory_space<vmem>>, %arg4: memref<8x32xf32, #tpu.memory_space<vmem>>) attributes {dimension_semantics = [#tpu.dimension_semantics<parallel>], iteration_bounds = array<i64: 1>, scalar_prefetch = 0 : i64, scratch_operands = 0 : i64, tpu.core_type = #tpu.core_type<tc>, window_params = [{transform_indices = @transform_0, window_bounds = array<i64: 8, 256>}, {pipeline_mode = #tpu.pipeline_mode<synchronous>, transform_indices = @transform_1, window_bounds = array<i64: 256, 32>}, {pipeline_mode = #tpu.pipeline_mode<synchronous>, transform_indices = @transform_2, window_bounds = array<i64: 1, 32>}, {transform_indices = @transform_3, window_bounds = array<i64: 8, 32>}]} {
    %c0 = arith.constant 0 : index
    %c0_0 = arith.constant 0 : index
    %0 = vector.load %arg1[%c0, %c0_0] : memref<8x256xbf16, #tpu.memory_space<vmem>>, vector<8x256xbf16>
    %c0_1 = arith.constant 0 : index
    %c0_2 = arith.constant 0 : index
    %1 = vector.load %arg2[%c0_1, %c0_2] : memref<256x32xbf16, #tpu.memory_space<vmem>>, vector<256x32xbf16>
    %cst = arith.constant dense<0.000000e+00> : vector<8x32xf32>
    %2 = tpu.matmul %0, %1, %cst {dimension_numbers = #tpu.dot_dimension_numbers<[1], [0], [0], [1], [0, 0, 1, 1], [], []>} : vector<8x256xbf16>, vector<256x32xbf16>, vector<8x32xf32> -> vector<8x32xf32>
    %c0_3 = arith.constant 0 : index
    %c0_4 = arith.constant 0 : index
    %3 = vector.load %arg3[%c0_3, %c0_4] : memref<1x32xf32, #tpu.memory_space<vmem>>, vector<1x32xf32>
    %4 = vector.broadcast %3 : vector<1x32xf32> to vector<8x32xf32>
    %5 = arith.addf %2, %4 : vector<8x32xf32>
    %c0_5 = arith.constant 0 : index
    %c0_6 = arith.constant 0 : index
    %6 = vector.load %arg4[%c0_5, %c0_6] : memref<8x32xf32, #tpu.memory_space<vmem>>, vector<8x32xf32>
    tpu.vector_store %arg4[%c0_5, %c0_6], %5 {strides = array<i32>} : memref<8x32xf32, #tpu.memory_space<vmem>>, vector<8x32xf32>,
    return
  }
  func.func @transform_0(%arg0: i32) -> (i32, i32) {
    %c0_i32 = arith.constant 0 : i32
    %c0_i32_0 = arith.constant 0 : i32
    return %arg0, %c0_i32 : i32, i32
  }
  func.func @transform_1(%arg0: i32) -> (i32, i32) {
    %c0_i32 = arith.constant 0 : i32
    %c0_i32_0 = arith.constant 0 : i32
    %c0_i32_1 = arith.constant 0 : i32
    return %c0_i32, %c0_i32_0 : i32, i32
  }
  func.func @transform_2(%arg0: i32) -> (i32, i32) {
    %c0_i32 = arith.constant 0 : i32
    %c0_i32_0 = arith.constant 0 : i32
    %c0_i32_1 = arith.constant 0 : i32
    return %c0_i32, %c0_i32_0 : i32, i32
  }
  func.func @transform_3(%arg0: i32) -> (i32, i32) {
    %c0_i32 = arith.constant 0 : i32
    %c0_i32_0 = arith.constant 0 : i32
    return %arg0, %c0_i32 : i32, i32
  }
}

module attributes {stable_mosaic.version = 11 : i64} {
  func.func @_block_update_kernel(%arg0: i32, %arg1: memref<8x32xf32, #tpu.memory_space<vmem>>, %arg2: memref<8x32xf32, #tpu.memory_space<vmem>>, %arg3: memref<1x32xf32, #tpu.memory_space<vmem>>, %arg4: memref<1x32xf32, #tpu.memory_space<vmem>>, %arg5: memref<1x32x32xbf16, #tpu.memory_space<vmem>>, %arg6: memref<1x1x32xf32, #tpu.memory_space<vmem>>, %arg7: memref<1x32x32xbf16, #tpu.memory_space<vmem>>, %arg8: memref<1x1x32xf32, #tpu.memory_space<vmem>>, %arg9: memref<1x32x32xbf16, #tpu.memory_space<vmem>>, %arg10: memref<1x1x32xf32, #tpu.memory_space<vmem>>, %arg11: memref<1x32xf32, #tpu.memory_space<vmem>>, %arg12: memref<1x32xf32, #tpu.memory_space<vmem>>, %arg13: memref<32x6xbf16, #tpu.memory_space<vmem>>, %arg14: memref<1x6xf32, #tpu.memory_space<vmem>>, %arg15: memref<8x32xf32, #tpu.memory_space<vmem>>, %arg16: memref<8x6xf32, #tpu.memory_space<vmem>>) attributes {dimension_semantics = [#tpu.dimension_semantics<parallel>], iteration_bounds = array<i64: 1>, scalar_prefetch = 0 : i64, scratch_operands = 0 : i64, tpu.core_type = #tpu.core_type<tc>, window_params = [{transform_indices = @transform_0, window_bounds = array<i64: 8, 32>}, {transform_indices = @transform_1, window_bounds = array<i64: 8, 32>}, {pipeline_mode = #tpu.pipeline_mode<synchronous>, transform_indices = @transform_2, window_bounds = array<i64: 1, 32>}, {pipeline_mode = #tpu.pipeline_mode<synchronous>, transform_indices = @transform_3, window_bounds = array<i64: 1, 32>}, {pipeline_mode = #tpu.pipeline_mode<synchronous>, transform_indices = @transform_4, window_bounds = array<i64: 1, 32, 32>}, {pipeline_mode = #tpu.pipeline_mode<synchronous>, transform_indices = @transform_5, window_bounds = array<i64: 1, 1, 32>}, {pipeline_mode = #tpu.pipeline_mode<synchronous>, transform_indices = @transform_6, window_bounds = array<i64: 1, 32, 32>}, {pipeline_mode = #tpu.pipeline_mode<synchronous>, transform_indices = @transform_7, window_bounds = array<i64: 1, 1, 32>}, {pipeline_mode = #tpu.pipeline_mode<synchronous>, transform_indices = @transform_8, window_bounds = array<i64: 1, 32, 32>}, {pipeline_mode = #tpu.pipeline_mode<synchronous>, transform_indices = @transform_9, window_bounds = array<i64: 1, 1, 32>}, {pipeline_mode = #tpu.pipeline_mode<synchronous>, transform_indices = @transform_10, window_bounds = array<i64: 1, 32>}, {pipeline_mode = #tpu.pipeline_mode<synchronous>, transform_indices = @transform_11, window_bounds = array<i64: 1, 32>}, {pipeline_mode = #tpu.pipeline_mode<synchronous>, transform_indices = @transform_12, window_bounds = array<i64: 32, 6>}, {pipeline_mode = #tpu.pipeline_mode<synchronous>, transform_indices = @transform_13, window_bounds = array<i64: 1, 6>}, {transform_indices = @transform_14, window_bounds = array<i64: 8, 32>}, {transform_indices = @transform_15, window_bounds = array<i64: 8, 6>}]} {
    %c0 = arith.constant 0 : index
    %c0_0 = arith.constant 0 : index
    %0 = vector.load %arg1[%c0, %c0_0] : memref<8x32xf32, #tpu.memory_space<vmem>>, vector<8x32xf32>
    %c0_1 = arith.constant 0 : index
    %c0_2 = arith.constant 0 : index
    %1 = vector.load %arg2[%c0_1, %c0_2] : memref<8x32xf32, #tpu.memory_space<vmem>>, vector<8x32xf32>
    %2 = arith.addf %0, %1 : vector<8x32xf32>
    %c0_3 = arith.constant 0 : index
    %c0_4 = arith.constant 0 : index
    %3 = vector.load %arg3[%c0_3, %c0_4] : memref<1x32xf32, #tpu.memory_space<vmem>>, vector<1x32xf32>
    %c0_5 = arith.constant 0 : index
    %c0_6 = arith.constant 0 : index
    %4 = vector.load %arg4[%c0_5, %c0_6] : memref<1x32xf32, #tpu.memory_space<vmem>>, vector<1x32xf32>
    %cst = arith.constant dense<0.000000e+00> : vector<8xf32>
    %5 = vector.multi_reduction <add>, %2, %cst [1] : vector<8x32xf32> to vector<8xf32>
    %6 = vector.shape_cast %5 : vector<8xf32> to vector<8x1xf32>
    %cst_7 = arith.constant 3.200000e+01 : f32
    %7 = vector.broadcast %cst_7 : f32 to vector<8x1xf32>
    %8 = arith.divf %6, %7 : vector<8x1xf32>
    %9 = vector.broadcast %8 : vector<8x1xf32> to vector<8x32xf32>
    %10 = arith.subf %2, %9 : vector<8x32xf32>
    %11 = arith.mulf %10, %10 : vector<8x32xf32>
    %cst_8 = arith.constant dense<0.000000e+00> : vector<8xf32>
    %12 = vector.multi_reduction <add>, %11, %cst_8 [1] : vector<8x32xf32> to vector<8xf32>
    %13 = vector.shape_cast %12 : vector<8xf32> to vector<8x1xf32>
    %cst_9 = arith.constant 3.200000e+01 : f32
    %14 = vector.broadcast %cst_9 : f32 to vector<8x1xf32>
    %15 = arith.divf %13, %14 : vector<8x1xf32>
    %cst_10 = arith.constant 9.99999974E-6 : f32
    %16 = vector.broadcast %cst_10 : f32 to vector<8x1xf32>
    %17 = arith.addf %15, %16 : vector<8x1xf32>
    %18 = math.rsqrt %17 : vector<8x1xf32>
    %19 = vector.broadcast %18 : vector<8x1xf32> to vector<8x32xf32>
    %20 = arith.mulf %10, %19 : vector<8x32xf32>
    %21 = vector.broadcast %3 : vector<1x32xf32> to vector<8x32xf32>
    %22 = arith.mulf %20, %21 : vector<8x32xf32>
    %23 = vector.broadcast %4 : vector<1x32xf32> to vector<8x32xf32>
    %24 = arith.addf %22, %23 : vector<8x32xf32>
    %25 = arith.truncf %24 : vector<8x32xf32> to vector<8x32xbf16>
    %c0_11 = arith.constant 0 : index
    %c0_12 = arith.constant 0 : index
    %c0_13 = arith.constant 0 : index
    %26 = vector.load %arg5[%c0_11, %c0_12, %c0_13] : memref<1x32x32xbf16, #tpu.memory_space<vmem>>, vector<1x32x32xbf16>
    %27 = vector.shape_cast %26 : vector<1x32x32xbf16> to vector<32x32xbf16>
    %cst_14 = arith.constant dense<0.000000e+00> : vector<8x32xf32>
    %28 = tpu.matmul %25, %27, %cst_14 {dimension_numbers = #tpu.dot_dimension_numbers<[1], [0], [0], [1], [0, 0, 1, 1], [], []>} : vector<8x32xbf16>, vector<32x32xbf16>, vector<8x32xf32> -> vector<8x32xf32>
    %c0_15 = arith.constant 0 : index
    %c0_16 = arith.constant 0 : index
    %c0_17 = arith.constant 0 : index
    %29 = vector.load %arg6[%c0_15, %c0_16, %c0_17] : memref<1x1x32xf32, #tpu.memory_space<vmem>>, vector<1x1x32xf32>
    %30 = vector.shape_cast %29 : vector<1x1x32xf32> to vector<1x32xf32>
    %31 = vector.broadcast %30 : vector<1x32xf32> to vector<8x32xf32>
    %32 = arith.addf %28, %31 : vector<8x32xf32>
    %cst_18 = arith.constant 0.000000e+00 : f32
    %33 = vector.broadcast %cst_18 : f32 to vector<8x32xf32>
    %34 = arith.maximumf %32, %33 : vector<8x32xf32>
    %35 = arith.truncf %34 : vector<8x32xf32> to vector<8x32xbf16>
    %c0_19 = arith.constant 0 : index
    %c0_20 = arith.constant 0 : index
    %c0_21 = arith.constant 0 : index
    %36 = vector.load %arg7[%c0_19, %c0_20, %c0_21] : memref<1x32x32xbf16, #tpu.memory_space<vmem>>, vector<1x32x32xbf16>
    %37 = vector.shape_cast %36 : vector<1x32x32xbf16> to vector<32x32xbf16>
    %cst_22 = arith.constant dense<0.000000e+00> : vector<8x32xf32>
    %38 = tpu.matmul %35, %37, %cst_22 {dimension_numbers = #tpu.dot_dimension_numbers<[1], [0], [0], [1], [0, 0, 1, 1], [], []>} : vector<8x32xbf16>, vector<32x32xbf16>, vector<8x32xf32> -> vector<8x32xf32>
    %c0_23 = arith.constant 0 : index
    %c0_24 = arith.constant 0 : index
    %c0_25 = arith.constant 0 : index
    %39 = vector.load %arg8[%c0_23, %c0_24, %c0_25] : memref<1x1x32xf32, #tpu.memory_space<vmem>>, vector<1x1x32xf32>
    %40 = vector.shape_cast %39 : vector<1x1x32xf32> to vector<1x32xf32>
    %41 = vector.broadcast %40 : vector<1x32xf32> to vector<8x32xf32>
    %42 = arith.addf %38, %41 : vector<8x32xf32>
    %cst_26 = arith.constant 0.000000e+00 : f32
    %43 = vector.broadcast %cst_26 : f32 to vector<8x32xf32>
    %44 = arith.maximumf %42, %43 : vector<8x32xf32>
    %45 = arith.truncf %44 : vector<8x32xf32> to vector<8x32xbf16>
    %c0_27 = arith.constant 0 : index
    %c0_28 = arith.constant 0 : index
    %c0_29 = arith.constant 0 : index
    %46 = vector.load %arg9[%c0_27, %c0_28, %c0_29] : memref<1x32x32xbf16, #tpu.memory_space<vmem>>, vector<1x32x32xbf16>
    %47 = vector.shape_cast %46 : vector<1x32x32xbf16> to vector<32x32xbf16>
    %cst_30 = arith.constant dense<0.000000e+00> : vector<8x32xf32>
    %48 = tpu.matmul %45, %47, %cst_30 {dimension_numbers = #tpu.dot_dimension_numbers<[1], [0], [0], [1], [0, 0, 1, 1], [], []>} : vector<8x32xbf16>, vector<32x32xbf16>, vector<8x32xf32> -> vector<8x32xf32>
    %c0_31 = arith.constant 0 : index
    %c0_32 = arith.constant 0 : index
    %c0_33 = arith.constant 0 : index
    %49 = vector.load %arg10[%c0_31, %c0_32, %c0_33] : memref<1x1x32xf32, #tpu.memory_space<vmem>>, vector<1x1x32xf32>
    %50 = vector.shape_cast %49 : vector<1x1x32xf32> to vector<1x32xf32>
    %51 = vector.broadcast %50 : vector<1x32xf32> to vector<8x32xf32>
    %52 = arith.addf %48, %51 : vector<8x32xf32>
    %53 = arith.addf %24, %52 : vector<8x32xf32>
    %c0_34 = arith.constant 0 : index
    %c0_35 = arith.constant 0 : index
    %54 = vector.load %arg11[%c0_34, %c0_35] : memref<1x32xf32, #tpu.memory_space<vmem>>, vector<1x32xf32>
    %c0_36 = arith.constant 0 : index
    %c0_37 = arith.constant 0 : index
    %55 = vector.load %arg12[%c0_36, %c0_37] : memref<1x32xf32, #tpu.memory_space<vmem>>, vector<1x32xf32>
    %cst_38 = arith.constant dense<0.000000e+00> : vector<8xf32>
    %56 = vector.multi_reduction <add>, %53, %cst_38 [1] : vector<8x32xf32> to vector<8xf32>
    %57 = vector.shape_cast %56 : vector<8xf32> to vector<8x1xf32>
    %cst_39 = arith.constant 3.200000e+01 : f32
    %58 = vector.broadcast %cst_39 : f32 to vector<8x1xf32>
    %59 = arith.divf %57, %58 : vector<8x1xf32>
    %60 = vector.broadcast %59 : vector<8x1xf32> to vector<8x32xf32>
    %61 = arith.subf %53, %60 : vector<8x32xf32>
    %62 = arith.mulf %61, %61 : vector<8x32xf32>
    %cst_40 = arith.constant dense<0.000000e+00> : vector<8xf32>
    %63 = vector.multi_reduction <add>, %62, %cst_40 [1] : vector<8x32xf32> to vector<8xf32>
    %64 = vector.shape_cast %63 : vector<8xf32> to vector<8x1xf32>
    %cst_41 = arith.constant 3.200000e+01 : f32
    %65 = vector.broadcast %cst_41 : f32 to vector<8x1xf32>
    %66 = arith.divf %64, %65 : vector<8x1xf32>
    %cst_42 = arith.constant 9.99999974E-6 : f32
    %67 = vector.broadcast %cst_42 : f32 to vector<8x1xf32>
    %68 = arith.addf %66, %67 : vector<8x1xf32>
    %69 = math.rsqrt %68 : vector<8x1xf32>
    %70 = vector.broadcast %69 : vector<8x1xf32> to vector<8x32xf32>
    %71 = arith.mulf %61, %70 : vector<8x32xf32>
    %72 = vector.broadcast %54 : vector<1x32xf32> to vector<8x32xf32>
    %73 = arith.mulf %71, %72 : vector<8x32xf32>
    %74 = vector.broadcast %55 : vector<1x32xf32> to vector<8x32xf32>
    %75 = arith.addf %73, %74 : vector<8x32xf32>
    %c0_43 = arith.constant 0 : index
    %c0_44 = arith.constant 0 : index
    %76 = vector.load %arg15[%c0_43, %c0_44] : memref<8x32xf32, #tpu.memory_space<vmem>>, vector<8x32xf32>
    tpu.vector_store %arg15[%c0_43, %c0_44], %75 {strides = array<i32>} : memref<8x32xf32, #tpu.memory_space<vmem>>, vector<8x32xf32>,
    %77 = arith.truncf %75 : vector<8x32xf32> to vector<8x32xbf16>
    %c0_45 = arith.constant 0 : index
    %c0_46 = arith.constant 0 : index
    %78 = vector.load %arg13[%c0_45, %c0_46] : memref<32x6xbf16, #tpu.memory_space<vmem>>, vector<32x6xbf16>
    %cst_47 = arith.constant dense<0.000000e+00> : vector<8x6xf32>
    %79 = tpu.matmul %77, %78, %cst_47 {dimension_numbers = #tpu.dot_dimension_numbers<[1], [0], [0], [1], [0, 0, 1, 1], [], []>} : vector<8x32xbf16>, vector<32x6xbf16>, vector<8x6xf32> -> vector<8x6xf32>
    %c0_48 = arith.constant 0 : index
    %c0_49 = arith.constant 0 : index
    %80 = vector.load %arg14[%c0_48, %c0_49] : memref<1x6xf32, #tpu.memory_space<vmem>>, vector<1x6xf32>
    %81 = vector.broadcast %80 : vector<1x6xf32> to vector<8x6xf32>
    %82 = arith.addf %79, %81 : vector<8x6xf32>
    %c0_50 = arith.constant 0 : index
    %c0_51 = arith.constant 0 : index
    %83 = vector.load %arg16[%c0_50, %c0_51] : memref<8x6xf32, #tpu.memory_space<vmem>>, vector<8x6xf32>
    tpu.vector_store %arg16[%c0_50, %c0_51], %82 {strides = array<i32>} : memref<8x6xf32, #tpu.memory_space<vmem>>, vector<8x6xf32>,
    return
  }
  func.func @transform_0(%arg0: i32) -> (i32, i32) {
    %c0_i32 = arith.constant 0 : i32
    %c0_i32_0 = arith.constant 0 : i32
    return %arg0, %c0_i32 : i32, i32
  }
  func.func @transform_1(%arg0: i32) -> (i32, i32) {
    %c0_i32 = arith.constant 0 : i32
    %c0_i32_0 = arith.constant 0 : i32
    return %arg0, %c0_i32 : i32, i32
  }
  func.func @transform_2(%arg0: i32) -> (i32, i32) {
    %c0_i32 = arith.constant 0 : i32
    %c0_i32_0 = arith.constant 0 : i32
    %c0_i32_1 = arith.constant 0 : i32
    return %c0_i32, %c0_i32_0 : i32, i32
  }
  func.func @transform_3(%arg0: i32) -> (i32, i32) {
    %c0_i32 = arith.constant 0 : i32
    %c0_i32_0 = arith.constant 0 : i32
    %c0_i32_1 = arith.constant 0 : i32
    return %c0_i32, %c0_i32_0 : i32, i32
  }
  func.func @transform_4(%arg0: i32) -> (i32, i32, i32) {
    %c0_i32 = arith.constant 0 : i32
    %c0_i32_0 = arith.constant 0 : i32
    %c0_i32_1 = arith.constant 0 : i32
    %c0_i32_2 = arith.constant 0 : i32
    return %c0_i32, %c0_i32_0, %c0_i32_1 : i32, i32, i32
  }
  func.func @transform_5(%arg0: i32) -> (i32, i32, i32) {
    %c0_i32 = arith.constant 0 : i32
    %c0_i32_0 = arith.constant 0 : i32
    %c0_i32_1 = arith.constant 0 : i32
    %c0_i32_2 = arith.constant 0 : i32
    return %c0_i32, %c0_i32_0, %c0_i32_1 : i32, i32, i32
  }
  func.func @transform_6(%arg0: i32) -> (i32, i32, i32) {
    %c0_i32 = arith.constant 0 : i32
    %c0_i32_0 = arith.constant 0 : i32
    %c0_i32_1 = arith.constant 0 : i32
    %c0_i32_2 = arith.constant 0 : i32
    return %c0_i32, %c0_i32_0, %c0_i32_1 : i32, i32, i32
  }
  func.func @transform_7(%arg0: i32) -> (i32, i32, i32) {
    %c0_i32 = arith.constant 0 : i32
    %c0_i32_0 = arith.constant 0 : i32
    %c0_i32_1 = arith.constant 0 : i32
    %c0_i32_2 = arith.constant 0 : i32
    return %c0_i32, %c0_i32_0, %c0_i32_1 : i32, i32, i32
  }
  func.func @transform_8(%arg0: i32) -> (i32, i32, i32) {
    %c0_i32 = arith.constant 0 : i32
    %c0_i32_0 = arith.constant 0 : i32
    %c0_i32_1 = arith.constant 0 : i32
    %c0_i32_2 = arith.constant 0 : i32
    return %c0_i32, %c0_i32_0, %c0_i32_1 : i32, i32, i32
  }
  func.func @transform_9(%arg0: i32) -> (i32, i32, i32) {
    %c0_i32 = arith.constant 0 : i32
    %c0_i32_0 = arith.constant 0 : i32
    %c0_i32_1 = arith.constant 0 : i32
    %c0_i32_2 = arith.constant 0 : i32
    return %c0_i32, %c0_i32_0, %c0_i32_1 : i32, i32, i32
  }
  func.func @transform_10(%arg0: i32) -> (i32, i32) {
    %c0_i32 = arith.constant 0 : i32
    %c0_i32_0 = arith.constant 0 : i32
    %c0_i32_1 = arith.constant 0 : i32
    return %c0_i32, %c0_i32_0 : i32, i32
  }
  func.func @transform_11(%arg0: i32) -> (i32, i32) {
    %c0_i32 = arith.constant 0 : i32
    %c0_i32_0 = arith.constant 0 : i32
    %c0_i32_1 = arith.constant 0 : i32
    return %c0_i32, %c0_i32_0 : i32, i32
  }
  func.func @transform_12(%arg0: i32) -> (i32, i32) {
    %c0_i32 = arith.constant 0 : i32
    %c0_i32_0 = arith.constant 0 : i32
    %c0_i32_1 = arith.constant 0 : i32
    return %c0_i32, %c0_i32_0 : i32, i32
  }
  func.func @transform_13(%arg0: i32) -> (i32, i32) {
    %c0_i32 = arith.constant 0 : i32
    %c0_i32_0 = arith.constant 0 : i32
    %c0_i32_1 = arith.constant 0 : i32
    return %c0_i32, %c0_i32_0 : i32, i32
  }
  func.func @transform_14(%arg0: i32) -> (i32, i32) {
    %c0_i32 = arith.constant 0 : i32
    %c0_i32_0 = arith.constant 0 : i32
    return %arg0, %c0_i32 : i32, i32
  }
  func.func @transform_15(%arg0: i32) -> (i32, i32) {
    %c0_i32 = arith.constant 0 : i32
    %c0_i32_0 = arith.constant 0 : i32
    return %arg0, %c0_i32 : i32, i32
  }
}

module attributes {stable_mosaic.version = 11 : i64} {
  func.func @_block_update_kernel(%arg0: i32, %arg1: memref<8x32xf32, #tpu.memory_space<vmem>>, %arg2: memref<8x32xf32, #tpu.memory_space<vmem>>, %arg3: memref<1x32xf32, #tpu.memory_space<vmem>>, %arg4: memref<1x32xf32, #tpu.memory_space<vmem>>, %arg5: memref<1x32x32xbf16, #tpu.memory_space<vmem>>, %arg6: memref<1x1x32xf32, #tpu.memory_space<vmem>>, %arg7: memref<1x32x32xbf16, #tpu.memory_space<vmem>>, %arg8: memref<1x1x32xf32, #tpu.memory_space<vmem>>, %arg9: memref<1x32x32xbf16, #tpu.memory_space<vmem>>, %arg10: memref<1x1x32xf32, #tpu.memory_space<vmem>>, %arg11: memref<1x32xf32, #tpu.memory_space<vmem>>, %arg12: memref<1x32xf32, #tpu.memory_space<vmem>>, %arg13: memref<32x6xbf16, #tpu.memory_space<vmem>>, %arg14: memref<1x6xf32, #tpu.memory_space<vmem>>, %arg15: memref<8x32xf32, #tpu.memory_space<vmem>>, %arg16: memref<8x6xf32, #tpu.memory_space<vmem>>) attributes {dimension_semantics = [#tpu.dimension_semantics<parallel>], iteration_bounds = array<i64: 1>, scalar_prefetch = 0 : i64, scratch_operands = 0 : i64, tpu.core_type = #tpu.core_type<tc>, window_params = [{transform_indices = @transform_0, window_bounds = array<i64: 8, 32>}, {transform_indices = @transform_1, window_bounds = array<i64: 8, 32>}, {pipeline_mode = #tpu.pipeline_mode<synchronous>, transform_indices = @transform_2, window_bounds = array<i64: 1, 32>}, {pipeline_mode = #tpu.pipeline_mode<synchronous>, transform_indices = @transform_3, window_bounds = array<i64: 1, 32>}, {pipeline_mode = #tpu.pipeline_mode<synchronous>, transform_indices = @transform_4, window_bounds = array<i64: 1, 32, 32>}, {pipeline_mode = #tpu.pipeline_mode<synchronous>, transform_indices = @transform_5, window_bounds = array<i64: 1, 1, 32>}, {pipeline_mode = #tpu.pipeline_mode<synchronous>, transform_indices = @transform_6, window_bounds = array<i64: 1, 32, 32>}, {pipeline_mode = #tpu.pipeline_mode<synchronous>, transform_indices = @transform_7, window_bounds = array<i64: 1, 1, 32>}, {pipeline_mode = #tpu.pipeline_mode<synchronous>, transform_indices = @transform_8, window_bounds = array<i64: 1, 32, 32>}, {pipeline_mode = #tpu.pipeline_mode<synchronous>, transform_indices = @transform_9, window_bounds = array<i64: 1, 1, 32>}, {pipeline_mode = #tpu.pipeline_mode<synchronous>, transform_indices = @transform_10, window_bounds = array<i64: 1, 32>}, {pipeline_mode = #tpu.pipeline_mode<synchronous>, transform_indices = @transform_11, window_bounds = array<i64: 1, 32>}, {pipeline_mode = #tpu.pipeline_mode<synchronous>, transform_indices = @transform_12, window_bounds = array<i64: 32, 6>}, {pipeline_mode = #tpu.pipeline_mode<synchronous>, transform_indices = @transform_13, window_bounds = array<i64: 1, 6>}, {transform_indices = @transform_14, window_bounds = array<i64: 8, 32>}, {transform_indices = @transform_15, window_bounds = array<i64: 8, 6>}]} {
    %c0 = arith.constant 0 : index
    %c0_0 = arith.constant 0 : index
    %0 = vector.load %arg1[%c0, %c0_0] : memref<8x32xf32, #tpu.memory_space<vmem>>, vector<8x32xf32>
    %c0_1 = arith.constant 0 : index
    %c0_2 = arith.constant 0 : index
    %1 = vector.load %arg2[%c0_1, %c0_2] : memref<8x32xf32, #tpu.memory_space<vmem>>, vector<8x32xf32>
    %2 = arith.addf %0, %1 : vector<8x32xf32>
    %c0_3 = arith.constant 0 : index
    %c0_4 = arith.constant 0 : index
    %3 = vector.load %arg3[%c0_3, %c0_4] : memref<1x32xf32, #tpu.memory_space<vmem>>, vector<1x32xf32>
    %c0_5 = arith.constant 0 : index
    %c0_6 = arith.constant 0 : index
    %4 = vector.load %arg4[%c0_5, %c0_6] : memref<1x32xf32, #tpu.memory_space<vmem>>, vector<1x32xf32>
    %cst = arith.constant dense<0.000000e+00> : vector<8xf32>
    %5 = vector.multi_reduction <add>, %2, %cst [1] : vector<8x32xf32> to vector<8xf32>
    %6 = vector.shape_cast %5 : vector<8xf32> to vector<8x1xf32>
    %cst_7 = arith.constant 3.200000e+01 : f32
    %7 = vector.broadcast %cst_7 : f32 to vector<8x1xf32>
    %8 = arith.divf %6, %7 : vector<8x1xf32>
    %9 = vector.broadcast %8 : vector<8x1xf32> to vector<8x32xf32>
    %10 = arith.subf %2, %9 : vector<8x32xf32>
    %11 = arith.mulf %10, %10 : vector<8x32xf32>
    %cst_8 = arith.constant dense<0.000000e+00> : vector<8xf32>
    %12 = vector.multi_reduction <add>, %11, %cst_8 [1] : vector<8x32xf32> to vector<8xf32>
    %13 = vector.shape_cast %12 : vector<8xf32> to vector<8x1xf32>
    %cst_9 = arith.constant 3.200000e+01 : f32
    %14 = vector.broadcast %cst_9 : f32 to vector<8x1xf32>
    %15 = arith.divf %13, %14 : vector<8x1xf32>
    %cst_10 = arith.constant 9.99999974E-6 : f32
    %16 = vector.broadcast %cst_10 : f32 to vector<8x1xf32>
    %17 = arith.addf %15, %16 : vector<8x1xf32>
    %18 = math.rsqrt %17 : vector<8x1xf32>
    %19 = vector.broadcast %18 : vector<8x1xf32> to vector<8x32xf32>
    %20 = arith.mulf %10, %19 : vector<8x32xf32>
    %21 = vector.broadcast %3 : vector<1x32xf32> to vector<8x32xf32>
    %22 = arith.mulf %20, %21 : vector<8x32xf32>
    %23 = vector.broadcast %4 : vector<1x32xf32> to vector<8x32xf32>
    %24 = arith.addf %22, %23 : vector<8x32xf32>
    %25 = arith.truncf %24 : vector<8x32xf32> to vector<8x32xbf16>
    %c0_11 = arith.constant 0 : index
    %c0_12 = arith.constant 0 : index
    %c0_13 = arith.constant 0 : index
    %26 = vector.load %arg5[%c0_11, %c0_12, %c0_13] : memref<1x32x32xbf16, #tpu.memory_space<vmem>>, vector<1x32x32xbf16>
    %27 = vector.shape_cast %26 : vector<1x32x32xbf16> to vector<32x32xbf16>
    %cst_14 = arith.constant dense<0.000000e+00> : vector<8x32xf32>
    %28 = tpu.matmul %25, %27, %cst_14 {dimension_numbers = #tpu.dot_dimension_numbers<[1], [0], [0], [1], [0, 0, 1, 1], [], []>} : vector<8x32xbf16>, vector<32x32xbf16>, vector<8x32xf32> -> vector<8x32xf32>
    %c0_15 = arith.constant 0 : index
    %c0_16 = arith.constant 0 : index
    %c0_17 = arith.constant 0 : index
    %29 = vector.load %arg6[%c0_15, %c0_16, %c0_17] : memref<1x1x32xf32, #tpu.memory_space<vmem>>, vector<1x1x32xf32>
    %30 = vector.shape_cast %29 : vector<1x1x32xf32> to vector<1x32xf32>
    %31 = vector.broadcast %30 : vector<1x32xf32> to vector<8x32xf32>
    %32 = arith.addf %28, %31 : vector<8x32xf32>
    %cst_18 = arith.constant 0.000000e+00 : f32
    %33 = vector.broadcast %cst_18 : f32 to vector<8x32xf32>
    %34 = arith.maximumf %32, %33 : vector<8x32xf32>
    %35 = arith.truncf %34 : vector<8x32xf32> to vector<8x32xbf16>
    %c0_19 = arith.constant 0 : index
    %c0_20 = arith.constant 0 : index
    %c0_21 = arith.constant 0 : index
    %36 = vector.load %arg7[%c0_19, %c0_20, %c0_21] : memref<1x32x32xbf16, #tpu.memory_space<vmem>>, vector<1x32x32xbf16>
    %37 = vector.shape_cast %36 : vector<1x32x32xbf16> to vector<32x32xbf16>
    %cst_22 = arith.constant dense<0.000000e+00> : vector<8x32xf32>
    %38 = tpu.matmul %35, %37, %cst_22 {dimension_numbers = #tpu.dot_dimension_numbers<[1], [0], [0], [1], [0, 0, 1, 1], [], []>} : vector<8x32xbf16>, vector<32x32xbf16>, vector<8x32xf32> -> vector<8x32xf32>
    %c0_23 = arith.constant 0 : index
    %c0_24 = arith.constant 0 : index
    %c0_25 = arith.constant 0 : index
    %39 = vector.load %arg8[%c0_23, %c0_24, %c0_25] : memref<1x1x32xf32, #tpu.memory_space<vmem>>, vector<1x1x32xf32>
    %40 = vector.shape_cast %39 : vector<1x1x32xf32> to vector<1x32xf32>
    %41 = vector.broadcast %40 : vector<1x32xf32> to vector<8x32xf32>
    %42 = arith.addf %38, %41 : vector<8x32xf32>
    %cst_26 = arith.constant 0.000000e+00 : f32
    %43 = vector.broadcast %cst_26 : f32 to vector<8x32xf32>
    %44 = arith.maximumf %42, %43 : vector<8x32xf32>
    %45 = arith.truncf %44 : vector<8x32xf32> to vector<8x32xbf16>
    %c0_27 = arith.constant 0 : index
    %c0_28 = arith.constant 0 : index
    %c0_29 = arith.constant 0 : index
    %46 = vector.load %arg9[%c0_27, %c0_28, %c0_29] : memref<1x32x32xbf16, #tpu.memory_space<vmem>>, vector<1x32x32xbf16>
    %47 = vector.shape_cast %46 : vector<1x32x32xbf16> to vector<32x32xbf16>
    %cst_30 = arith.constant dense<0.000000e+00> : vector<8x32xf32>
    %48 = tpu.matmul %45, %47, %cst_30 {dimension_numbers = #tpu.dot_dimension_numbers<[1], [0], [0], [1], [0, 0, 1, 1], [], []>} : vector<8x32xbf16>, vector<32x32xbf16>, vector<8x32xf32> -> vector<8x32xf32>
    %c0_31 = arith.constant 0 : index
    %c0_32 = arith.constant 0 : index
    %c0_33 = arith.constant 0 : index
    %49 = vector.load %arg10[%c0_31, %c0_32, %c0_33] : memref<1x1x32xf32, #tpu.memory_space<vmem>>, vector<1x1x32xf32>
    %50 = vector.shape_cast %49 : vector<1x1x32xf32> to vector<1x32xf32>
    %51 = vector.broadcast %50 : vector<1x32xf32> to vector<8x32xf32>
    %52 = arith.addf %48, %51 : vector<8x32xf32>
    %53 = arith.addf %24, %52 : vector<8x32xf32>
    %c0_34 = arith.constant 0 : index
    %c0_35 = arith.constant 0 : index
    %54 = vector.load %arg11[%c0_34, %c0_35] : memref<1x32xf32, #tpu.memory_space<vmem>>, vector<1x32xf32>
    %c0_36 = arith.constant 0 : index
    %c0_37 = arith.constant 0 : index
    %55 = vector.load %arg12[%c0_36, %c0_37] : memref<1x32xf32, #tpu.memory_space<vmem>>, vector<1x32xf32>
    %cst_38 = arith.constant dense<0.000000e+00> : vector<8xf32>
    %56 = vector.multi_reduction <add>, %53, %cst_38 [1] : vector<8x32xf32> to vector<8xf32>
    %57 = vector.shape_cast %56 : vector<8xf32> to vector<8x1xf32>
    %cst_39 = arith.constant 3.200000e+01 : f32
    %58 = vector.broadcast %cst_39 : f32 to vector<8x1xf32>
    %59 = arith.divf %57, %58 : vector<8x1xf32>
    %60 = vector.broadcast %59 : vector<8x1xf32> to vector<8x32xf32>
    %61 = arith.subf %53, %60 : vector<8x32xf32>
    %62 = arith.mulf %61, %61 : vector<8x32xf32>
    %cst_40 = arith.constant dense<0.000000e+00> : vector<8xf32>
    %63 = vector.multi_reduction <add>, %62, %cst_40 [1] : vector<8x32xf32> to vector<8xf32>
    %64 = vector.shape_cast %63 : vector<8xf32> to vector<8x1xf32>
    %cst_41 = arith.constant 3.200000e+01 : f32
    %65 = vector.broadcast %cst_41 : f32 to vector<8x1xf32>
    %66 = arith.divf %64, %65 : vector<8x1xf32>
    %cst_42 = arith.constant 9.99999974E-6 : f32
    %67 = vector.broadcast %cst_42 : f32 to vector<8x1xf32>
    %68 = arith.addf %66, %67 : vector<8x1xf32>
    %69 = math.rsqrt %68 : vector<8x1xf32>
    %70 = vector.broadcast %69 : vector<8x1xf32> to vector<8x32xf32>
    %71 = arith.mulf %61, %70 : vector<8x32xf32>
    %72 = vector.broadcast %54 : vector<1x32xf32> to vector<8x32xf32>
    %73 = arith.mulf %71, %72 : vector<8x32xf32>
    %74 = vector.broadcast %55 : vector<1x32xf32> to vector<8x32xf32>
    %75 = arith.addf %73, %74 : vector<8x32xf32>
    %c0_43 = arith.constant 0 : index
    %c0_44 = arith.constant 0 : index
    %76 = vector.load %arg15[%c0_43, %c0_44] : memref<8x32xf32, #tpu.memory_space<vmem>>, vector<8x32xf32>
    tpu.vector_store %arg15[%c0_43, %c0_44], %75 {strides = array<i32>} : memref<8x32xf32, #tpu.memory_space<vmem>>, vector<8x32xf32>,
    %77 = arith.truncf %75 : vector<8x32xf32> to vector<8x32xbf16>
    %c0_45 = arith.constant 0 : index
    %c0_46 = arith.constant 0 : index
    %78 = vector.load %arg13[%c0_45, %c0_46] : memref<32x6xbf16, #tpu.memory_space<vmem>>, vector<32x6xbf16>
    %cst_47 = arith.constant dense<0.000000e+00> : vector<8x6xf32>
    %79 = tpu.matmul %77, %78, %cst_47 {dimension_numbers = #tpu.dot_dimension_numbers<[1], [0], [0], [1], [0, 0, 1, 1], [], []>} : vector<8x32xbf16>, vector<32x6xbf16>, vector<8x6xf32> -> vector<8x6xf32>
    %c0_48 = arith.constant 0 : index
    %c0_49 = arith.constant 0 : index
    %80 = vector.load %arg14[%c0_48, %c0_49] : memref<1x6xf32, #tpu.memory_space<vmem>>, vector<1x6xf32>
    %81 = vector.broadcast %80 : vector<1x6xf32> to vector<8x6xf32>
    %82 = arith.addf %79, %81 : vector<8x6xf32>
    %c0_50 = arith.constant 0 : index
    %c0_51 = arith.constant 0 : index
    %83 = vector.load %arg16[%c0_50, %c0_51] : memref<8x6xf32, #tpu.memory_space<vmem>>, vector<8x6xf32>
    tpu.vector_store %arg16[%c0_50, %c0_51], %82 {strides = array<i32>} : memref<8x6xf32, #tpu.memory_space<vmem>>, vector<8x6xf32>,
    return
  }
  func.func @transform_0(%arg0: i32) -> (i32, i32) {
    %c0_i32 = arith.constant 0 : i32
    %c0_i32_0 = arith.constant 0 : i32
    return %arg0, %c0_i32 : i32, i32
  }
  func.func @transform_1(%arg0: i32) -> (i32, i32) {
    %c0_i32 = arith.constant 0 : i32
    %c0_i32_0 = arith.constant 0 : i32
    return %arg0, %c0_i32 : i32, i32
  }
  func.func @transform_2(%arg0: i32) -> (i32, i32) {
    %c0_i32 = arith.constant 0 : i32
    %c0_i32_0 = arith.constant 0 : i32
    %c0_i32_1 = arith.constant 0 : i32
    return %c0_i32, %c0_i32_0 : i32, i32
  }
  func.func @transform_3(%arg0: i32) -> (i32, i32) {
    %c0_i32 = arith.constant 0 : i32
    %c0_i32_0 = arith.constant 0 : i32
    %c0_i32_1 = arith.constant 0 : i32
    return %c0_i32, %c0_i32_0 : i32, i32
  }
  func.func @transform_4(%arg0: i32) -> (i32, i32, i32) {
    %c0_i32 = arith.constant 0 : i32
    %c0_i32_0 = arith.constant 0 : i32
    %c0_i32_1 = arith.constant 0 : i32
    %c0_i32_2 = arith.constant 0 : i32
    return %c0_i32, %c0_i32_0, %c0_i32_1 : i32, i32, i32
  }
  func.func @transform_5(%arg0: i32) -> (i32, i32, i32) {
    %c0_i32 = arith.constant 0 : i32
    %c0_i32_0 = arith.constant 0 : i32
    %c0_i32_1 = arith.constant 0 : i32
    %c0_i32_2 = arith.constant 0 : i32
    return %c0_i32, %c0_i32_0, %c0_i32_1 : i32, i32, i32
  }
  func.func @transform_6(%arg0: i32) -> (i32, i32, i32) {
    %c0_i32 = arith.constant 0 : i32
    %c0_i32_0 = arith.constant 0 : i32
    %c0_i32_1 = arith.constant 0 : i32
    %c0_i32_2 = arith.constant 0 : i32
    return %c0_i32, %c0_i32_0, %c0_i32_1 : i32, i32, i32
  }
  func.func @transform_7(%arg0: i32) -> (i32, i32, i32) {
    %c0_i32 = arith.constant 0 : i32
    %c0_i32_0 = arith.constant 0 : i32
    %c0_i32_1 = arith.constant 0 : i32
    %c0_i32_2 = arith.constant 0 : i32
    return %c0_i32, %c0_i32_0, %c0_i32_1 : i32, i32, i32
  }
  func.func @transform_8(%arg0: i32) -> (i32, i32, i32) {
    %c0_i32 = arith.constant 0 : i32
    %c0_i32_0 = arith.constant 0 : i32
    %c0_i32_1 = arith.constant 0 : i32
    %c0_i32_2 = arith.constant 0 : i32
    return %c0_i32, %c0_i32_0, %c0_i32_1 : i32, i32, i32
  }
  func.func @transform_9(%arg0: i32) -> (i32, i32, i32) {
    %c0_i32 = arith.constant 0 : i32
    %c0_i32_0 = arith.constant 0 : i32
    %c0_i32_1 = arith.constant 0 : i32
    %c0_i32_2 = arith.constant 0 : i32
    return %c0_i32, %c0_i32_0, %c0_i32_1 : i32, i32, i32
  }
  func.func @transform_10(%arg0: i32) -> (i32, i32) {
    %c0_i32 = arith.constant 0 : i32
    %c0_i32_0 = arith.constant 0 : i32
    %c0_i32_1 = arith.constant 0 : i32
    return %c0_i32, %c0_i32_0 : i32, i32
  }
  func.func @transform_11(%arg0: i32) -> (i32, i32) {
    %c0_i32 = arith.constant 0 : i32
    %c0_i32_0 = arith.constant 0 : i32
    %c0_i32_1 = arith.constant 0 : i32
    return %c0_i32, %c0_i32_0 : i32, i32
  }
  func.func @transform_12(%arg0: i32) -> (i32, i32) {
    %c0_i32 = arith.constant 0 : i32
    %c0_i32_0 = arith.constant 0 : i32
    %c0_i32_1 = arith.constant 0 : i32
    return %c0_i32, %c0_i32_0 : i32, i32
  }
  func.func @transform_13(%arg0: i32) -> (i32, i32) {
    %c0_i32 = arith.constant 0 : i32
    %c0_i32_0 = arith.constant 0 : i32
    %c0_i32_1 = arith.constant 0 : i32
    return %c0_i32, %c0_i32_0 : i32, i32
  }
  func.func @transform_14(%arg0: i32) -> (i32, i32) {
    %c0_i32 = arith.constant 0 : i32
    %c0_i32_0 = arith.constant 0 : i32
    return %arg0, %c0_i32 : i32, i32
  }
  func.func @transform_15(%arg0: i32) -> (i32, i32) {
    %c0_i32 = arith.constant 0 : i32
    %c0_i32_0 = arith.constant 0 : i32
    return %arg0, %c0_i32 : i32, i32
  }
}

</mosaic_0001>

<bundles_post_ra>
// kernel: structure_module_forward.10
= control target key start
LH: loop header
LB: loop body
LE: loop exit
PB: predicated region body
PF: predicated region fallthrough
CT: control target
= control target key end

     0   :  { %10 = vsyncpa [#allocation3], 0  ;;  %s184_s18 = smov [#allocation2]   ;;  %s242_s0 = inlined_call_operand.hbm [shape: f32[8,32], index: 0, kind: input, shape index: {}]   ;;  %s243_s1 = inlined_call_operand.vmem [shape: f32[1,32], index: 1, kind: input, shape index: {}]   ;;  %s244_s2 = inlined_call_operand.vmem [shape: f32[1,32], index: 2, kind: input, shape index: {}]   ;;  %s245_s3 = inlined_call_operand.vmem [shape: bf16[32,32], index: 3, kind: input, shape index: {}]   ;;  %s246_s4 = inlined_call_operand.vmem [shape: f32[1,32], index: 4, kind: input, shape index: {}]   ;;  %s247_s5 = inlined_call_operand.vmem [shape: f32[8,32], index: 5, kind: output, shape index: {}]  }
   0x1   :  { %s17_s19 = sshll.u32 %s184_s18, 4  ;;  %s18_s19 = int_to_ptr.vmem [resolvable:$true] %s17_s19 }
   0x2   :  { %s170_s20 = scalar_lea.vmem %s18_s19, 128  ;;  %p175_p1 = scmp.lt.s32.totalorder %s18_s19, %s18_s19 }
   0x3   :  { %p171_p0 = scmp.ne.s32.totalorder %s18_s19, %s170_s20  ;;  %p176_p2 = scmp.lt.s32.totalorder %s170_s20, %s170_s20 }
   0x5   :  { %p177_p3 = por %p176_p2, %p175_p1 }
   0x7   :  { %p178_p4 = pnand %p177_p3, %p171_p0 }
   0x9   :  { %181 = shalt.err (!%p178_p4)
}
   0xa   :  { %20 = dma.hbm_to_vmem [thread:$0]  %s242_s0, 128, %s18_s19, [#allocation3]  }
   0xb   :  { %182 = dma.done.wait [#allocation3], 128  }
   0xc   :  { %183 = vsyncadd [#allocation3], 4294967168  ;;  %vm36_vm0 = vcmask 261120   ;;  %v33_v0 = vld [vmem:[#allocation2] sm:$0xff]  ;;  %v158_v7 = vld [vmem:[%s245_s3 + $0x8] sm:$0xff]   ;;  %v185_v8 = vmov 0.0  }
   0xd   :  { %v37_v1 = vsel %vm36_vm0, %v33_v0, 0.0  ;;  %147 = vmatprep.subr.bf16.mxu0 %v185_v8  ;;  %vm186_vm1 = vmmov 0   ;;  %v159_v9 = vld [vmem:[%s245_s3] sm:$0xff]  }
   0xe   :  { %38 = vadd.xlane.f32.xlu0 %v37_v1  ;;  %151 = vmatprep.mubr.msk.bf16.mxu0 %vm186_vm1, %v185_v8  ;;  %v138_v14 = vld [vmem:[%s243_s1] ss:$0 sm:$0xff] }
   0xf   :  { %148 = vmatpush3.bf16.msra.mxu0 %v158_v7  ;;  %v139_v16 = vld [vmem:[%s244_s2] ss:$0 sm:$0xff] }
  0x10   :  { %149 = vmatprep.subr.bf16.mxu0 %v185_v8  ;;  %v140_v20 = vld [vmem:[%s246_s4] ss:$0 sm:$0xff] }
  0x13   :  { %150 = vmatpush3.bf16.msra.mxu0 %v159_v9 }
  0x97   :  { %v39_v2 = vpop.xlane.xlu0 %38 }
  0x98   :  { %v41_v3 = vmul.f32 0.03125, %v39_v2 }
  0x9a   :  { %v42_v4 = vsub.f32 %v33_v0, %v41_v3 }
  0x9c   :  { %v43_v5 = vmul.f32 %v42_v4, %v42_v4 }
  0x9e   :  { %v44_v6 = vsel %vm36_vm0, %v43_v5, 0.0 }
  0x9f   :  { %45 = vadd.xlane.f32.xlu0 %v44_v6 }
 0x128   :  { %v46_v10 = vpop.xlane.xlu0 %45 }
 0x129   :  { %v47_v11 = vmul.f32 0.03125, %v46_v10 }
 0x12b   :  { %v48_v12 = vadd.f32 1e-05, %v47_v11 }
 0x12d   :  { %160 = vrsqrt.f32 %v48_v12 }
 0x13a   :  { %v161_v13 = vpop.eup %160 }
 0x13b   :  { %v50_v15 = vmul.f32 %v161_v13, %v42_v4 }
 0x13d   :  { %v57_v17 = vmul.f32 %v138_v14, %v50_v15 }
 0x13f   :  { %v64_v18 = vadd.f32 %v139_v16, %v57_v17 }
 0x141   :  { %v65_v19 = vpack.c.bf16 %v64_v18, %v64_v18 }
 0x143   :  { %152 = vmatmul.mubr.msk.bf16.vlgmr.msra.gmra.mxu0 %vm36_vm0, %v65_v19 }
 0x203   :  { %v126_v21 = vpop.f32.mrf.mxu0 }
 0x204   :  { %v127_v22 = vadd.f32 %v140_v20, %v126_v21 }
 0x205   :  { %v153_v23 = vpop.f32.mrf.mxu0 }
 0x206   :  { %132 = vst.msk [vmem:[%s247_s5] sm:$0xff] %vm36_vm0, %v127_v22 }
 0x207   :  { %v129_v24 = vpop.f32.mrf.mxu0 }
 0x209   :  { %v154_v25 = vpop.f32.mrf.mxu0 }
 0x20a   :  { %137 = vsyncpa [#allocation3], 1 }

// kernel: structure_module_forward.12
= control target key start
LH: loop header
LB: loop body
LE: loop exit
PB: predicated region body
PF: predicated region fallthrough
CT: control target
= control target key end

     0   :  { %v195_v0 = vmov 0.0   ;;  %vm196_vm0 = vmmov 0   ;;  %v197_v3 = vmov 0   ;;  %vm73_vm1 = vcmask 261120   ;;  %s251_s1 = inlined_call_operand.vmem [shape: bf16[32,384], index: 1, kind: input, shape index: {}]   ;;  %s252_s0 = inlined_call_operand.vmem [shape: bf16[8,32], index: 0, kind: input, shape index: {}]   ;;  %s253_s2 = inlined_call_operand.vmem [shape: f32[1,384], index: 2, kind: input, shape index: {}]   ;;  %s254_s3 = inlined_call_operand.vmem [shape: f32[8,384], index: 3, kind: output, shape index: {}]  }
   0x1   :  { %176 = vmatprep.subr.bf16.mxu1 %v195_v0  ;;  %v187_v1 = vld [vmem:[%s251_s1 + $0x1c] ss:$12 sps:$4 sm:$0xff]   ;;  %180 = vmatprep.mubr.msk.bf16.mxu1 %vm196_vm0, %v195_v0  ;;  %v189_v2 = vld [vmem:[%s251_s1 + $0x20] ss:$12 sps:$4 sm:$0xff]   ;;  %v190_v4 = vld [vmem:[%s251_s1 + $0x18] ss:$12 sps:$4 sm:$0xff]   ;;  %v26_v9 = vlaneseq }
   0x2   :  { %109 = vmatprep.mubr.bf16.mxu0 %v197_v3  ;;  %89 = vmatprep.subr.bf16.mxu0 %v187_v1  ;;  %v191_v5 = vld [vmem:[%s251_s1 + $0x4] ss:$12 sps:$4 sm:$0xff]   ;;  %v193_v6 = vld [vmem:[%s251_s1 + $0x8] ss:$12 sps:$4 sm:$0xff]   ;;  %v194_v7 = vld [vmem:[%s251_s1] ss:$12 sps:$4 sm:$0xff]  }
   0x3   :  { %177 = vmatpush3.bf16.msra.mxu1 %v189_v2  ;;  %90 = vmatpush1.bf16.msra.mxu0 %v190_v4  ;;  %v15_v8 = vld [vmem:[%s252_s0] sm:$0xf]  ;;  %v27_v10 = vshrl.u32 %v26_v9, 7 }
   0x4   :  { %178 = vmatprep.subr.bf16.mxu1 %v195_v0  ;;  %91 = vmatprep.subr.bf16.mxu0 %v191_v5  ;;  %v24_v12 = vld [vmem:[%s253_s2] sm:$0x7] }
   0x5   :  { %v36_v11 = vsub.s32 2, %v27_v10  ;;  %v28_v13 = vsub.s32 0, %v27_v10  ;;  %v32_v14 = vsub.s32 1, %v27_v10 }
   0x7   :  { %179 = vmatpush3.bf16.msra.mxu1 %v193_v6  ;;  %92 = vmatpush1.bf16.msra.mxu0 %v194_v7  ;;  %v37_v15 = vrot.slane %v24_v12, %v36_v11  ;;  %v29_v16 = vrot.slane %v24_v12, %v28_v13  ;;  %v33_v18 = vrot.slane %v24_v12, %v32_v14 }
   0xa   :  { %181 = vmatmul.mubr.msk.bf16.vlgmr.msra.gmra.mxu1 %vm73_vm1, %v15_v8  ;;  %171 = vmatmul.mubr.msk.bf16.vlgmr.msra.gmra.mxu0 %vm73_vm1, %v15_v8 }
  0xca   :  { %v152_v17 = vpop.f32.mrf.mxu1  ;;  %v111_v20 = vpop.f32.mrf.mxu0 }
  0xcb   :  { %v153_v19 = vadd.f32 %v152_v17, %v37_v15  ;;  %v112_v21 = vadd.f32 %v111_v20, %v29_v16 }
  0xcc   :  { %v182_v22 = vpop.f32.mrf.mxu1  ;;  %v113_v23 = vpop.f32.mrf.mxu0 }
  0xcd   :  { %160 = vst [vmem:[%s254_s3 + $0x10] sm:$0xff] %v153_v19  ;;  %158 = vst [vmem:[%s254_s3] sm:$0xff] %v112_v21  ;;  %v114_v24 = vadd.f32 %v113_v23, %v33_v18 }
  0xce   :  { %v155_v25 = vpop.f32.mrf.mxu1  ;;  %v115_v26 = vpop.f32.mrf.mxu0 }
  0xcf   :  { %159 = vst [vmem:[%s254_s3 + $0x8] sm:$0xff] %v114_v24 }
  0xd0   :  { %v183_v27 = vpop.f32.mrf.mxu1  ;;  %v116_v28 = vpop.f32.mrf.mxu0 }

// kernel: structure_module_forward.11
= control target key start
LH: loop header
LB: loop body
LE: loop exit
PB: predicated region body
PF: predicated region fallthrough
CT: control target
= control target key end

     0   :  { %vm33_vm0 = vcmask 130048   ;;  %vm199_vm1 = vcmask 125952   ;;  %vm300_vm2 = vcmask 31744   ;;  %s570_s0 = inlined_call_operand.vmem [shape: f32[64,16], index: 0, kind: input, shape index: {}]   ;;  %s571_s3 = inlined_call_operand.vmem [shape: bf16[16,4], index: 3, kind: input, shape index: {}]   ;;  %s572_s1 = inlined_call_operand.vmem [shape: f32[1,16], index: 1, kind: input, shape index: {}]   ;;  %s573_s2 = inlined_call_operand.vmem [shape: f32[1,16], index: 2, kind: input, shape index: {}]   ;;  %s574_s5 = inlined_call_operand.vmem [shape: bf16[64,16], index: 5, kind: output, shape index: {0}]   ;;  %s575_s4 = inlined_call_operand.vmem [shape: f32[1,4], index: 4, kind: input, shape index: {}]   ;;  %s576_s6 = inlined_call_operand.vmem [shape: f32[64,4], index: 6, kind: output, shape index: {1}]  }
   0x1   :  { %v23_v0 = vld [vmem:[%s570_s0] sm:$0xff]  ;;  %v24_v2 = vld [vmem:[%s570_s0 + $0x8] sm:$0xff]  ;;  %v25_v8 = vld [vmem:[%s570_s0 + $0x10] sm:$0xff] }
   0x2   :  { %v27_v1 = vld [vmem:[%s570_s0 + $0x20] sm:$0xff]  ;;  %v34_v3 = vsel %vm33_vm0, %v23_v0, 0.0  ;;  %v28_v5 = vld [vmem:[%s570_s0 + $0x28] sm:$0xff]  ;;  %v37_v6 = vsel %vm33_vm0, %v24_v2, 0.0  ;;  %v26_v9 = vld [vmem:[%s570_s0 + $0x18] sm:$0xff]  ;;  %v40_v10 = vsel %vm33_vm0, %v25_v8, 0.0 }
   0x3   :  { %v46_v4 = vsel %vm33_vm0, %v27_v1, 0.0  ;;  %35 = vadd.xlane.f32.xlu0 %v34_v3  ;;  %v49_v7 = vsel %vm33_vm0, %v28_v5, 0.0  ;;  %v43_v11 = vsel %vm33_vm0, %v26_v9, 0.0  ;;  %v29_v12 = vld [vmem:[%s570_s0 + $0x30] sm:$0xff]  ;;  %v30_v13 = vld [vmem:[%s570_s0 + $0x38] sm:$0xff]  ;;  %v358_v56 = vld [vmem:[%s571_s3] sm:$0xff]  }
   0x4   :  { %47 = vadd.xlane.f32.xlu1 %v46_v4  ;;  %v52_v14 = vsel %vm33_vm0, %v29_v12, 0.0  ;;  %v55_v15 = vsel %vm33_vm0, %v30_v13, 0.0  ;;  %346 = vmatprep.subr.bf16.mxu0 %v358_v56 }
   0x5   :  { %356 = vmatprep.subr.bf16.mxu1 %v358_v56  ;;  %347 = vmatpush3.bf16.msra.mxu0 %v358_v56 }
   0x6   :  { %357 = vmatpush3.bf16.msra.mxu1 %v358_v56 }
   0x7   :  { %38 = vadd.xlane.f32.xlu0 %v37_v6 }
   0x8   :  { %50 = vadd.xlane.f32.xlu1 %v49_v7 }
   0xb   :  { %41 = vadd.xlane.f32.xlu0 %v40_v10 }
   0xc   :  { %44 = vadd.xlane.f32.xlu1 %v43_v11 }
   0xf   :  { %53 = vadd.xlane.f32.xlu0 %v52_v14 }
  0x10   :  { %56 = vadd.xlane.f32.xlu1 %v55_v15 }
  0x8c   :  { %v36_v16 = vpop.xlane.xlu0 %35 }
  0x8d   :  { %v48_v17 = vpop.xlane.xlu1 %47  ;;  %v59_v18 = vmul.f32 0.0625, %v36_v16 }
  0x8e   :  { %v63_v19 = vmul.f32 0.0625, %v48_v17  ;;  %v317_v17 = vld [vmem:[%s572_s1] ss:$0 sm:$0xff] }
  0x8f   :  { %v442_v20 = vsub.f32 %v23_v0, %v59_v18 }
  0x90   :  { %v444_v21 = vsub.f32 %v27_v1, %v63_v19  ;;  %v39_v22 = vpop.xlane.xlu0 %38 }
  0x91   :  { %v51_v23 = vpop.xlane.xlu1 %50  ;;  %v60_v24 = vmul.f32 0.0625, %v39_v22  ;;  %v75_v26 = vmul.f32 %v442_v20, %v442_v20  ;;  %v318_v22 = vld [vmem:[%s573_s2] ss:$0 sm:$0xff] }
  0x92   :  { %v64_v25 = vmul.f32 0.0625, %v51_v23  ;;  %v79_v27 = vmul.f32 %v444_v21, %v444_v21 }
  0x93   :  { %v450_v28 = vsub.f32 %v24_v2, %v60_v24  ;;  %v83_v30 = vsel %vm33_vm0, %v75_v26, 0.0 }
  0x94   :  { %v452_v29 = vsub.f32 %v28_v5, %v64_v25  ;;  %84 = vadd.xlane.f32.xlu0 %v83_v30  ;;  %v42_v31 = vpop.xlane.xlu0 %41  ;;  %v95_v33 = vsel %vm33_vm0, %v79_v27, 0.0 }
  0x95   :  { %v45_v32 = vpop.xlane.xlu1 %44  ;;  %v61_v34 = vmul.f32 0.0625, %v42_v31  ;;  %v76_v36 = vmul.f32 %v450_v28, %v450_v28 }
  0x96   :  { %v62_v35 = vmul.f32 0.0625, %v45_v32  ;;  %v80_v37 = vmul.f32 %v452_v29, %v452_v29 }
  0x97   :  { %v460_v38 = vsub.f32 %v25_v8, %v61_v34  ;;  %v86_v40 = vsel %vm33_vm0, %v76_v36, 0.0 }
  0x98   :  { %v462_v39 = vsub.f32 %v26_v9, %v62_v35  ;;  %96 = vadd.xlane.f32.xlu0 %v95_v33  ;;  %87 = vadd.xlane.f32.xlu1 %v86_v40  ;;  %v54_v41 = vpop.xlane.xlu0 %53  ;;  %v98_v43 = vsel %vm33_vm0, %v80_v37, 0.0 }
  0x99   :  { %v57_v42 = vpop.xlane.xlu1 %56  ;;  %v65_v44 = vmul.f32 0.0625, %v54_v41  ;;  %v77_v46 = vmul.f32 %v460_v38, %v460_v38 }
  0x9a   :  { %v66_v45 = vmul.f32 0.0625, %v57_v42  ;;  %v78_v47 = vmul.f32 %v462_v39, %v462_v39 }
  0x9b   :  { %v470_v48 = vsub.f32 %v29_v12, %v65_v44  ;;  %v89_v50 = vsel %vm33_vm0, %v77_v46, 0.0 }
  0x9c   :  { %v472_v49 = vsub.f32 %v30_v13, %v66_v45  ;;  %99 = vadd.xlane.f32.xlu1 %v98_v43  ;;  %90 = vadd.xlane.f32.xlu0 %v89_v50  ;;  %v92_v51 = vsel %vm33_vm0, %v78_v47, 0.0 }
  0x9d   :  { %v81_v52 = vmul.f32 %v470_v48, %v470_v48 }
  0x9e   :  { %v82_v53 = vmul.f32 %v472_v49, %v472_v49 }
  0x9f   :  { %v101_v54 = vsel %vm33_vm0, %v81_v52, 0.0 }
  0xa0   :  { %93 = vadd.xlane.f32.xlu1 %v92_v51  ;;  %102 = vadd.xlane.f32.xlu0 %v101_v54  ;;  %v104_v55 = vsel %vm33_vm0, %v82_v53, 0.0 }
  0xa4   :  { %105 = vadd.xlane.f32.xlu1 %v104_v55 }
 0x11d   :  { %v85_v57 = vpop.xlane.xlu0 %84 }
 0x11e   :  { %v107_v58 = vmul.f32 0.0625, %v85_v57 }
 0x120   :  { %v115_v59 = vadd.f32 1e-05, %v107_v58 }
 0x121   :  { %v88_v60 = vpop.xlane.xlu1 %87  ;;  %v97_v61 = vpop.xlane.xlu0 %96 }
 0x122   :  { %359 = vrsqrt.f32 %v115_v59  ;;  %v108_v62 = vmul.f32 0.0625, %v88_v60  ;;  %v111_v63 = vmul.f32 0.0625, %v97_v61 }
 0x124   :  { %v116_v0 = vadd.f32 1e-05, %v108_v62  ;;  %v119_v1 = vadd.f32 1e-05, %v111_v63  ;;  %v327_v63 = vld [vmem:[%s575_s4] ss:$0 sm:$0xff] }
 0x125   :  { %v100_v2 = vpop.xlane.xlu1 %99  ;;  %v91_v3 = vpop.xlane.xlu0 %90 }
 0x126   :  { %361 = vrsqrt.f32 %v116_v0  ;;  %v112_v4 = vmul.f32 0.0625, %v100_v2  ;;  %v109_v5 = vmul.f32 0.0625, %v91_v3 }
 0x127   :  { %363 = vrsqrt.f32 %v119_v1 }
 0x128   :  { %v120_v6 = vadd.f32 1e-05, %v112_v4  ;;  %v117_v7 = vadd.f32 1e-05, %v109_v5 }
 0x129   :  { %v94_v8 = vpop.xlane.xlu1 %93  ;;  %v103_v9 = vpop.xlane.xlu0 %102 }
 0x12a   :  { %365 = vrsqrt.f32 %v120_v6  ;;  %v110_v10 = vmul.f32 0.0625, %v94_v8  ;;  %v113_v11 = vmul.f32 0.0625, %v103_v9 }
 0x12b   :  { %367 = vrsqrt.f32 %v117_v7 }
 0x12c   :  { %v118_v12 = vadd.f32 1e-05, %v110_v10  ;;  %v121_v13 = vadd.f32 1e-05, %v113_v11 }
 0x12d   :  { %v106_v14 = vpop.xlane.xlu1 %105 }
 0x12e   :  { %369 = vrsqrt.f32 %v118_v12  ;;  %v114_v15 = vmul.f32 0.0625, %v106_v14 }
 0x12f   :  { %v360_v16 = vpop.eup %359  ;;  %371 = vrsqrt.f32 %v121_v13 }
 0x130   :  { %v122_v18 = vadd.f32 1e-05, %v114_v15  ;;  %v131_v19 = vmul.f32 %v360_v16, %v442_v20 }
 0x132   :  { %373 = vrsqrt.f32 %v122_v18  ;;  %v145_v23 = vmul.f32 %v317_v17, %v131_v19 }
 0x133   :  { %v362_v24 = vpop.eup %361 }
 0x134   :  { %v364_v25 = vpop.eup %363  ;;  %v132_v26 = vmul.f32 %v362_v24, %v450_v28  ;;  %v159_v27 = vadd.f32 %v318_v22, %v145_v23 }
 0x135   :  { %v135_v30 = vmul.f32 %v364_v25, %v444_v21 }
 0x136   :  { %v146_v31 = vmul.f32 %v317_v17, %v132_v26  ;;  %v333_v32 = vpack.c.bf16 %v159_v27, %v159_v27 }
 0x137   :  { %v366_v33 = vpop.eup %365  ;;  %v149_v34 = vmul.f32 %v317_v17, %v135_v30 }
 0x138   :  { %v368_v35 = vpop.eup %367  ;;  %v160_v20 = vadd.f32 %v318_v22, %v146_v31  ;;  %200 = vst.msk [vmem:[%s574_s5] sm:$0xf] %vm199_vm1, %v333_v32  ;;  %v136_v36 = vmul.f32 %v366_v33, %v452_v29 }
 0x139   :  { %v163_v37 = vadd.f32 %v318_v22, %v149_v34  ;;  %v133_v28 = vmul.f32 %v368_v35, %v460_v38 }
 0x13a   :  { %v167_v40 = vpack.c.bf16 %v160_v20, %v159_v27  ;;  %v334_v41 = vpack.c.bf16 %v160_v20, %v160_v20  ;;  %v150_v42 = vmul.f32 %v317_v17, %v136_v36 }
 0x13b   :  { %v370_v21 = vpop.eup %369  ;;  %v337_v43 = vpack.c.bf16 %v163_v37, %v163_v37  ;;  %v147_v44 = vmul.f32 %v317_v17, %v133_v28 }
 0x13c   :  { %v372_v45 = vpop.eup %371  ;;  %201 = vst.msk [vmem:[%s574_s5 + $0x4] sm:$0xf] %vm199_vm1, %v334_v41  ;;  %348 = vmatprep.mubr.msk.bf16.mxu0 %vm33_vm0, %v167_v40  ;;  %v164_v46 = vadd.f32 %v318_v22, %v150_v42  ;;  %v134_v29 = vmul.f32 %v370_v21, %v462_v39 }
 0x13d   :  { %204 = vst.msk [vmem:[%s574_s5 + $0x10] sm:$0xf] %vm199_vm1, %v337_v43  ;;  %v161_v38 = vadd.f32 %v318_v22, %v147_v44  ;;  %v137_v47 = vmul.f32 %v372_v45, %v470_v48 }
 0x13e   :  { %v169_v50 = vpack.c.bf16 %v164_v46, %v163_v37  ;;  %v338_v51 = vpack.c.bf16 %v164_v46, %v164_v46  ;;  %v148_v52 = vmul.f32 %v317_v17, %v134_v29 }
 0x13f   :  { %v374_v53 = vpop.eup %373  ;;  %v335_v54 = vpack.c.bf16 %v161_v38, %v161_v38  ;;  %v151_v55 = vmul.f32 %v317_v17, %v137_v47 }
 0x140   :  { %205 = vst.msk [vmem:[%s574_s5 + $0x14] sm:$0xf] %vm199_vm1, %v338_v51  ;;  %352 = vmatprep.mubr.msk.bf16.mxu1 %vm33_vm0, %v169_v50  ;;  %v162_v39 = vadd.f32 %v318_v22, %v148_v52  ;;  %v138_v56 = vmul.f32 %v374_v53, %v472_v49 }
 0x141   :  { %202 = vst.msk [vmem:[%s574_s5 + $0x8] sm:$0xf] %vm199_vm1, %v335_v54  ;;  %v165_v48 = vadd.f32 %v318_v22, %v151_v55 }
 0x142   :  { %v168_v57 = vpack.c.bf16 %v162_v39, %v161_v38  ;;  %v336_v58 = vpack.c.bf16 %v162_v39, %v162_v39  ;;  %v152_v59 = vmul.f32 %v317_v17, %v138_v56 }
 0x143   :  { %v339_v60 = vpack.c.bf16 %v165_v48, %v165_v48 }
 0x144   :  { %203 = vst.msk [vmem:[%s574_s5 + $0xc] sm:$0xf] %vm199_vm1, %v336_v58  ;;  %349 = vmatmul.mubr.msk.bf16.vlgmr.msra.gmra.mxu0 %vm33_vm0, %v168_v57  ;;  %v166_v61 = vadd.f32 %v318_v22, %v152_v59 }
 0x145   :  { %206 = vst.msk [vmem:[%s574_s5 + $0x18] sm:$0xf] %vm199_vm1, %v339_v60 }
 0x146   :  { %v170_v49 = vpack.c.bf16 %v166_v61, %v165_v48  ;;  %v340_v62 = vpack.c.bf16 %v166_v61, %v166_v61 }
 0x148   :  { %207 = vst.msk [vmem:[%s574_s5 + $0x1c] sm:$0xf] %vm199_vm1, %v340_v62  ;;  %353 = vmatmul.mubr.msk.bf16.vlgmr.msra.gmra.mxu1 %vm33_vm0, %v170_v49 }
 0x204   :  { %v350_v0 = vpop.f32.mrf.mxu0 }
 0x205   :  { %v278_v1 = vadd.f32 %v350_v0, %v327_v63 }
 0x206   :  { %v269_v2 = vpop.f32.mrf.mxu0 }
 0x207   :  { %303 = vst.msk [vmem:[%s576_s6 + $0x10] sm:$0xff] %vm300_vm2, %v278_v1  ;;  %v270_v3 = vadd.f32 %v327_v63, %v269_v2 }
 0x208   :  { %v351_v4 = vpop.f32.mrf.mxu0  ;;  %v354_v5 = vpop.f32.mrf.mxu1 }
 0x209   :  { %301 = vst.msk [vmem:[%s576_s6] sm:$0xff] %vm300_vm2, %v270_v3  ;;  %v281_v6 = vadd.f32 %v351_v4, %v327_v63  ;;  %v294_v7 = vadd.f32 %v354_v5, %v327_v63 }
 0x20a   :  { %v272_v8 = vpop.f32.mrf.mxu0  ;;  %v285_v9 = vpop.f32.mrf.mxu1 }
 0x20b   :  { %304 = vst.msk [vmem:[%s576_s6 + $0x18] sm:$0xff] %vm300_vm2, %v281_v6  ;;  %307 = vst.msk [vmem:[%s576_s6 + $0x30] sm:$0xff] %vm300_vm2, %v294_v7  ;;  %v273_v10 = vadd.f32 %v327_v63, %v272_v8  ;;  %v286_v11 = vadd.f32 %v327_v63, %v285_v9 }
 0x20c   :  { %v355_v12 = vpop.f32.mrf.mxu1 }
 0x20d   :  { %302 = vst.msk [vmem:[%s576_s6 + $0x8] sm:$0xff] %vm300_vm2, %v273_v10  ;;  %305 = vst.msk [vmem:[%s576_s6 + $0x20] sm:$0xff] %vm300_vm2, %v286_v11  ;;  %v297_v13 = vadd.f32 %v355_v12, %v327_v63 }
 0x20e   :  { %v288_v14 = vpop.f32.mrf.mxu1 }
 0x20f   :  { %308 = vst.msk [vmem:[%s576_s6 + $0x38] sm:$0xff] %vm300_vm2, %v297_v13  ;;  %v289_v15 = vadd.f32 %v327_v63, %v288_v14 }
 0x211   :  { %306 = vst.msk [vmem:[%s576_s6 + $0x28] sm:$0xff] %vm300_vm2, %v289_v15 }

// kernel: structure_module_forward.14
= control target key start
LH: loop header
LB: loop body
LE: loop exit
PB: predicated region body
PF: predicated region fallthrough
CT: control target
= control target key end

     0   :  { %vm198_vm0 = vcmask 261120   ;;  %s340_s1 = inlined_call_operand.vmem [shape: bf16[256,32], index: 1, kind: input, shape index: {}]   ;;  %s341_s0 = inlined_call_operand.vmem [shape: bf16[8,256], index: 0, kind: input, shape index: {}]   ;;  %s342_s2 = inlined_call_operand.vmem [shape: f32[1,32], index: 2, kind: input, shape index: {}]   ;;  %s343_s3 = inlined_call_operand.vmem [shape: f32[8,32], index: 3, kind: output, shape index: {}]  }
   0x1   :  { %v245_v0 = vld [vmem:[%s340_s1 + $0x78] sm:$0xff]   ;;  %v247_v2 = vld [vmem:[%s340_s1 + $0x70] sm:$0xff]   ;;  %v249_v4 = vld [vmem:[%s340_s1 + $0x68] sm:$0xff]  }
   0x2   :  { %v246_v1 = vld [vmem:[%s340_s1 + $0x38] sm:$0xff]   ;;  %223 = vmatprep.subr.bf16.mxu0 %v245_v0  ;;  %v248_v3 = vld [vmem:[%s340_s1 + $0x30] sm:$0xff]   ;;  %v250_v5 = vld [vmem:[%s340_s1 + $0x28] sm:$0xff]  }
   0x3   :  { %224 = vmatpush3.bf16.msra.mxu0 %v246_v1  ;;  %v251_v6 = vld [vmem:[%s340_s1 + $0x60] sm:$0xff]   ;;  %v253_v8 = vld [vmem:[%s340_s1 + $0x58] sm:$0xff]   ;;  %v255_v10 = vld [vmem:[%s340_s1 + $0x50] sm:$0xff]  }
   0x4   :  { %225 = vmatprep.subr.bf16.mxu0 %v247_v2  ;;  %v252_v7 = vld [vmem:[%s340_s1 + $0x20] sm:$0xff]   ;;  %v254_v9 = vld [vmem:[%s340_s1 + $0x18] sm:$0xff]   ;;  %v256_v13 = vld [vmem:[%s340_s1 + $0x10] sm:$0xff]  }
   0x5   :  { %v15_v11 = vld [vmem:[%s341_s0] sm:$0xff]  ;;  %v257_v14 = vld [vmem:[%s340_s1 + $0x48] sm:$0xff]  }
   0x6   :  { %v206_v12 = vcombine.high %v15_v11, %v15_v11  ;;  %v258_v15 = vld [vmem:[%s340_s1 + $0x8] sm:$0xff]   ;;  %v259_v16 = vld [vmem:[%s340_s1 + $0x40] sm:$0xff]   ;;  %v205_v18 = vcombine.low %v15_v11, %v15_v11 }
   0x7   :  { %226 = vmatpush3.bf16.msra.mxu0 %v248_v3  ;;  %v260_v17 = vld [vmem:[%s340_s1] sm:$0xff]  }
   0x8   :  { %227 = vmatprep.subr.bf16.mxu0 %v249_v4  ;;  %190 = vmatprep.mubr.bf16.mxu0 %v206_v12  ;;  %v204_v20 = vld [vmem:[%s342_s2] ss:$0 sm:$0xff] }
   0xb   :  { %228 = vmatpush3.bf16.msra.mxu0 %v250_v5 }
   0xc   :  { %229 = vmatprep.subr.bf16.mxu0 %v251_v6 }
   0xf   :  { %230 = vmatpush3.bf16.msra.mxu0 %v252_v7 }
  0x10   :  { %231 = vmatprep.subr.bf16.mxu0 %v253_v8 }
  0x13   :  { %232 = vmatpush3.bf16.msra.mxu0 %v254_v9 }
  0x14   :  { %233 = vmatprep.subr.bf16.mxu0 %v255_v10 }
  0x17   :  { %234 = vmatpush3.bf16.msra.mxu0 %v256_v13 }
  0x18   :  { %235 = vmatprep.subr.bf16.mxu0 %v257_v14 }
  0x1b   :  { %236 = vmatpush3.bf16.msra.mxu0 %v258_v15 }
  0x1c   :  { %237 = vmatprep.subr.bf16.mxu0 %v259_v16 }
  0x1f   :  { %238 = vmatpush3.bf16.msra.mxu0 %v260_v17 }
  0x22   :  { %191 = vmatmul.mubr.bf16.vlgmr.msra.gmra.mxu0 %v205_v18 }
  0xe2   :  { %v239_v19 = vpop.f32.mrf.mxu0 }
  0xe4   :  { %v240_v21 = vpop.f32.mrf.mxu0 }
  0xe5   :  { %v241_v22 = vadd.f32 %v240_v21, %v239_v19 }
  0xe6   :  { %v242_v23 = vpop.f32.mrf.mxu0 }
  0xe7   :  { %v193_v24 = vadd.f32 %v241_v22, %v204_v20 }
  0xe8   :  { %v243_v25 = vpop.f32.mrf.mxu0 }
  0xe9   :  { %199 = vst.msk [vmem:[%s343_s3] sm:$0xff] %vm198_vm0, %v193_v24 }

// kernel: structure_module_forward.13
= control target key start
LH: loop header
LB: loop body
LE: loop exit
PB: predicated region body
PF: predicated region fallthrough
CT: control target
= control target key end

     0   :  { %vm48_vm0 = vcmask 130048   ;;  %v1742_v0 = vmov 0.0   ;;  %vm1743_vm1 = vmmov 0   ;;  %vm241_vm2 = vcmask 97280   ;;  %s2146_s1 = inlined_call_operand.vmem [shape: bf16[4,8,16], index: 1, kind: input, shape index: {}]   ;;  %s2147_s3 = inlined_call_operand.vmem [shape: f32[4,8,12], index: 3, kind: input, shape index: {}]   ;;  %s2148_s0 = inlined_call_operand.vmem [shape: bf16[4,8,16], index: 0, kind: input, shape index: {}]   ;;  %s2149_s4 = inlined_call_operand.vmem [shape: f32[4,8,12], index: 4, kind: input, shape index: {}]   ;;  %s2150_s7 = inlined_call_operand.vmem [shape: f32[4,8,8], index: 7, kind: input, shape index: {}]   ;;  %s2151_s5 = inlined_call_operand.vmem [shape: f32[4,1,8], index: 5, kind: input, shape index: {}]   ;;  %s2152_s2 = inlined_call_operand.vmem [shape: bf16[4,8,16], index: 2, kind: input, shape index: {}]   ;;  %s2153_s6 = inlined_call_operand.vmem [shape: bf16[4,8,24], index: 6, kind: input, shape index: {}]   ;;  %s2154_s8 = inlined_call_operand.vmem [shape: bf16[8,8,16], index: 8, kind: input, shape index: {}]   ;;  %s2155_s9 = inlined_call_operand.vmem [shape: f32[4,8,16], index: 9, kind: output, shape index: {0}]   ;;  %s2156_s10 = inlined_call_operand.vmem [shape: f32[4,8,24], index: 10, kind: output, shape index: {1}]   ;;  %s2157_s11 = inlined_call_operand.vmem [shape: f32[8,4,16], index: 11, kind: output, shape index: {2}]  }
   0x1   :  { %1582 = vmatprep.subr.bf16.mxu0 %v1742_v0  ;;  %1588 = vmatprep.subr.bf16.mxu1 %v1742_v0  ;;  %v40_v1 = vld [vmem:[%s2146_s1] sm:$0xf]  ;;  %v41_v2 = vld [vmem:[%s2146_s1 + $0x4] sm:$0xf]  ;;  %v42_v6 = vld [vmem:[%s2146_s1 + $0x8] sm:$0xf] }
   0x2   :  { %v53_v3 = vsel %vm48_vm0, %v40_v1, 0  ;;  %v99_v4 = vsel %vm48_vm0, %v41_v2, 0  ;;  %1584 = vmatprep.mubr.msk.bf16.mxu0 %vm1743_vm1, %v1742_v0  ;;  %1590 = vmatprep.mubr.msk.bf16.mxu1 %vm1743_vm1, %v1742_v0  ;;  %v233_v5 = vld [vmem:[%s2147_s3] sm:$0xff]  ;;  %v43_v7 = vld [vmem:[%s2146_s1 + $0xc] sm:$0xf]  ;;  %v235_v10 = vld [vmem:[%s2147_s3 + $0x10] sm:$0xff] }
   0x3   :  { %1583 = vmatpush3.bf16.xpose.msra.mxu0 %v53_v3  ;;  %1589 = vmatpush3.bf16.xpose.msra.mxu1 %v99_v4  ;;  %v554_v8 = vmul.f32 %v233_v5, %v233_v5  ;;  %v234_v9 = vld [vmem:[%s2147_s3 + $0x8] sm:$0xff]  ;;  %v36_v11 = vld [vmem:[%s2148_s0] sm:$0xf]  ;;  %v37_v12 = vld [vmem:[%s2148_s0 + $0x4] sm:$0xf]  ;;  %v556_v14 = vmul.f32 %v235_v10, %v235_v10  ;;  %v145_v16 = vsel %vm48_vm0, %v42_v6, 0 }
   0x4   :  { %1594 = vmatprep.subr.bf16.mxu0 %v1742_v0  ;;  %1600 = vmatprep.subr.bf16.mxu1 %v1742_v0  ;;  %v555_v15 = vmul.f32 %v234_v9, %v234_v9  ;;  %v191_v17 = vsel %vm48_vm0, %v43_v7, 0  ;;  %v236_v20 = vld [vmem:[%s2147_s3 + $0x18] sm:$0xff]  ;;  %v38_v21 = vld [vmem:[%s2148_s0 + $0x8] sm:$0xf]  ;;  %v39_v22 = vld [vmem:[%s2148_s0 + $0xc] sm:$0xf] }
   0x5   :  { %v558_v13 = vsel %vm241_vm2, %v554_v8, 0.0  ;;  %v564_v18 = vsel %vm241_vm2, %v556_v14, 0.0  ;;  %v557_v23 = vmul.f32 %v236_v20, %v236_v20  ;;  %v237_v24 = vld [vmem:[%s2149_s4] sm:$0xff]  ;;  %v238_v25 = vld [vmem:[%s2149_s4 + $0x8] sm:$0xff]  ;;  %v239_v27 = vld [vmem:[%s2149_s4 + $0x10] sm:$0xff]  ;;  %vm606_vm3 = vcmask 64512  }
   0x6   :  { %559 = vadd.xlane.f32.xlu0 %v558_v13  ;;  %v561_v19 = vsel %vm241_vm2, %v555_v15, 0.0  ;;  %565 = vadd.xlane.f32.xlu1 %v564_v18  ;;  %v240_v28 = vld [vmem:[%s2149_s4 + $0x18] sm:$0xff]  ;;  %v44_v44 = vld [vmem:[%s2150_s7] sm:$0xff]  ;;  %v45_v45 = vld [vmem:[%s2150_s7 + $0x8] sm:$0xff]  ;;  %vm662_vm4 = vcmask 1043456   ;;  %vm1024_vm5 = vcmask 195584  }
   0x7   :  { %v567_v26 = vsel %vm241_vm2, %v557_v23, 0.0  ;;  %v46_v53 = vld [vmem:[%s2150_s7 + $0x10] sm:$0xff]  ;;  %v47_v54 = vld [vmem:[%s2150_s7 + $0x18] sm:$0xff]  ;;  %v1515_v3 = vld [vmem:[%s2151_s5 + $0x1] ss:$0 sm:$0xff]  ;;  %vm1481_vm6 = vcmask 125952  }
   0x8   :  { %v1514_v4 = vld [vmem:[%s2151_s5] ss:$0 sm:$0xff] }
   0xa   :  { %1585 = vmatmul.mubr.msk.bf16.vlgmr.msra.gmra.mxu0 %vm48_vm0, %v36_v11  ;;  %1591 = vmatmul.mubr.msk.bf16.vlgmr.msra.gmra.mxu1 %vm48_vm0, %v37_v12 }
   0xb   :  { %1595 = vmatpush3.bf16.xpose.msra.mxu0 %v145_v16  ;;  %1601 = vmatpush3.bf16.xpose.msra.mxu1 %v191_v17  ;;  %v1517_v16 = vld [vmem:[%s2151_s5 + $0x3] ss:$0 sm:$0xff]  ;;  %v1516_v17 = vld [vmem:[%s2151_s5 + $0x2] ss:$0 sm:$0xff] }
   0xc   :  { %1596 = vmatprep.mubr.msk.bf16.mxu0 %vm1743_vm1, %v1742_v0  ;;  %1602 = vmatprep.mubr.msk.bf16.mxu1 %vm1743_vm1, %v1742_v0 }
   0xd   :  { %1606 = vmatprep.subr.mxu0 %v1742_v0  ;;  %1611 = vmatprep.subr.mxu1 %v1742_v0 }
   0xe   :  { %562 = vadd.xlane.f32.xlu0 %v561_v19  ;;  %568 = vadd.xlane.f32.xlu1 %v567_v26 }
  0x12   :  { %1597 = vmatmul.mubr.msk.bf16.vlgmr.msra.gmra.mxu0 %vm48_vm0, %v38_v21  ;;  %1603 = vmatmul.mubr.msk.bf16.vlgmr.msra.gmra.mxu1 %vm48_vm0, %v39_v22 }
  0x13   :  { %1607 = vmatpush3.xpose.msk.msra.mxu0 %vm241_vm2, %v237_v24  ;;  %1612 = vmatpush3.xpose.msk.msra.mxu1 %vm241_vm2, %v238_v25 }
  0x14   :  { %1608 = vmatprep.mubr.msk.f32.mxu0 %vm1743_vm1, %v1742_v0  ;;  %1613 = vmatprep.mubr.msk.f32.mxu1 %vm1743_vm1, %v1742_v0 }
  0x15   :  { %1616 = vmatprep.subr.mxu0 %v1742_v0  ;;  %1621 = vmatprep.subr.mxu1 %v1742_v0 }
  0x1a   :  { %1609 = vmatmul.mubr.msk.f32.vlgmr.msra.gmra.mxu0 %vm241_vm2, %v233_v5  ;;  %1614 = vmatmul.mubr.msk.f32.vlgmr.msra.gmra.mxu1 %vm241_vm2, %v234_v9 }
  0x1b   :  { %1617 = vmatpush3.xpose.msk.msra.mxu0 %vm241_vm2, %v239_v27  ;;  %1622 = vmatpush3.xpose.msk.msra.mxu1 %vm241_vm2, %v240_v28 }
  0x1c   :  { %1618 = vmatprep.mubr.msk.f32.mxu0 %vm1743_vm1, %v1742_v0  ;;  %1623 = vmatprep.mubr.msk.f32.mxu1 %vm1743_vm1, %v1742_v0 }
  0x1d   :  { %1626 = vmatprep.subr.bf16.mxu0 %v1742_v0  ;;  %1632 = vmatprep.subr.bf16.mxu1 %v1742_v0 }
  0x1e   :  { %1619 = vmatmul.mubr.msk.f32.vlgmr.msra.gmra.mxu0 %vm241_vm2, %v235_v10  ;;  %1624 = vmatmul.mubr.msk.f32.vlgmr.msra.gmra.mxu1 %vm241_vm2, %v236_v20 }
  0x1f   :  { %1628 = vmatprep.mubr.msk.bf16.mxu0 %vm1743_vm1, %v1742_v0  ;;  %1634 = vmatprep.mubr.msk.bf16.mxu1 %vm1743_vm1, %v1742_v0 }
  0x8f   :  { %v560_v41 = vpop.xlane.xlu0 %559  ;;  %v566_v48 = vpop.xlane.xlu1 %565 }
  0x97   :  { %v563_v57 = vpop.xlane.xlu0 %562  ;;  %v569_v8 = vpop.xlane.xlu1 %568 }
  0xca   :  { %v89_v29 = vpop.f32.mrf.mxu0  ;;  %v135_v30 = vpop.f32.mrf.mxu1 }
  0xcb   :  { %v90_v51 = vadd.f32 %v89_v29, %v44_v44  ;;  %v136_v52 = vadd.f32 %v135_v30, %v45_v45 }
  0xcc   :  { %v1586_v31 = vpop.f32.mrf.mxu0  ;;  %v1592_v32 = vpop.f32.mrf.mxu1 }
  0xce   :  { %v92_v33 = vpop.f32.mrf.mxu0  ;;  %v138_v34 = vpop.f32.mrf.mxu1 }
  0xd0   :  { %v1587_v35 = vpop.f32.mrf.mxu0  ;;  %v1593_v36 = vpop.f32.mrf.mxu1 }
  0xd2   :  { %v181_v37 = vpop.f32.mrf.mxu0  ;;  %v227_v38 = vpop.f32.mrf.mxu1 }
  0xd3   :  { %v182_v62 = vadd.f32 %v181_v37, %v46_v53  ;;  %v228_v63 = vadd.f32 %v227_v38, %v47_v54 }
  0xd4   :  { %v1598_v39 = vpop.f32.mrf.mxu0  ;;  %v1604_v40 = vpop.f32.mrf.mxu1 }
  0xd6   :  { %v184_v42 = vpop.f32.mrf.mxu0  ;;  %v230_v43 = vpop.f32.mrf.mxu1 }
  0xd8   :  { %v1599_v46 = vpop.f32.mrf.mxu0  ;;  %v1605_v47 = vpop.f32.mrf.mxu1 }
  0xd9   :  { %v655_v46 = vld [vmem:[%s2152_s2] sm:$0xf]  ;;  %v656_v47 = vld [vmem:[%s2152_s2 + $0x4] sm:$0xf] }
  0xda   :  { %v314_v49 = vpop.f32.mrf.mxu0  ;;  %v390_v50 = vpop.f32.mrf.mxu1 }
  0xdb   :  { %v546_v55 = vmul.f32 2.0, %v314_v49  ;;  %v547_v56 = vmul.f32 2.0, %v390_v50  ;;  %v710_v49 = vsel %vm662_vm4, %v656_v47, 0  ;;  %v657_v50 = vld [vmem:[%s2152_s2 + $0x8] sm:$0xf] }
  0xdc   :  { %v1610_v58 = vpop.f32.mrf.mxu0  ;;  %v1615_v59 = vpop.f32.mrf.mxu1  ;;  %1633 = vmatpush3.bf16.msra.mxu1 %v710_v49 }
  0xdd   :  { %v550_v60 = vadd.f32 %v546_v55, %v90_v51  ;;  %v551_v61 = vadd.f32 %v547_v56, %v136_v52  ;;  %1644 = vmatprep.subr.bf16.mxu1 %v1742_v0  ;;  %v658_v51 = vld [vmem:[%s2152_s2 + $0xc] sm:$0xf]  ;;  %v756_v52 = vsel %vm662_vm4, %v657_v50, 0  ;;  %v1110_v50 = vld [vmem:[%s2154_s8 + $0x14] sm:$0xf] }
  0xde   :  { %v466_v1 = vpop.f32.mrf.mxu0  ;;  %v542_v2 = vpop.f32.mrf.mxu1  ;;  %v802_v53 = vsel %vm662_vm4, %v658_v51, 0  ;;  %v1109_v51 = vld [vmem:[%s2154_s8 + $0x10] sm:$0xf] }
  0xdf   :  { %v571_v5 = vsub.f32 %v551_v61, %v563_v57  ;;  %v548_v6 = vmul.f32 2.0, %v466_v1  ;;  %v549_v7 = vmul.f32 2.0, %v542_v2  ;;  %v570_v9 = vsub.f32 %v550_v60, %v560_v41 }
  0xe0   :  { %v1620_v10 = vpop.f32.mrf.mxu0  ;;  %v1625_v11 = vpop.f32.mrf.mxu1 }
  0xe1   :  { %v552_v12 = vadd.f32 %v548_v6, %v182_v62  ;;  %v553_v13 = vadd.f32 %v549_v7, %v228_v63  ;;  %v603_v14 = vsub.f32 %v571_v5, %v1515_v3  ;;  %v602_v15 = vsub.f32 %v570_v9, %v1514_v4  ;;  %v848_v9 = vld [vmem:[%s2153_s6] sm:$0xf] }
  0xe2   :  { %v1744_v4 = vmov 1983009808   ;;  %v1034_v6 = vlaneseq }
  0xe3   :  { %v573_v18 = vsub.f32 %v553_v13, %v569_v8  ;;  %v610_v19 = vsel %vm606_vm3, %v603_v14, -inf  ;;  %v607_v20 = vsel %vm606_vm3, %v602_v15, -inf  ;;  %v572_v21 = vsub.f32 %v552_v12, %v566_v48  ;;  %v849_v8 = vld [vmem:[%s2153_s6 + $0x4] sm:$0xf] }
  0xe4   :  { %611 = vmax.xlane.f32.xlu1 %v610_v19  ;;  %608 = vmax.xlane.f32.xlu0 %v607_v20  ;;  %v664_v48 = vsel %vm662_vm4, %v655_v46, 0  ;;  %v1032_v5 = vunpack.c.l.s4 %v1744_v4  ;;  %v896_v11 = vsel %vm662_vm4, %v849_v8, 0  ;;  %v1035_v13 = vshrl.u32 %v1034_v6, 7 }
  0xe5   :  { %v605_v22 = vsub.f32 %v573_v18, %v1517_v16  ;;  %v604_v23 = vsub.f32 %v572_v21, %v1516_v17  ;;  %1627 = vmatpush3.bf16.msra.mxu0 %v664_v48  ;;  %v1745_v19 = vmov 1934713408   ;;  %v851_v21 = vld [vmem:[%s2153_s6 + $0xc] sm:$0xf] }
  0xe6   :  { %1638 = vmatprep.subr.bf16.mxu0 %v1742_v0  ;;  %v1033_v12 = vunpack.c.0.s8 %v1032_v5  ;;  %v1064_v20 = vunpack.c.l.s4 %v1745_v19 }
  0xe7   :  { %v616_v24 = vsel %vm606_vm3, %v605_v22, -inf  ;;  %v613_v25 = vsel %vm606_vm3, %v604_v23, -inf }
  0xe8   :  { %617 = vmax.xlane.f32.xlu1 %v616_v24  ;;  %614 = vmax.xlane.f32.xlu0 %v613_v25  ;;  %v1036_v18 = vsub.s32 %v1033_v12, %v1035_v13 }
 0x16d   :  { %v612_v26 = vpop.xlane.xlu1 %611  ;;  %v609_v27 = vpop.xlane.xlu0 %608 }
 0x16e   :  { %v620_v28 = vsub.f32 %v603_v14, %v612_v26  ;;  %v619_v29 = vsub.f32 %v602_v15, %v609_v27  ;;  %v853_v15 = vsel %vm662_vm4, %v848_v9, 0  ;;  %v1065_v26 = vunpack.c.0.s8 %v1064_v20 }
 0x170   :  { %v625_v30 = vmul.f32 1.442695, %v620_v28  ;;  %v623_v31 = vmul.f32 1.442695, %v619_v29  ;;  %v1068_v29 = vsub.s32 %v1065_v26, %v1035_v13 }
 0x171   :  { %v618_v32 = vpop.xlane.xlu1 %617  ;;  %v615_v33 = vpop.xlane.xlu0 %614 }
 0x172   :  { %1726 = vpow2.f32 %v625_v30  ;;  %v622_v34 = vsub.f32 %v605_v22, %v618_v32  ;;  %v621_v35 = vsub.f32 %v604_v23, %v615_v33  ;;  %v850_v22 = vld [vmem:[%s2153_s6 + $0x8] sm:$0xf]  ;;  %v982_v23 = vsel %vm662_vm4, %v851_v21, 0  ;;  %v1106_v30 = vld [vmem:[%s2154_s8 + $0x4] sm:$0xf] }
 0x173   :  { %1728 = vpow2.f32 %v623_v31  ;;  %v939_v27 = vsel %vm662_vm4, %v850_v22, 0  ;;  %v1105_v31 = vld [vmem:[%s2154_s8] sm:$0xf]  ;;  %v1163_v32 = vsel %vm662_vm4, %v1106_v30, 0 }
 0x174   :  { %v629_v36 = vmul.f32 1.442695, %v622_v34  ;;  %v627_v37 = vmul.f32 1.442695, %v621_v35  ;;  %v1117_v34 = vsel %vm662_vm4, %v1105_v31, 0 }
 0x176   :  { %1730 = vpow2.f32 %v629_v36 }
 0x177   :  { %1732 = vpow2.f32 %v627_v37 }
 0x17f   :  { %v1727_v38 = vpop.eup %1726 }
 0x180   :  { %v1729_v39 = vpop.eup %1728  ;;  %v634_v40 = vsel %vm606_vm3, %v1727_v38, 0.0 }
 0x181   :  { %635 = vadd.xlane.f32.xlu1 %v634_v40  ;;  %v631_v41 = vsel %vm606_vm3, %v1729_v39, 0.0  ;;  %v1107_v40 = vld [vmem:[%s2154_s8 + $0x8] sm:$0xf] }
 0x182   :  { %632 = vadd.xlane.f32.xlu0 %v631_v41  ;;  %v1209_v47 = vsel %vm662_vm4, %v1107_v40, 0 }
 0x183   :  { %v1731_v42 = vpop.eup %1730 }
 0x184   :  { %v1733_v43 = vpop.eup %1732  ;;  %v640_v44 = vsel %vm606_vm3, %v1731_v42, 0.0 }
 0x185   :  { %641 = vadd.xlane.f32.xlu1 %v640_v44  ;;  %v637_v45 = vsel %vm606_vm3, %v1733_v43, 0.0 }
 0x186   :  { %638 = vadd.xlane.f32.xlu0 %v637_v45 }
 0x20a   :  { %v636_v54 = vpop.xlane.xlu1 %635 }
 0x20b   :  { %1734 = vrcp.f32 %v636_v54  ;;  %v633_v55 = vpop.xlane.xlu0 %632 }
 0x20c   :  { %1736 = vrcp.f32 %v633_v55 }
 0x20e   :  { %v642_v56 = vpop.xlane.xlu1 %641 }
 0x20f   :  { %1738 = vrcp.f32 %v642_v56  ;;  %v639_v57 = vpop.xlane.xlu0 %638  ;;  %v1301_v56 = vsel %vm662_vm4, %v1109_v51, 0 }
 0x210   :  { %1740 = vrcp.f32 %v639_v57 }
 0x218   :  { %v1735_v58 = vpop.eup %1734 }
 0x219   :  { %v1737_v59 = vpop.eup %1736  ;;  %v1954_v60 = vmul.f32 %v1735_v58, %v1727_v38  ;;  %v1108_v38 = vld [vmem:[%s2154_s8 + $0xc] sm:$0xf] }
 0x21a   :  { %v1956_v61 = vmul.f32 %v1737_v59, %v1729_v39  ;;  %v1255_v41 = vsel %vm662_vm4, %v1108_v38, 0  ;;  %v1112_v59 = vld [vmem:[%s2154_s8 + $0x1c] sm:$0xf] }
 0x21b   :  { %v652_v62 = vpack.c.bf16 %v1954_v60, %v1954_v60 }
 0x21c   :  { %v1739_v63 = vpop.eup %1738  ;;  %v651_v1 = vpack.c.bf16 %v1956_v61, %v1956_v61 }
 0x21d   :  { %v1741_v2 = vpop.eup %1740  ;;  %1635 = vmatmul.mubr.msk.bf16.vlgmr.msra.gmra.mxu1 %vm606_vm3, %v652_v62  ;;  %v1964_v3 = vmul.f32 %v1739_v63, %v1731_v42 }
 0x21e   :  { %1629 = vmatmul.mubr.msk.bf16.vlgmr.msra.gmra.mxu0 %vm606_vm3, %v651_v1  ;;  %1645 = vmatpush3.bf16.msra.mxu1 %v802_v53  ;;  %v1968_v7 = vmul.f32 %v1741_v2, %v1733_v43  ;;  %v1347_v53 = vsel %vm662_vm4, %v1110_v50, 0 }
 0x21f   :  { %1639 = vmatpush3.bf16.msra.mxu0 %v756_v52  ;;  %1640 = vmatprep.mubr.msk.bf16.mxu0 %vm1743_vm1, %v1742_v0  ;;  %v654_v10 = vpack.c.bf16 %v1964_v3, %v1964_v3  ;;  %v1045_v16 = vcombine.low %v1954_v60, %v1964_v3  ;;  %v1046_v35 = vcombine.high %v1954_v60, %v1964_v3  ;;  %v1111_v60 = vld [vmem:[%s2154_s8 + $0x18] sm:$0xf] }
 0x220   :  { %1646 = vmatprep.mubr.msk.bf16.mxu1 %vm1743_vm1, %v1742_v0  ;;  %1650 = vmatprep.subr.bf16.mxu0 %v1742_v0  ;;  %v653_v14 = vpack.c.bf16 %v1968_v7, %v1968_v7  ;;  %v1029_v17 = vcombine.low %v1956_v61, %v1968_v7  ;;  %v1030_v36 = vcombine.high %v1956_v61, %v1968_v7  ;;  %v1393_v2 = vsel %vm662_vm4, %v1111_v60, 0 }
 0x221   :  { %1656 = vmatprep.subr.bf16.mxu1 %v1742_v0  ;;  %v1053_v25 = vrot.slane %v1045_v16, %v1036_v18  ;;  %v1060_v45 = vrot.slane %v1046_v35, %v1036_v18 }
 0x222   :  { %v1037_v24 = vrot.slane %v1029_v17, %v1036_v18  ;;  %v1044_v44 = vrot.slane %v1030_v36, %v1036_v18 }
 0x224   :  { %v1061_v28 = vcombine.low %v1037_v24, %v1053_v25  ;;  %v1062_v39 = vcombine.high %v1037_v24, %v1053_v25  ;;  %v1077_v49 = vcombine.low %v1044_v44, %v1060_v45  ;;  %v1078_v58 = vcombine.high %v1044_v44, %v1060_v45 }
 0x225   :  { %1647 = vmatmul.mubr.msk.bf16.vlgmr.msra.gmra.mxu1 %vm606_vm3, %v654_v10 }
 0x226   :  { %1641 = vmatmul.mubr.msk.bf16.vlgmr.msra.gmra.mxu0 %vm606_vm3, %v653_v14  ;;  %1657 = vmatpush3.bf16.msra.mxu1 %v896_v11  ;;  %v1069_v33 = vrot.slane %v1061_v28, %v1068_v29  ;;  %v1076_v43 = vrot.slane %v1062_v39, %v1068_v29  ;;  %v1085_v54 = vrot.slane %v1077_v49, %v1068_v29 }
 0x227   :  { %1651 = vmatpush3.bf16.msra.mxu0 %v853_v15  ;;  %1652 = vmatprep.mubr.msk.bf16.mxu0 %vm1743_vm1, %v1742_v0  ;;  %v1092_v63 = vrot.slane %v1078_v58, %v1068_v29 }
 0x228   :  { %1658 = vmatprep.mubr.msk.bf16.mxu1 %vm1743_vm1, %v1742_v0  ;;  %1662 = vmatprep.subr.bf16.mxu0 %v1742_v0  ;;  %v1093_v37 = vcombine.high %v1069_v33, %v1742_v0  ;;  %v1097_v46 = vpack.c.bf16 %v1069_v33, %v1069_v33  ;;  %v1094_v48 = vcombine.high %v1076_v43, %v1742_v0 }
 0x229   :  { %1668 = vmatprep.subr.bf16.mxu1 %v1742_v0  ;;  %v1099_v55 = vpack.c.bf16 %v1076_v43, %v1076_v43  ;;  %v1095_v57 = vcombine.high %v1085_v54, %v1742_v0  ;;  %v1096_v3 = vcombine.high %v1092_v63, %v1742_v0  ;;  %v1103_v5 = vpack.c.bf16 %v1092_v63, %v1092_v63 }
 0x22a   :  { %v1098_v42 = vpack.c.bf16 %v1093_v37, %v1093_v37  ;;  %v1100_v52 = vpack.c.bf16 %v1094_v48, %v1094_v48 }
 0x22b   :  { %v1102_v61 = vpack.c.bf16 %v1095_v57, %v1095_v57  ;;  %v1104_v4 = vpack.c.bf16 %v1096_v3, %v1096_v3 }
 0x22d   :  { %1659 = vmatmul.mubr.msk.bf16.vlgmr.msra.gmra.mxu1 %vm606_vm3, %v652_v62  ;;  %v1439_v62 = vsel %vm662_vm4, %v1112_v59, 0 }
 0x22e   :  { %1653 = vmatmul.mubr.msk.bf16.vlgmr.msra.gmra.mxu0 %vm606_vm3, %v651_v1  ;;  %1669 = vmatpush3.bf16.msra.mxu1 %v982_v23  ;;  %v1101_v1 = vpack.c.bf16 %v1085_v54, %v1085_v54 }
 0x22f   :  { %1663 = vmatpush3.bf16.msra.mxu0 %v939_v27  ;;  %1664 = vmatprep.mubr.msk.bf16.mxu0 %vm1743_vm1, %v1742_v0 }
 0x230   :  { %1670 = vmatprep.mubr.msk.bf16.mxu1 %vm1743_vm1, %v1742_v0  ;;  %1674 = vmatprep.subr.bf16.mxu0 %v1742_v0 }
 0x231   :  { %1680 = vmatprep.subr.bf16.mxu1 %v1742_v0 }
 0x235   :  { %1671 = vmatmul.mubr.msk.bf16.vlgmr.msra.gmra.mxu1 %vm606_vm3, %v654_v10 }
 0x236   :  { %1665 = vmatmul.mubr.msk.bf16.vlgmr.msra.gmra.mxu0 %vm606_vm3, %v653_v14  ;;  %1681 = vmatpush3.bf16.msra.mxu1 %v1163_v32 }
 0x237   :  { %1675 = vmatpush3.bf16.msra.mxu0 %v1117_v34  ;;  %1676 = vmatprep.mubr.msk.bf16.mxu0 %vm1743_vm1, %v1742_v0 }
 0x238   :  { %1682 = vmatprep.mubr.msk.bf16.mxu1 %vm1743_vm1, %v1742_v0  ;;  %1686 = vmatprep.subr.bf16.mxu0 %v1742_v0 }
 0x239   :  { %1692 = vmatprep.subr.bf16.mxu1 %v1742_v0 }
 0x23d   :  { %1683 = vmatmul.mubr.msk.bf16.vlgmr.msra.gmra.mxu1 %vm606_vm3, %v1098_v42 }
 0x23e   :  { %1677 = vmatmul.mubr.msk.bf16.vlgmr.msra.gmra.mxu0 %vm606_vm3, %v1097_v46  ;;  %1693 = vmatpush3.bf16.msra.mxu1 %v1255_v41 }
 0x23f   :  { %1687 = vmatpush3.bf16.msra.mxu0 %v1209_v47  ;;  %1688 = vmatprep.mubr.msk.bf16.mxu0 %vm1743_vm1, %v1742_v0 }
 0x240   :  { %1694 = vmatprep.mubr.msk.bf16.mxu1 %vm1743_vm1, %v1742_v0  ;;  %1698 = vmatprep.subr.bf16.mxu0 %v1742_v0 }
 0x241   :  { %1704 = vmatprep.subr.bf16.mxu1 %v1742_v0 }
 0x245   :  { %1695 = vmatmul.mubr.msk.bf16.vlgmr.msra.gmra.mxu1 %vm606_vm3, %v1100_v52 }
 0x246   :  { %1689 = vmatmul.mubr.msk.bf16.vlgmr.msra.gmra.mxu0 %vm606_vm3, %v1099_v55  ;;  %1705 = vmatpush3.bf16.msra.mxu1 %v1347_v53 }
 0x247   :  { %1699 = vmatpush3.bf16.msra.mxu0 %v1301_v56  ;;  %1700 = vmatprep.mubr.msk.bf16.mxu0 %vm1743_vm1, %v1742_v0 }
 0x248   :  { %1706 = vmatprep.mubr.msk.bf16.mxu1 %vm1743_vm1, %v1742_v0  ;;  %1710 = vmatprep.subr.bf16.mxu0 %v1742_v0 }
 0x249   :  { %1716 = vmatprep.subr.bf16.mxu1 %v1742_v0 }
 0x24d   :  { %1707 = vmatmul.mubr.msk.bf16.vlgmr.msra.gmra.mxu1 %vm606_vm3, %v1102_v61 }
 0x24e   :  { %1701 = vmatmul.mubr.msk.bf16.vlgmr.msra.gmra.mxu0 %vm606_vm3, %v1101_v1  ;;  %1717 = vmatpush3.bf16.msra.mxu1 %v1439_v62 }
 0x24f   :  { %1711 = vmatpush3.bf16.msra.mxu0 %v1393_v2  ;;  %1712 = vmatprep.mubr.msk.bf16.mxu0 %vm1743_vm1, %v1742_v0 }
 0x250   :  { %1718 = vmatprep.mubr.msk.bf16.mxu1 %vm1743_vm1, %v1742_v0 }
 0x255   :  { %1719 = vmatmul.mubr.msk.bf16.vlgmr.msra.gmra.mxu1 %vm606_vm3, %v1104_v4 }
 0x256   :  { %1713 = vmatmul.mubr.msk.bf16.vlgmr.msra.gmra.mxu0 %vm606_vm3, %v1103_v5 }
 0x2dd   :  { %v746_v6 = vpop.f32.mrf.mxu1 }
 0x2de   :  { %v700_v7 = vpop.f32.mrf.mxu0  ;;  %845 = vst.msk [vmem:[%s2155_s9 + $0x8] sm:$0xff] %vm48_vm0, %v746_v6 }
 0x2df   :  { %844 = vst.msk [vmem:[%s2155_s9] sm:$0xff] %vm48_vm0, %v700_v7  ;;  %v1636_v8 = vpop.f32.mrf.mxu1 }
 0x2e0   :  { %v1630_v0 = vpop.f32.mrf.mxu0 }
 0x2e1   :  { %v749_v9 = vpop.f32.mrf.mxu1 }
 0x2e2   :  { %v703_v10 = vpop.f32.mrf.mxu0 }
 0x2e3   :  { %v1637_v11 = vpop.f32.mrf.mxu1 }
 0x2e4   :  { %v1631_v12 = vpop.f32.mrf.mxu0 }
 0x2e5   :  { %v838_v13 = vpop.f32.mrf.mxu1 }
 0x2e6   :  { %v792_v14 = vpop.f32.mrf.mxu0  ;;  %847 = vst.msk [vmem:[%s2155_s9 + $0x18] sm:$0xff] %vm48_vm0, %v838_v13 }
 0x2e7   :  { %846 = vst.msk [vmem:[%s2155_s9 + $0x10] sm:$0xff] %vm48_vm0, %v792_v14  ;;  %v1648_v15 = vpop.f32.mrf.mxu1 }
 0x2e8   :  { %v1642_v16 = vpop.f32.mrf.mxu0 }
 0x2e9   :  { %v841_v17 = vpop.f32.mrf.mxu1 }
 0x2ea   :  { %v795_v18 = vpop.f32.mrf.mxu0 }
 0x2eb   :  { %v1649_v19 = vpop.f32.mrf.mxu1 }
 0x2ec   :  { %v1643_v20 = vpop.f32.mrf.mxu0 }
 0x2ed   :  { %v932_v21 = vpop.f32.mrf.mxu1 }
 0x2ee   :  { %v889_v22 = vpop.f32.mrf.mxu0  ;;  %1026 = vst.msk [vmem:[%s2156_s10 + $0x8] sm:$0xff] %vm1024_vm5, %v932_v21 }
 0x2ef   :  { %1025 = vst.msk [vmem:[%s2156_s10] sm:$0xff] %vm1024_vm5, %v889_v22  ;;  %v1660_v23 = vpop.f32.mrf.mxu1 }
 0x2f0   :  { %v1654_v24 = vpop.f32.mrf.mxu0 }
 0x2f1   :  { %v935_v25 = vpop.f32.mrf.mxu1 }
 0x2f2   :  { %v892_v26 = vpop.f32.mrf.mxu0 }
 0x2f3   :  { %v1661_v27 = vpop.f32.mrf.mxu1 }
 0x2f4   :  { %v1655_v28 = vpop.f32.mrf.mxu0 }
 0x2f5   :  { %v1018_v29 = vpop.f32.mrf.mxu1 }
 0x2f6   :  { %v975_v30 = vpop.f32.mrf.mxu0  ;;  %1028 = vst.msk [vmem:[%s2156_s10 + $0x18] sm:$0xff] %vm1024_vm5, %v1018_v29 }
 0x2f7   :  { %1027 = vst.msk [vmem:[%s2156_s10 + $0x10] sm:$0xff] %vm1024_vm5, %v975_v30  ;;  %v1672_v31 = vpop.f32.mrf.mxu1 }
 0x2f8   :  { %v1666_v32 = vpop.f32.mrf.mxu0 }
 0x2f9   :  { %v1021_v33 = vpop.f32.mrf.mxu1 }
 0x2fa   :  { %v978_v34 = vpop.f32.mrf.mxu0 }
 0x2fb   :  { %v1673_v35 = vpop.f32.mrf.mxu1 }
 0x2fc   :  { %v1667_v36 = vpop.f32.mrf.mxu0 }
 0x2fd   :  { %v1199_v37 = vpop.f32.mrf.mxu1 }
 0x2fe   :  { %v1153_v38 = vpop.f32.mrf.mxu0  ;;  %1483 = vst.msk [vmem:[%s2157_s11 + $0x4] sm:$0xf] %vm1481_vm6, %v1199_v37 }
 0x2ff   :  { %1482 = vst.msk [vmem:[%s2157_s11] sm:$0xf] %vm1481_vm6, %v1153_v38  ;;  %v1684_v39 = vpop.f32.mrf.mxu1 }
 0x300   :  { %v1678_v40 = vpop.f32.mrf.mxu0 }
 0x301   :  { %v1202_v41 = vpop.f32.mrf.mxu1 }
 0x302   :  { %v1156_v42 = vpop.f32.mrf.mxu0 }
 0x303   :  { %v1685_v43 = vpop.f32.mrf.mxu1 }
 0x304   :  { %v1679_v44 = vpop.f32.mrf.mxu0 }
 0x305   :  { %v1291_v45 = vpop.f32.mrf.mxu1 }
 0x306   :  { %v1245_v46 = vpop.f32.mrf.mxu0  ;;  %1485 = vst.msk [vmem:[%s2157_s11 + $0xc] sm:$0xf] %vm1481_vm6, %v1291_v45 }
 0x307   :  { %1484 = vst.msk [vmem:[%s2157_s11 + $0x8] sm:$0xf] %vm1481_vm6, %v1245_v46  ;;  %v1696_v47 = vpop.f32.mrf.mxu1 }
 0x308   :  { %v1690_v48 = vpop.f32.mrf.mxu0 }
 0x309   :  { %v1294_v49 = vpop.f32.mrf.mxu1 }
 0x30a   :  { %v1248_v50 = vpop.f32.mrf.mxu0 }
 0x30b   :  { %v1697_v51 = vpop.f32.mrf.mxu1 }
 0x30c   :  { %v1691_v52 = vpop.f32.mrf.mxu0 }
 0x30d   :  { %v1383_v53 = vpop.f32.mrf.mxu1 }
 0x30e   :  { %v1337_v54 = vpop.f32.mrf.mxu0  ;;  %1487 = vst.msk [vmem:[%s2157_s11 + $0x14] sm:$0xf] %vm1481_vm6, %v1383_v53 }
 0x30f   :  { %1486 = vst.msk [vmem:[%s2157_s11 + $0x10] sm:$0xf] %vm1481_vm6, %v1337_v54  ;;  %v1708_v55 = vpop.f32.mrf.mxu1 }
 0x310   :  { %v1702_v56 = vpop.f32.mrf.mxu0 }
 0x311   :  { %v1386_v57 = vpop.f32.mrf.mxu1 }
 0x312   :  { %v1340_v58 = vpop.f32.mrf.mxu0 }
 0x313   :  { %v1709_v59 = vpop.f32.mrf.mxu1 }
 0x314   :  { %v1703_v60 = vpop.f32.mrf.mxu0 }
 0x315   :  { %v1475_v61 = vpop.f32.mrf.mxu1 }
 0x316   :  { %v1429_v62 = vpop.f32.mrf.mxu0  ;;  %1489 = vst.msk [vmem:[%s2157_s11 + $0x1c] sm:$0xf] %vm1481_vm6, %v1475_v61 }
 0x317   :  { %1488 = vst.msk [vmem:[%s2157_s11 + $0x18] sm:$0xf] %vm1481_vm6, %v1429_v62  ;;  %v1720_v63 = vpop.f32.mrf.mxu1 }
 0x318   :  { %v1714_v1 = vpop.f32.mrf.mxu0 }
 0x319   :  { %v1478_v2 = vpop.f32.mrf.mxu1 }
 0x31a   :  { %v1432_v3 = vpop.f32.mrf.mxu0 }
 0x31b   :  { %v1721_v4 = vpop.f32.mrf.mxu1 }
 0x31c   :  { %v1715_v5 = vpop.f32.mrf.mxu0 }

// kernel: structure_module_forward.15
= control target key start
LH: loop header
LB: loop body
LE: loop exit
PB: predicated region body
PF: predicated region fallthrough
CT: control target
= control target key end

     0   :  { %vm55_vm0 = vcmask 261120   ;;  %v473_v9 = vmov 0.0   ;;  %vm474_vm1 = vmmov 0   ;;  %vm385_vm2 = vcmask 48128   ;;  %s640_s0 = inlined_call_operand.vmem [shape: f32[8,32], index: 0, kind: input, shape index: {}]   ;;  %s641_s1 = inlined_call_operand.vmem [shape: f32[8,32], index: 1, kind: input, shape index: {}]   ;;  %s642_s4 = inlined_call_operand.vmem [shape: bf16[1,32,32], index: 4, kind: input, shape index: {}]   ;;  %s643_s2 = inlined_call_operand.vmem [shape: f32[1,32], index: 2, kind: input, shape index: {}, may-alias: {2,10}]   ;;  %s644_s3 = inlined_call_operand.vmem [shape: f32[1,32], index: 3, kind: input, shape index: {}, may-alias: {3,11}]   ;;  %s645_s6 = inlined_call_operand.vmem [shape: bf16[1,32,32], index: 6, kind: input, shape index: {}]   ;;  %s646_s8 = inlined_call_operand.vmem [shape: bf16[1,32,32], index: 8, kind: input, shape index: {}]   ;;  %s647_s5 = inlined_call_operand.vmem [shape: f32[1,1,32], index: 5, kind: input, shape index: {}]   ;;  %s648_s7 = inlined_call_operand.vmem [shape: f32[1,1,32], index: 7, kind: input, shape index: {}]   ;;  %s649_s9 = inlined_call_operand.vmem [shape: f32[1,1,32], index: 9, kind: input, shape index: {}]   ;;  %s650_s12 = inlined_call_operand.vmem [shape: bf16[32,6], index: 12, kind: input, shape index: {}]   ;;  %s651_s10 = inlined_call_operand.vmem [shape: f32[1,32], index: 10, kind: input, shape index: {}, may-alias: {2,10}]   ;;  %s652_s11 = inlined_call_operand.vmem [shape: f32[1,32], index: 11, kind: input, shape index: {}, may-alias: {3,11}]   ;;  %s653_s14 = inlined_call_operand.vmem [shape: f32[8,32], index: 14, kind: output, shape index: {0}]   ;;  %s654_s13 = inlined_call_operand.vmem [shape: f32[1,6], index: 13, kind: input, shape index: {}]   ;;  %s655_s15 = inlined_call_operand.vmem [shape: f32[8,6], index: 15, kind: output, shape index: {1}]  }
   0x1   :  { %v50_v0 = vld [vmem:[%s640_s0] sm:$0xff]  ;;  %427 = vmatprep.subr.bf16.mxu0 %v473_v9  ;;  %v461_v10 = vld [vmem:[%s642_s4 + $0x8] sm:$0xff]   ;;  %431 = vmatprep.mubr.msk.bf16.mxu0 %vm474_vm1, %v473_v9 }
   0x2   :  { %v51_v1 = vld [vmem:[%s641_s1] sm:$0xff]  ;;  %435 = vmatprep.subr.bf16.mxu1 %v473_v9  ;;  %439 = vmatprep.mubr.msk.bf16.mxu1 %vm474_vm1, %v473_v9  ;;  %v463_v22 = vld [vmem:[%s645_s6 + $0x8] sm:$0xff]  }
   0x3   :  { %v52_v2 = vadd.f32 %v51_v1, %v50_v0  ;;  %428 = vmatpush3.bf16.msra.mxu0 %v461_v10  ;;  %v462_v11 = vld [vmem:[%s642_s4] sm:$0xff]   ;;  %436 = vmatpush3.bf16.msra.mxu1 %v463_v22  ;;  %v465_v24 = vld [vmem:[%s646_s8 + $0x8] sm:$0xff]  }
   0x4   :  { %429 = vmatprep.subr.bf16.mxu0 %v473_v9  ;;  %v395_v16 = vld [vmem:[%s643_s2] ss:$0 sm:$0xff]  ;;  %437 = vmatprep.subr.bf16.mxu1 %v473_v9  ;;  %v467_v55 = vld [vmem:[%s650_s12 + $0x8] sm:$0xff]  }
   0x5   :  { %v56_v3 = vsel %vm55_vm0, %v52_v2, 0.0  ;;  %v396_v18 = vld [vmem:[%s644_s3] ss:$0 sm:$0xff] }
   0x6   :  { %57 = vadd.xlane.f32.xlu0 %v56_v3  ;;  %v464_v23 = vld [vmem:[%s645_s6] sm:$0xff]  }
   0x7   :  { %430 = vmatpush3.bf16.msra.mxu0 %v462_v11  ;;  %438 = vmatpush3.bf16.msra.mxu1 %v464_v23  ;;  %v397_v25 = vld [vmem:[%s647_s5] ss:$0 sm:$0xff] }
   0x8   :  { %443 = vmatprep.subr.bf16.mxu0 %v473_v9  ;;  %451 = vmatprep.subr.bf16.mxu1 %v473_v9  ;;  %v466_v33 = vld [vmem:[%s646_s8] sm:$0xff]  }
   0x9   :  { %v401_v34 = vld [vmem:[%s648_s7] ss:$0 sm:$0xff] }
   0xa   :  { %v405_v42 = vld [vmem:[%s649_s9] ss:$0 sm:$0xff] }
   0xb   :  { %v468_v56 = vld [vmem:[%s650_s12] sm:$0xff]  }
   0xc   :  { %v409_v61 = vld [vmem:[%s651_s10] ss:$0 sm:$0xff] }
   0xd   :  { %v410_v63 = vld [vmem:[%s652_s11] ss:$0 sm:$0xff] }
   0xe   :  { %v411_v3 = vld [vmem:[%s654_s13] ss:$0 sm:$0xff] }
  0x8f   :  { %v58_v4 = vpop.xlane.xlu0 %57 }
  0x90   :  { %v60_v5 = vmul.f32 0.03125, %v58_v4 }
  0x92   :  { %v61_v6 = vsub.f32 %v52_v2, %v60_v5 }
  0x94   :  { %v62_v7 = vmul.f32 %v61_v6, %v61_v6 }
  0x96   :  { %v63_v8 = vsel %vm55_vm0, %v62_v7, 0.0 }
  0x97   :  { %64 = vadd.xlane.f32.xlu0 %v63_v8 }
 0x120   :  { %v65_v12 = vpop.xlane.xlu0 %64 }
 0x121   :  { %v66_v13 = vmul.f32 0.03125, %v65_v12 }
 0x123   :  { %v67_v14 = vadd.f32 1e-05, %v66_v13 }
 0x125   :  { %469 = vrsqrt.f32 %v67_v14 }
 0x132   :  { %v470_v15 = vpop.eup %469 }
 0x133   :  { %v69_v17 = vmul.f32 %v470_v15, %v61_v6 }
 0x135   :  { %v76_v19 = vmul.f32 %v395_v16, %v69_v17 }
 0x137   :  { %v83_v20 = vadd.f32 %v396_v18, %v76_v19 }
 0x139   :  { %v84_v21 = vpack.c.bf16 %v83_v20, %v83_v20 }
 0x13b   :  { %432 = vmatmul.mubr.msk.bf16.vlgmr.msra.gmra.mxu0 %vm55_vm0, %v84_v21 }
 0x13c   :  { %447 = vmatprep.mubr.msk.bf16.mxu0 %vm474_vm1, %v473_v9  ;;  %444 = vmatpush3.bf16.msra.mxu0 %v465_v24 }
 0x13d   :  { %445 = vmatprep.subr.bf16.mxu0 %v473_v9 }
 0x140   :  { %446 = vmatpush3.bf16.msra.mxu0 %v466_v33 }
 0x1fb   :  { %v145_v26 = vpop.f32.mrf.mxu0 }
 0x1fc   :  { %v146_v27 = vadd.f32 %v397_v25, %v145_v26 }
 0x1fd   :  { %v433_v28 = vpop.f32.mrf.mxu0 }
 0x1fe   :  { %v151_v29 = vmax.f32 %v146_v27, 0.0 }
 0x1ff   :  { %v148_v30 = vpop.f32.mrf.mxu0 }
 0x200   :  { %v152_v31 = vpack.c.bf16 %v151_v29, %v151_v29 }
 0x201   :  { %v434_v32 = vpop.f32.mrf.mxu0 }
 0x202   :  { %440 = vmatmul.mubr.msk.bf16.vlgmr.msra.gmra.mxu1 %vm55_vm0, %v152_v31 }
 0x203   :  { %455 = vmatprep.mubr.msk.bf16.mxu1 %vm474_vm1, %v473_v9  ;;  %452 = vmatpush3.bf16.msra.mxu1 %v467_v55 }
 0x204   :  { %453 = vmatprep.subr.bf16.mxu1 %v473_v9 }
 0x207   :  { %454 = vmatpush3.bf16.msra.mxu1 %v468_v56 }
 0x2c2   :  { %v213_v35 = vpop.f32.mrf.mxu1 }
 0x2c3   :  { %v214_v36 = vadd.f32 %v401_v34, %v213_v35 }
 0x2c4   :  { %v441_v37 = vpop.f32.mrf.mxu1 }
 0x2c5   :  { %v219_v38 = vmax.f32 %v214_v36, 0.0 }
 0x2c6   :  { %v216_v39 = vpop.f32.mrf.mxu1 }
 0x2c7   :  { %v220_v40 = vpack.c.bf16 %v219_v38, %v219_v38 }
 0x2c8   :  { %v442_v41 = vpop.f32.mrf.mxu1 }
 0x2c9   :  { %448 = vmatmul.mubr.msk.bf16.vlgmr.msra.gmra.mxu0 %vm55_vm0, %v220_v40 }
 0x389   :  { %v281_v43 = vpop.f32.mrf.mxu0 }
 0x38a   :  { %v282_v44 = vadd.f32 %v405_v42, %v281_v43 }
 0x38b   :  { %v449_v45 = vpop.f32.mrf.mxu0 }
 0x38c   :  { %v287_v46 = vadd.f32 %v282_v44, %v83_v20 }
 0x38d   :  { %v284_v47 = vpop.f32.mrf.mxu0 }
 0x38e   :  { %v290_v48 = vsel %vm55_vm0, %v287_v46, 0.0 }
 0x38f   :  { %291 = vadd.xlane.f32.xlu1 %v290_v48  ;;  %v450_v49 = vpop.f32.mrf.mxu0 }
 0x418   :  { %v292_v50 = vpop.xlane.xlu1 %291 }
 0x419   :  { %v293_v51 = vmul.f32 0.03125, %v292_v50 }
 0x41b   :  { %v294_v52 = vsub.f32 %v287_v46, %v293_v51 }
 0x41d   :  { %v295_v53 = vmul.f32 %v294_v52, %v294_v52 }
 0x41f   :  { %v296_v54 = vsel %vm55_vm0, %v295_v53, 0.0 }
 0x420   :  { %297 = vadd.xlane.f32.xlu1 %v296_v54 }
 0x4a9   :  { %v298_v57 = vpop.xlane.xlu1 %297 }
 0x4aa   :  { %v299_v58 = vmul.f32 0.03125, %v298_v57 }
 0x4ac   :  { %v300_v59 = vadd.f32 1e-05, %v299_v58 }
 0x4ae   :  { %471 = vrsqrt.f32 %v300_v59 }
 0x4bb   :  { %v472_v60 = vpop.eup %471 }
 0x4bc   :  { %v302_v62 = vmul.f32 %v472_v60, %v294_v52 }
 0x4be   :  { %v309_v0 = vmul.f32 %v409_v61, %v302_v62 }
 0x4c0   :  { %v316_v1 = vadd.f32 %v410_v63, %v309_v0 }
 0x4c2   :  { %317 = vst.msk [vmem:[%s653_s14] sm:$0xff] %vm55_vm0, %v316_v1  ;;  %v318_v2 = vpack.c.bf16 %v316_v1, %v316_v1 }
 0x4c4   :  { %456 = vmatmul.mubr.msk.bf16.vlgmr.msra.gmra.mxu1 %vm55_vm0, %v318_v2 }
 0x584   :  { %v379_v4 = vpop.f32.mrf.mxu1 }
 0x585   :  { %v380_v5 = vadd.f32 %v411_v3, %v379_v4 }
 0x586   :  { %v457_v6 = vpop.f32.mrf.mxu1 }
 0x587   :  { %386 = vst.msk [vmem:[%s655_s15] sm:$0xff] %vm385_vm2, %v380_v5 }
 0x588   :  { %v382_v7 = vpop.f32.mrf.mxu1 }
 0x58a   :  { %v458_v8 = vpop.f32.mrf.mxu1 }

// kernel: structure_module_forward.19
= control target key start
LH: loop header
LB: loop body
LE: loop exit
PB: predicated region body
PF: predicated region fallthrough
CT: control target
= control target key end

     0   :  { %vm56_vm0 = vcmask 261120   ;;  %s675_s0 = inlined_call_operand.vmem [shape: f32[8,32], index: 0, kind: input, shape index: {}]   ;;  %s676_s1 = inlined_call_operand.vmem [shape: f32[8,32], index: 1, kind: input, shape index: {}]   ;;  %s677_s2 = inlined_call_operand.vmem [shape: f32[1,32], index: 2, kind: input, shape index: {}, may-alias: {2,10}]   ;;  %s678_s3 = inlined_call_operand.vmem [shape: f32[1,32], index: 3, kind: input, shape index: {}, may-alias: {3,11}]   ;;  %s679_s4 = inlined_call_operand.vmem [shape: bf16[1,32,32], index: 4, kind: input, shape index: {}]   ;;  %s680_s5 = inlined_call_operand.vmem [shape: f32[1,1,32], index: 5, kind: input, shape index: {}]   ;;  %s681_s6 = inlined_call_operand.vmem [shape: bf16[1,32,32], index: 6, kind: input, shape index: {}]   ;;  %s682_s7 = inlined_call_operand.vmem [shape: f32[1,1,32], index: 7, kind: input, shape index: {}]   ;;  %s683_s8 = inlined_call_operand.vmem [shape: bf16[1,32,32], index: 8, kind: input, shape index: {}]   ;;  %s684_s9 = inlined_call_operand.vmem [shape: f32[1,1,32], index: 9, kind: input, shape index: {}]   ;;  %s685_s10 = inlined_call_operand.vmem [shape: f32[1,32], index: 10, kind: input, shape index: {}, may-alias: {2,10}]   ;;  %s686_s11 = inlined_call_operand.vmem [shape: f32[1,32], index: 11, kind: input, shape index: {}, may-alias: {3,11}]   ;;  %s687_s12 = inlined_call_operand.vmem [shape: bf16[32,6], index: 12, kind: input, shape index: {}]   ;;  %s688_s13 = inlined_call_operand.vmem [shape: f32[1,6], index: 13, kind: input, shape index: {}]   ;;  %s689_s14 = inlined_call_operand.hbm [shape: f32[8,32], index: 14, kind: output, shape index: {0}]   ;;  %s690_s15 = inlined_call_operand.vmem [shape: f32[8,6], index: 15, kind: output, shape index: {1}]  }
   0x1   :  { %v51_v0 = vld [vmem:[%s675_s0] sm:$0xff] }
   0x2   :  { %v52_v1 = vld [vmem:[%s676_s1] sm:$0xff] }
   0x3   :  { %v53_v2 = vadd.f32 %v52_v1, %v51_v0 }
   0x5   :  { %v57_v3 = vsel %vm56_vm0, %v53_v2, 0.0 }
   0x6   :  { %58 = vadd.xlane.f32.xlu0 %v57_v3 }
   0x7   :  { %21 = vsyncpa [#allocation3], 0  ;;  %v473_v9 = vld [vmem:[%s679_s4 + $0x8] sm:$0xff]   ;;  %v507_v10 = vmov 0.0   ;;  %vm508_vm1 = vmmov 0   ;;  %v474_v11 = vld [vmem:[%s679_s4] sm:$0xff]  }
   0x8   :  { %438 = vmatprep.subr.bf16.mxu0 %v507_v10  ;;  %442 = vmatprep.mubr.msk.bf16.mxu0 %vm508_vm1, %v507_v10  ;;  %v406_v16 = vld [vmem:[%s677_s2] ss:$0 sm:$0xff]  ;;  %v475_v22 = vld [vmem:[%s681_s6 + $0x8] sm:$0xff]  }
   0x9   :  { %439 = vmatpush3.bf16.msra.mxu0 %v473_v9  ;;  %446 = vmatprep.subr.bf16.mxu1 %v507_v10  ;;  %v407_v18 = vld [vmem:[%s678_s3] ss:$0 sm:$0xff]  ;;  %v477_v24 = vld [vmem:[%s683_s8 + $0x8] sm:$0xff]  }
   0xa   :  { %440 = vmatprep.subr.bf16.mxu0 %v507_v10  ;;  %450 = vmatprep.mubr.msk.bf16.mxu1 %vm508_vm1, %v507_v10  ;;  %v476_v23 = vld [vmem:[%s681_s6] sm:$0xff]   ;;  %v479_v55 = vld [vmem:[%s687_s12 + $0x8] sm:$0xff]  }
   0xb   :  { %447 = vmatpush3.bf16.msra.mxu1 %v475_v22  ;;  %v408_v25 = vld [vmem:[%s680_s5] ss:$0 sm:$0xff] }
   0xc   :  { %448 = vmatprep.subr.bf16.mxu1 %v507_v10  ;;  %v478_v33 = vld [vmem:[%s683_s8] sm:$0xff]  }
   0xd   :  { %441 = vmatpush3.bf16.msra.mxu0 %v474_v11  ;;  %v412_v34 = vld [vmem:[%s682_s7] ss:$0 sm:$0xff] }
   0xe   :  { %454 = vmatprep.subr.bf16.mxu0 %v507_v10  ;;  %v416_v42 = vld [vmem:[%s684_s9] ss:$0 sm:$0xff] }
   0xf   :  { %449 = vmatpush3.bf16.msra.mxu1 %v476_v23  ;;  %v480_v56 = vld [vmem:[%s687_s12] sm:$0xff]   ;;  %s509_s12 = smov [#allocation2]  }
  0x10   :  { %462 = vmatprep.subr.bf16.mxu1 %v507_v10  ;;  %v420_v61 = vld [vmem:[%s685_s10] ss:$0 sm:$0xff]  ;;  %s394_s25 = sshll.u32 %s509_s12, 4  ;;  %s395_s25 = int_to_ptr.vmem [resolvable:$true] %s394_s25 }
  0x11   :  { %v421_v63 = vld [vmem:[%s686_s11] ss:$0 sm:$0xff]  ;;  %s485_s4 = scalar_lea.vmem %s395_s25, 128  ;;  %p490_p1 = scmp.lt.s32.totalorder %s395_s25, %s395_s25 }
  0x12   :  { %p486_p0 = scmp.ne.s32.totalorder %s395_s25, %s485_s4  ;;  %p491_p2 = scmp.lt.s32.totalorder %s485_s4, %s485_s4 }
  0x14   :  { %p492_p3 = por %p491_p2, %p490_p1 }
  0x16   :  { %p493_p4 = pnand %p492_p3, %p486_p0 }
  0x8f   :  { %v59_v4 = vpop.xlane.xlu0 %58 }
  0x90   :  { %v61_v5 = vmul.f32 0.03125, %v59_v4 }
  0x92   :  { %v62_v6 = vsub.f32 %v53_v2, %v61_v5 }
  0x94   :  { %v63_v7 = vmul.f32 %v62_v6, %v62_v6 }
  0x96   :  { %v64_v8 = vsel %vm56_vm0, %v63_v7, 0.0 }
  0x97   :  { %65 = vadd.xlane.f32.xlu0 %v64_v8 }
 0x120   :  { %v66_v12 = vpop.xlane.xlu0 %65 }
 0x121   :  { %v67_v13 = vmul.f32 0.03125, %v66_v12 }
 0x123   :  { %v68_v14 = vadd.f32 1e-05, %v67_v13 }
 0x125   :  { %481 = vrsqrt.f32 %v68_v14 }
 0x132   :  { %v482_v15 = vpop.eup %481 }
 0x133   :  { %v70_v17 = vmul.f32 %v482_v15, %v62_v6 }
 0x135   :  { %v77_v19 = vmul.f32 %v406_v16, %v70_v17 }
 0x137   :  { %v84_v20 = vadd.f32 %v407_v18, %v77_v19 }
 0x139   :  { %v85_v21 = vpack.c.bf16 %v84_v20, %v84_v20 }
 0x13b   :  { %443 = vmatmul.mubr.msk.bf16.vlgmr.msra.gmra.mxu0 %vm56_vm0, %v85_v21 }
 0x13c   :  { %458 = vmatprep.mubr.msk.bf16.mxu0 %vm508_vm1, %v507_v10  ;;  %455 = vmatpush3.bf16.msra.mxu0 %v477_v24 }
 0x13d   :  { %456 = vmatprep.subr.bf16.mxu0 %v507_v10 }
 0x140   :  { %457 = vmatpush3.bf16.msra.mxu0 %v478_v33 }
 0x1fb   :  { %v146_v26 = vpop.f32.mrf.mxu0 }
 0x1fc   :  { %v147_v27 = vadd.f32 %v408_v25, %v146_v26 }
 0x1fd   :  { %v444_v28 = vpop.f32.mrf.mxu0 }
 0x1fe   :  { %v152_v29 = vmax.f32 %v147_v27, 0.0 }
 0x1ff   :  { %v149_v30 = vpop.f32.mrf.mxu0 }
 0x200   :  { %v153_v31 = vpack.c.bf16 %v152_v29, %v152_v29 }
 0x201   :  { %v445_v32 = vpop.f32.mrf.mxu0 }
 0x202   :  { %451 = vmatmul.mubr.msk.bf16.vlgmr.msra.gmra.mxu1 %vm56_vm0, %v153_v31 }
 0x203   :  { %466 = vmatprep.mubr.msk.bf16.mxu1 %vm508_vm1, %v507_v10  ;;  %463 = vmatpush3.bf16.msra.mxu1 %v479_v55 }
 0x204   :  { %464 = vmatprep.subr.bf16.mxu1 %v507_v10 }
 0x207   :  { %465 = vmatpush3.bf16.msra.mxu1 %v480_v56 }
 0x2c2   :  { %v214_v35 = vpop.f32.mrf.mxu1 }
 0x2c3   :  { %v215_v36 = vadd.f32 %v412_v34, %v214_v35 }
 0x2c4   :  { %v452_v37 = vpop.f32.mrf.mxu1 }
 0x2c5   :  { %v220_v38 = vmax.f32 %v215_v36, 0.0 }
 0x2c6   :  { %v217_v39 = vpop.f32.mrf.mxu1 }
 0x2c7   :  { %v221_v40 = vpack.c.bf16 %v220_v38, %v220_v38 }
 0x2c8   :  { %v453_v41 = vpop.f32.mrf.mxu1 }
 0x2c9   :  { %459 = vmatmul.mubr.msk.bf16.vlgmr.msra.gmra.mxu0 %vm56_vm0, %v221_v40 }
 0x389   :  { %v282_v43 = vpop.f32.mrf.mxu0 }
 0x38a   :  { %v283_v44 = vadd.f32 %v416_v42, %v282_v43 }
 0x38b   :  { %v460_v45 = vpop.f32.mrf.mxu0 }
 0x38c   :  { %v288_v46 = vadd.f32 %v283_v44, %v84_v20 }
 0x38d   :  { %v285_v47 = vpop.f32.mrf.mxu0 }
 0x38e   :  { %v291_v48 = vsel %vm56_vm0, %v288_v46, 0.0 }
 0x38f   :  { %292 = vadd.xlane.f32.xlu1 %v291_v48  ;;  %v461_v49 = vpop.f32.mrf.mxu0 }
 0x418   :  { %v293_v50 = vpop.xlane.xlu1 %292 }
 0x419   :  { %v294_v51 = vmul.f32 0.03125, %v293_v50 }
 0x41b   :  { %v295_v52 = vsub.f32 %v288_v46, %v294_v51 }
 0x41d   :  { %v296_v53 = vmul.f32 %v295_v52, %v295_v52 }
 0x41f   :  { %v297_v54 = vsel %vm56_vm0, %v296_v53, 0.0 }
 0x420   :  { %298 = vadd.xlane.f32.xlu1 %v297_v54 }
 0x4a9   :  { %v299_v57 = vpop.xlane.xlu1 %298 }
 0x4aa   :  { %v300_v58 = vmul.f32 0.03125, %v299_v57 }
 0x4ac   :  { %v301_v59 = vadd.f32 1e-05, %v300_v58 }
 0x4ae   :  { %483 = vrsqrt.f32 %v301_v59 }
 0x4bb   :  { %v484_v60 = vpop.eup %483 }
 0x4bc   :  { %v303_v62 = vmul.f32 %v484_v60, %v295_v52 }
 0x4be   :  { %v310_v0 = vmul.f32 %v420_v61, %v303_v62 }
 0x4c0   :  { %v317_v1 = vadd.f32 %v421_v63, %v310_v0 }
 0x4c2   :  { %v319_v2 = vpack.c.bf16 %v317_v1, %v317_v1  ;;  %318 = vst.msk [vmem:[#allocation2] sm:$0xff] %vm56_vm0, %v317_v1 }
 0x4c4   :  { %467 = vmatmul.mubr.msk.bf16.vlgmr.msra.gmra.mxu1 %vm56_vm0, %v319_v2 }
 0x4c5   :  { %496 = shalt.err (!%p493_p4)
}
 0x4c6   :  { %397 = dma.vmem_to_hbm [thread:$0]  %s395_s25, 128, %s689_s14, [#allocation3]   ;;  %v422_v3 = vld [vmem:[%s688_s13] ss:$0 sm:$0xff]  ;;  %vm386_vm2 = vcmask 48128  }
 0x584   :  { %v380_v4 = vpop.f32.mrf.mxu1 }
 0x585   :  { %v381_v5 = vadd.f32 %v422_v3, %v380_v4 }
 0x586   :  { %v468_v6 = vpop.f32.mrf.mxu1 }
 0x587   :  { %387 = vst.msk [vmem:[%s690_s15] sm:$0xff] %vm386_vm2, %v381_v5 }
 0x588   :  { %v383_v7 = vpop.f32.mrf.mxu1 }
 0x58a   :  { %v469_v8 = vpop.f32.mrf.mxu1 }
 0x58b   :  { %505 = dma.done.wait [#allocation3], 128  }
 0x58c   :  { %506 = vsyncadd [#allocation3], 4294967168 }
 0x58d   :  { %405 = vsyncpa [#allocation3], 1 }

</bundles_post_ra>
